<compile_context>
chip_gen: v7x
topology: tpu7x:2x2x1
jax: 0.10.0
libtpu: 0.0.40
codegen_flags: <defaults>
</compile_context>

<pallas_src>
import math
import functools

import jax
import jax.numpy as jnp
from jax import lax
from jax.experimental import pallas as pl
from jax.experimental.pallas import tpu as pltpu

NEG_INF = -1e30  # large-negative stand-in for -inf (rows are never fully masked)


# --------------------------------------------------------------------------
# In-kernel helpers
# --------------------------------------------------------------------------
def _layernorm(x, gamma, beta, eps=1e-5):
    # x: (S, D); gamma/beta: (1, D)  (PyTorch nn.LayerNorm semantics, biased var)
    mu = jnp.mean(x, axis=-1, keepdims=True)
    var = jnp.mean((x - mu) ** 2, axis=-1, keepdims=True)
    return (x - mu) * lax.rsqrt(var + eps) * gamma + beta


def _attention(xq_ln, xkv, kv_len, wq, bq, wkv, bkv, wo, bo, residual,
               *, n_heads, d_q, d_v, causal):
    """Multi-head attention on one batch element, heads batched on a leading dim."""
    bf16 = jnp.bfloat16
    # QKV projections: bf16 inputs, f32 accumulation.
    q = jnp.dot(xq_ln.astype(bf16), wq, preferred_element_type=jnp.float32) + bq
    kvp = jnp.dot(xkv.astype(bf16), wkv, preferred_element_type=jnp.float32) + bkv
    k = kvp[:, : n_heads * d_q]
    v = kvp[:, n_heads * d_q:]

    sq = xq_ln.shape[0]
    skv = xkv.shape[0]

    # One-time relayout to (H, S, d): heads on the leading (major) axis so the
    # score / context matmuls are a single head-batched einsum each.
    qh = jnp.stack([q[:, h * d_q:(h + 1) * d_q] for h in range(n_heads)], axis=0)
    kh = jnp.stack([k[:, h * d_q:(h + 1) * d_q] for h in range(n_heads)], axis=0)
    vh = jnp.stack([v[:, h * d_v:(h + 1) * d_v] for h in range(n_heads)], axis=0)

    scale = 1.0 / math.sqrt(d_q)
    s = jnp.einsum('hqd,hkd->hqk', qh.astype(bf16), kh.astype(bf16),
                   preferred_element_type=jnp.float32) * scale

    key_ids = lax.broadcasted_iota(jnp.int32, (n_heads, sq, skv), 2)
    mask = key_ids < kv_len
    if causal:  # in_decoder & self-attention
        q_ids = lax.broadcasted_iota(jnp.int32, (n_heads, sq, skv), 1)
        mask = jnp.logical_and(mask, key_ids <= q_ids)
    s = jnp.where(mask, s, NEG_INF)

    m = jnp.max(s, axis=-1, keepdims=True)
    p = jnp.exp(s - m)
    p = p * pl.reciprocal(jnp.sum(p, axis=-1, keepdims=True), approx=True)

    ctx = jnp.einsum('hqk,hkd->hqd', p.astype(bf16), vh.astype(bf16),
                     preferred_element_type=jnp.float32)          # (H, Sq, dv)
    ctx_all = jnp.concatenate([ctx[h] for h in range(n_heads)], axis=-1)  # (Sq, H*dv)

    # Single fused output projection over all heads.
    out = jnp.dot(ctx_all.astype(bf16), wo, preferred_element_type=jnp.float32)
    return residual + out + bo


# --------------------------------------------------------------------------
# Fused decoder-layer kernel: self-attn + cross-attn + FFN (one batch element)
# --------------------------------------------------------------------------
def decoder_layer_kernel(dec_lens_ref, enc_lens_ref,            # scalar prefetch (SMEM)
                         x_ref, enc_ref,                        # (1,Sq,D), (1,Skv,D)
                         sa_ln_g, sa_ln_b, sa_wq, sa_bq, sa_wkv, sa_bkv, sa_wo, sa_bo,
                         ca_ln_g, ca_ln_b, ca_wq, ca_bq, ca_wkv, ca_bkv, ca_wo, ca_bo,
                         ff_ln_g, ff_ln_b, ff_w1, ff_b1, ff_w2, ff_b2,
                         o_ref,                                 # (1,Sq,D)
                         *, n_heads, d_q, d_v):
    b = pl.program_id(0)
    x = x_ref[0]          # (Sq, D) f32 residual stream
    enc = enc_ref[0]      # (Skv, D) f32

    # ---- masked causal self-attention (kv shares the query layer-norm) ----
    xq = _layernorm(x, sa_ln_g[...], sa_ln_b[...])
    x = _attention(xq, xq, dec_lens_ref[b],
                   sa_wq[...], sa_bq[...], sa_wkv[...], sa_bkv[...],
                   sa_wo[...], sa_bo[...], residual=x,
                   n_heads=n_heads, d_q=d_q, d_v=d_v, causal=True)

    # ---- cross-attention over encoder outputs (kv NOT layer-normed) ----
    xq = _layernorm(x, ca_ln_g[...], ca_ln_b[...])
    x = _attention(xq, enc, enc_lens_ref[b],
                   ca_wq[...], ca_bq[...], ca_wkv[...], ca_bkv[...],
                   ca_wo[...], ca_bo[...], residual=x,
                   n_heads=n_heads, d_q=d_q, d_v=d_v, causal=False)

    # ---- position-wise FFN ----
    h = _layernorm(x, ff_ln_g[...], ff_ln_b[...])
    h = jnp.dot(h.astype(jnp.bfloat16), ff_w1[...],
                preferred_element_type=jnp.float32) + ff_b1[...]
    h = jnp.maximum(h, 0.0)
    h = jnp.dot(h.astype(jnp.bfloat16), ff_w2[...],
                preferred_element_type=jnp.float32) + ff_b2[...]
    o_ref[0] = x + h


def decoder_layer(x, enc, dec_lens, enc_lens, lp, *, n_heads, d_q, d_v, d_inner):
    N, Sq, D = x.shape
    Skv = enc.shape[1]
    sa, ca, ff = lp["self_attn"], lp["cross_attn"], lp["ffn"]

    def rep(shape):  # grid-constant (replicated) operand
        return pl.BlockSpec(shape, lambda b, dl, el, _n=len(shape): (0,) * _n)

    attn_specs = [rep((1, D)), rep((1, D)),
                  rep((D, n_heads * d_q)), rep((1, n_heads * d_q)),
                  rep((D, n_heads * (d_q + d_v))), rep((1, n_heads * (d_q + d_v))),
                  rep((n_heads * d_v, D)), rep((1, D))]

    grid_spec = pltpu.PrefetchScalarGridSpec(
        num_scalar_prefetch=2,
        grid=(N,),
        in_specs=[
            pl.BlockSpec((1, Sq, D), lambda b, dl, el: (b, 0, 0)),
            pl.BlockSpec((1, Skv, D), lambda b, dl, el: (b, 0, 0)),
            *attn_specs,            # self-attention params
            *attn_specs,            # cross-attention params
            rep((1, D)), rep((1, D)),
            rep((D, d_inner)), rep((1, d_inner)),
            rep((d_inner, D)), rep((1, D)),
        ],
        out_specs=pl.BlockSpec((1, Sq, D), lambda b, dl, el: (b, 0, 0)),
    )
    kernel = functools.partial(decoder_layer_kernel,
                               n_heads=n_heads, d_q=d_q, d_v=d_v)
    return pl.pallas_call(
        kernel,
        out_shape=jax.ShapeDtypeStruct((N, Sq, D), jnp.float32),
        grid_spec=grid_spec,
        compiler_params=pltpu.CompilerParams(dimension_semantics=("parallel",)),
    )(dec_lens, enc_lens, x, enc,
      sa["ln_g"], sa["ln_b"], sa["wq"], sa["bq"], sa["wkv"], sa["bkv"], sa["wo"], sa["bo"],
      ca["ln_g"], ca["ln_b"], ca["wq"], ca["bq"], ca["wkv"], ca["bkv"], ca["wo"], ca["bo"],
      ff["ln_g"], ff["ln_b"], ff["w1"], ff["b1"], ff["w2"], ff["b2"])


# --------------------------------------------------------------------------
# Final layer-norm + (vocab-tiled) output projection
# --------------------------------------------------------------------------
def final_kernel(x_ref, ln_g_ref, ln_b_ref, w_ref, b_ref, o_ref):
    x = _layernorm(x_ref[0], ln_g_ref[...], ln_b_ref[...])
    o_ref[0] = (jnp.dot(x.astype(jnp.bfloat16), w_ref[...],
                        preferred_element_type=jnp.float32) + b_ref[...])


def _pick_vocab_tile(vocab_size, max_tile=4096):
    # Largest multiple of 128 (<= max_tile) that evenly divides vocab_size;
    # fall back to the full vocab width for small / non-divisible vocabs.
    if vocab_size <= max_tile:
        return vocab_size
    for t in range(max_tile, 127, -128):
        if vocab_size % t == 0:
            return t
    return vocab_size


def final_layer(x, p, *, vocab_size):
    N, S, D = x.shape
    tile_v = _pick_vocab_tile(vocab_size)
    n_v = vocab_size // tile_v

    grid_spec = pl.GridSpec(
        grid=(N, n_v),
        in_specs=[
            pl.BlockSpec((1, S, D), lambda b, v: (b, 0, 0)),
            pl.BlockSpec((1, D), lambda b, v: (0, 0)),
            pl.BlockSpec((1, D), lambda b, v: (0, 0)),
            pl.BlockSpec((D, tile_v), lambda b, v: (0, v)),
            pl.BlockSpec((1, tile_v), lambda b, v: (0, v)),
        ],
        out_specs=pl.BlockSpec((1, S, tile_v), lambda b, v: (b, 0, v)),
    )
    return pl.pallas_call(
        final_kernel,
        out_shape=jax.ShapeDtypeStruct((N, S, vocab_size), jnp.float32),
        grid_spec=grid_spec,
        compiler_params=pltpu.CompilerParams(
            dimension_semantics=("parallel", "parallel")),
    )(x, p["ln_g"], p["ln_b"], p["w"], p["b"])


# --------------------------------------------------------------------------
# Full decoder forward (Pallas kernels + JAX glue)
# --------------------------------------------------------------------------
def decoder_forward(params, dec_ids, dec_lens, enc_seq, enc_lens, cfg):
    D = cfg["d_model"]
    pad_length = dec_ids.shape[1]
    # Embedding gather + scale + positional encoding (glue; dropout is identity).
    x = params["embedding"][dec_ids] * math.sqrt(D) \
        + params["pos_enc"][:, :pad_length, :]
    x = x.astype(jnp.float32)
    enc_seq = enc_seq.astype(jnp.float32)

    for lp in params["layers"]:
        x = decoder_layer(x, enc_seq, dec_lens, enc_lens, lp,
                          n_heads=cfg["n_heads"], d_q=cfg["d_queries"],
                          d_v=cfg["d_values"], d_inner=cfg["d_inner"])

    return final_layer(x, params["final"], vocab_size=cfg["vocab_size"])


# --------------------------------------------------------------------------
# Pure-JAX reference (mirrors the PyTorch forward semantics, f32 math)
# --------------------------------------------------------------------------
def _ref_ln(x, g, b, eps=1e-5):
    mu = x.mean(-1, keepdims=True)
    var = ((x - mu) ** 2).mean(-1, keepdims=True)
    return (x - mu) / jnp.sqrt(var + eps) * g + b


def _f32(w):
    return w.astype(jnp.float32)


def _ref_mha(x, kv, lens, p, n_heads, d_q, d_v, is_self):
    N, Sq, _ = x.shape
    Skv = kv.shape[1]
    res = x
    xq = _ref_ln(x, p["ln_g"][0], p["ln_b"][0])
    xkv = xq if is_self else kv
    Q = xq @ _f32(p["wq"]) + p["bq"][0]
    KV = xkv @ _f32(p["wkv"]) + p["bkv"][0]
    K, V = KV[..., : n_heads * d_q], KV[..., n_heads * d_q:]
    Q = Q.reshape(N, Sq, n_heads, d_q).transpose(0, 2, 1, 3)
    K = K.reshape(N, Skv, n_heads, d_q).transpose(0, 2, 1, 3)
    V = V.reshape(N, Skv, n_heads, d_v).transpose(0, 2, 1, 3)
    s = jnp.einsum('nhqd,nhkd->nhqk', Q, K) / math.sqrt(d_q)
    key_ids = jnp.arange(Skv)[None, None, None, :]
    mask = key_ids < lens[:, None, None, None]
    if is_self:
        q_ids = jnp.arange(Sq)[None, None, :, None]
        mask = mask & (key_ids <= q_ids)
    s = jnp.where(mask, s, NEG_INF)
    a = jax.nn.softmax(s, axis=-1)
    ctx = jnp.einsum('nhqk,nhkd->nhqd', a, V).transpose(0, 2, 1, 3).reshape(N, Sq, -1)
    return ctx @ _f32(p["wo"]) + p["bo"][0] + res


def _ref_ffn(x, p):
    h = _ref_ln(x, p["ln_g"][0], p["ln_b"][0])
    h = jnp.maximum(h @ _f32(p["w1"]) + p["b1"][0], 0.0)
    return h @ _f32(p["w2"]) + p["b2"][0] + x


def decoder_forward_ref(params, dec_ids, dec_lens, enc_seq, enc_lens, cfg):
    D = cfg["d_model"]
    pad_length = dec_ids.shape[1]
    x = params["embedding"][dec_ids] * math.sqrt(D) \
        + params["pos_enc"][:, :pad_length, :]
    for lp in params["layers"]:
        x = _ref_mha(x, x, dec_lens, lp["self_attn"],
                     cfg["n_heads"], cfg["d_queries"], cfg["d_values"], True)
        x = _ref_mha(x, enc_seq, enc_lens, lp["cross_attn"],
                     cfg["n_heads"], cfg["d_queries"], cfg["d_values"], False)
        x = _ref_ffn(x, lp["ffn"])
    fp = params["final"]
    x = _ref_ln(x, fp["ln_g"][0], fp["ln_b"][0])
    return x @ _f32(fp["w"]) + fp["b"][0]


# --------------------------------------------------------------------------
# Deterministic parameter construction (weights bf16, biases / LN / emb f32)
# --------------------------------------------------------------------------
def sinusoidal_pos_enc(max_len, d_model):
    pos = jnp.arange(max_len, dtype=jnp.float32)[:, None]
    i = jnp.arange(d_model, dtype=jnp.float32)[None, :]
    angle = pos / jnp.power(10000.0, (2.0 * jnp.floor(i / 2.0)) / d_model)
    pe = jnp.where(jnp.mod(jnp.arange(d_model), 2) == 0,
                   jnp.sin(angle), jnp.cos(angle))
    return pe[None, :, :]  # (1, max_len, d_model)


def init_params(key, cfg):
    D, H = cfg["d_model"], cfg["n_heads"]
    dq, dv, di, V = cfg["d_queries"], cfg["d_values"], cfg["d_inner"], cfg["vocab_size"]

    def lin(k, fan_in, fan_out):
        w = (jax.random.normal(k, (fan_in, fan_out), jnp.float32) * 0.05
             ).astype(jnp.bfloat16)
        return w, jnp.zeros((1, fan_out), jnp.float32)

    keys = iter(jax.random.split(key, 8 + cfg["n_layers"] * 16))
    params = {
        "embedding": jax.random.normal(next(keys), (V, D), jnp.float32) * 0.05,
        "pos_enc": sinusoidal_pos_enc(cfg["max_len"], D),
        "layers": [],
    }

    def mha_params():
        wq, bq = lin(next(keys), D, H * dq)
        wkv, bkv = lin(next(keys), D, H * (dq + dv))
        wo, bo = lin(next(keys), H * dv, D)
        return {"ln_g": jnp.ones((1, D), jnp.float32),
                "ln_b": jnp.zeros((1, D), jnp.float32),
                "wq": wq, "bq": bq, "wkv": wkv, "bkv": bkv, "wo": wo, "bo": bo}

    def ffn_params():
        w1, b1 = lin(next(keys), D, di)
        w2, b2 = lin(next(keys), di, D)
        return {"ln_g": jnp.ones((1, D), jnp.float32),
                "ln_b": jnp.zeros((1, D), jnp.float32),
                "w1": w1, "b1": b1, "w2": w2, "b2": b2}

    for _ in range(cfg["n_layers"]):
        params["layers"].append({"self_attn": mha_params(),
                                 "cross_attn": mha_params(),
                                 "ffn": ffn_params()})

    wf, bf = lin(next(keys), D, V)
    params["final"] = {"ln_g": jnp.ones((1, D), jnp.float32),
                       "ln_b": jnp.zeros((1, D), jnp.float32),
                       "w": wf, "b": bf}
    return params


# --------------------------------------------------------------------------
if __name__ == "__main__":
    cfg = dict(vocab_size=50, d_model=32, n_heads=4, d_queries=8, d_values=8,
               d_inner=64, n_layers=2, max_len=32)

    key = jax.random.PRNGKey(0)
    k_par, k_ids, k_enc = jax.random.split(key, 3)

    N, S_dec, S_enc = 2, 8, 10
    params = init_params(k_par, cfg)

    dec_ids = jax.random.randint(k_ids, (N, S_dec), 0, cfg["vocab_size"], jnp.int32)
    dec_lens = jnp.array([8, 5], jnp.int32)     # must be > 0 (fully-masked rows unsupported)
    enc_seq = jax.random.normal(k_enc, (N, S_enc, cfg["d_model"]), jnp.float32)
    enc_lens = jnp.array([10, 7], jnp.int32)

    fwd = jax.jit(lambda p, di, dl, es, el: decoder_forward(p, di, dl, es, el, cfg))
    out = fwd(params, dec_ids, dec_lens, enc_seq, enc_lens)
    out = jax.block_until_ready(out)

    ref = decoder_forward_ref(params, dec_ids, dec_lens, enc_seq, enc_lens, cfg)
    assert out.shape == (N, S_dec, cfg["vocab_size"])
    # bf16 matmul inputs + approx softmax reciprocal vs. f32 reference -> loosened tolerance
    max_diff = jnp.max(jnp.abs(out - ref))
    assert jnp.allclose(out, ref, rtol=5e-2, atol=5e-2), f"max abs diff {max_diff}"

    # TODO(synk): dropout layers are identity (eval mode); no RNG dropout in-kernel.
    print("KERNEL_OK")
</pallas_src>

<mosaic_0001>
module attributes {stable_mosaic.version = 11 : i64} {
  func.func @final_kernel(%arg0: i32, %arg1: i32, %arg2: memref<1x8x32xf32, #tpu.memory_space<vmem>>, %arg3: memref<1x32xf32, #tpu.memory_space<vmem>>, %arg4: memref<1x32xf32, #tpu.memory_space<vmem>>, %arg5: memref<32x50xbf16, #tpu.memory_space<vmem>>, %arg6: memref<1x50xf32, #tpu.memory_space<vmem>>, %arg7: memref<1x8x50xf32, #tpu.memory_space<vmem>>) attributes {dimension_semantics = [#tpu.dimension_semantics<parallel>, #tpu.dimension_semantics<parallel>], iteration_bounds = array<i64: 2, 1>, scalar_prefetch = 0 : i64, scratch_operands = 0 : i64, tpu.core_type = #tpu.core_type<tc>, window_params = [{transform_indices = @transform_0, window_bounds = array<i64: 1, 8, 32>}, {pipeline_mode = #tpu.pipeline_mode<synchronous>, transform_indices = @transform_1, window_bounds = array<i64: 1, 32>}, {pipeline_mode = #tpu.pipeline_mode<synchronous>, transform_indices = @transform_2, window_bounds = array<i64: 1, 32>}, {transform_indices = @transform_3, window_bounds = array<i64: 32, 50>}, {transform_indices = @transform_4, window_bounds = array<i64: 1, 50>}, {transform_indices = @transform_5, window_bounds = array<i64: 1, 8, 50>}]} {
    %c0 = arith.constant 0 : index
    %c0_0 = arith.constant 0 : index
    %c0_1 = arith.constant 0 : index
    %0 = vector.load %arg2[%c0, %c0_0, %c0_1] : memref<1x8x32xf32, #tpu.memory_space<vmem>>, vector<1x8x32xf32>
    %1 = vector.shape_cast %0 : vector<1x8x32xf32> to vector<8x32xf32>
    %c0_2 = arith.constant 0 : index
    %c0_3 = arith.constant 0 : index
    %2 = vector.load %arg3[%c0_2, %c0_3] : memref<1x32xf32, #tpu.memory_space<vmem>>, vector<1x32xf32>
    %c0_4 = arith.constant 0 : index
    %c0_5 = arith.constant 0 : index
    %3 = vector.load %arg4[%c0_4, %c0_5] : memref<1x32xf32, #tpu.memory_space<vmem>>, vector<1x32xf32>
    %cst = arith.constant dense<0.000000e+00> : vector<8xf32>
    %4 = vector.multi_reduction <add>, %1, %cst [1] : vector<8x32xf32> to vector<8xf32>
    %5 = vector.shape_cast %4 : vector<8xf32> to vector<8x1xf32>
    %cst_6 = arith.constant 3.200000e+01 : f32
    %6 = vector.broadcast %cst_6 : f32 to vector<8x1xf32>
    %7 = arith.divf %5, %6 : vector<8x1xf32>
    %8 = vector.broadcast %7 : vector<8x1xf32> to vector<8x32xf32>
    %9 = arith.subf %1, %8 : vector<8x32xf32>
    %10 = arith.mulf %9, %9 : vector<8x32xf32>
    %cst_7 = arith.constant dense<0.000000e+00> : vector<8xf32>
    %11 = vector.multi_reduction <add>, %10, %cst_7 [1] : vector<8x32xf32> to vector<8xf32>
    %12 = vector.shape_cast %11 : vector<8xf32> to vector<8x1xf32>
    %cst_8 = arith.constant 3.200000e+01 : f32
    %13 = vector.broadcast %cst_8 : f32 to vector<8x1xf32>
    %14 = arith.divf %12, %13 : vector<8x1xf32>
    %15 = vector.broadcast %7 : vector<8x1xf32> to vector<8x32xf32>
    %16 = arith.subf %1, %15 : vector<8x32xf32>
    %cst_9 = arith.constant 9.99999974E-6 : f32
    %17 = vector.broadcast %cst_9 : f32 to vector<8x1xf32>
    %18 = arith.addf %14, %17 : vector<8x1xf32>
    %19 = math.rsqrt %18 : vector<8x1xf32>
    %20 = vector.broadcast %19 : vector<8x1xf32> to vector<8x32xf32>
    %21 = arith.mulf %16, %20 : vector<8x32xf32>
    %22 = vector.broadcast %2 : vector<1x32xf32> to vector<8x32xf32>
    %23 = arith.mulf %21, %22 : vector<8x32xf32>
    %24 = vector.broadcast %3 : vector<1x32xf32> to vector<8x32xf32>
    %25 = arith.addf %23, %24 : vector<8x32xf32>
    %26 = arith.truncf %25 : vector<8x32xf32> to vector<8x32xbf16>
    %c0_10 = arith.constant 0 : index
    %c0_11 = arith.constant 0 : index
    %27 = vector.load %arg5[%c0_10, %c0_11] : memref<32x50xbf16, #tpu.memory_space<vmem>>, vector<32x50xbf16>
    %cst_12 = arith.constant dense<0.000000e+00> : vector<8x50xf32>
    %28 = tpu.matmul %26, %27, %cst_12 {dimension_numbers = #tpu.dot_dimension_numbers<[1], [0], [0], [1], [0, 0, 1, 1], [], []>} : vector<8x32xbf16>, vector<32x50xbf16>, vector<8x50xf32> -> vector<8x50xf32>
    %c0_13 = arith.constant 0 : index
    %c0_14 = arith.constant 0 : index
    %29 = vector.load %arg6[%c0_13, %c0_14] : memref<1x50xf32, #tpu.memory_space<vmem>>, vector<1x50xf32>
    %30 = vector.broadcast %29 : vector<1x50xf32> to vector<8x50xf32>
    %31 = arith.addf %28, %30 : vector<8x50xf32>
    %c0_15 = arith.constant 0 : index
    %c0_16 = arith.constant 0 : index
    %c0_17 = arith.constant 0 : index
    %32 = vector.load %arg7[%c0_15, %c0_16, %c0_17] : memref<1x8x50xf32, #tpu.memory_space<vmem>>, vector<1x8x50xf32>
    %33 = vector.shape_cast %32 : vector<1x8x50xf32> to vector<8x50xf32>
    %34 = vector.shape_cast %31 : vector<8x50xf32> to vector<1x8x50xf32>
    tpu.vector_store %arg7[%c0_15, %c0_16, %c0_17], %34 {strides = array<i32>} : memref<1x8x50xf32, #tpu.memory_space<vmem>>, vector<1x8x50xf32>,
    return
  }
  func.func @transform_0(%arg0: i32, %arg1: i32) -> (i32, i32, i32) {
    %c0_i32 = arith.constant 0 : i32
    %c0_i32_0 = arith.constant 0 : i32
    %c0_i32_1 = arith.constant 0 : i32
    return %arg0, %c0_i32, %c0_i32_0 : i32, i32, i32
  }
  func.func @transform_1(%arg0: i32, %arg1: i32) -> (i32, i32) {
    %c0_i32 = arith.constant 0 : i32
    %c0_i32_0 = arith.constant 0 : i32
    %c0_i32_1 = arith.constant 0 : i32
    return %c0_i32, %c0_i32_0 : i32, i32
  }
  func.func @transform_2(%arg0: i32, %arg1: i32) -> (i32, i32) {
    %c0_i32 = arith.constant 0 : i32
    %c0_i32_0 = arith.constant 0 : i32
    %c0_i32_1 = arith.constant 0 : i32
    return %c0_i32, %c0_i32_0 : i32, i32
  }
  func.func @transform_3(%arg0: i32, %arg1: i32) -> (i32, i32) {
    %c0_i32 = arith.constant 0 : i32
    %c0_i32_0 = arith.constant 0 : i32
    return %c0_i32, %arg1 : i32, i32
  }
  func.func @transform_4(%arg0: i32, %arg1: i32) -> (i32, i32) {
    %c0_i32 = arith.constant 0 : i32
    %c0_i32_0 = arith.constant 0 : i32
    return %c0_i32, %arg1 : i32, i32
  }
  func.func @transform_5(%arg0: i32, %arg1: i32) -> (i32, i32, i32) {
    %c0_i32 = arith.constant 0 : i32
    %c0_i32_0 = arith.constant 0 : i32
    return %arg0, %c0_i32, %arg1 : i32, i32, i32
  }
}

module attributes {stable_mosaic.version = 11 : i64} {
  func.func @decoder_layer_kernel(%arg0: i32, %arg1: memref<2xi32, #tpu.memory_space<smem>>, %arg2: memref<2xi32, #tpu.memory_space<smem>>, %arg3: memref<1x8x32xf32, #tpu.memory_space<vmem>>, %arg4: memref<1x10x32xf32, #tpu.memory_space<vmem>>, %arg5: memref<1x32xf32, #tpu.memory_space<vmem>>, %arg6: memref<1x32xf32, #tpu.memory_space<vmem>>, %arg7: memref<32x32xbf16, #tpu.memory_space<vmem>>, %arg8: memref<1x32xf32, #tpu.memory_space<vmem>>, %arg9: memref<32x64xbf16, #tpu.memory_space<vmem>>, %arg10: memref<1x64xf32, #tpu.memory_space<vmem>>, %arg11: memref<32x32xbf16, #tpu.memory_space<vmem>>, %arg12: memref<1x32xf32, #tpu.memory_space<vmem>>, %arg13: memref<1x32xf32, #tpu.memory_space<vmem>>, %arg14: memref<1x32xf32, #tpu.memory_space<vmem>>, %arg15: memref<32x32xbf16, #tpu.memory_space<vmem>>, %arg16: memref<1x32xf32, #tpu.memory_space<vmem>>, %arg17: memref<32x64xbf16, #tpu.memory_space<vmem>>, %arg18: memref<1x64xf32, #tpu.memory_space<vmem>>, %arg19: memref<32x32xbf16, #tpu.memory_space<vmem>>, %arg20: memref<1x32xf32, #tpu.memory_space<vmem>>, %arg21: memref<1x32xf32, #tpu.memory_space<vmem>>, %arg22: memref<1x32xf32, #tpu.memory_space<vmem>>, %arg23: memref<32x64xbf16, #tpu.memory_space<vmem>>, %arg24: memref<1x64xf32, #tpu.memory_space<vmem>>, %arg25: memref<64x32xbf16, #tpu.memory_space<vmem>>, %arg26: memref<1x32xf32, #tpu.memory_space<vmem>>, %arg27: memref<1x8x32xf32, #tpu.memory_space<vmem>>) attributes {dimension_semantics = [#tpu.dimension_semantics<parallel>], iteration_bounds = array<i64: 2>, scalar_prefetch = 2 : i64, scratch_operands = 0 : i64, tpu.core_type = #tpu.core_type<tc>, window_params = [{transform_indices = @transform_0, window_bounds = array<i64: 1, 8, 32>}, {transform_indices = @transform_1, window_bounds = array<i64: 1, 10, 32>}, {pipeline_mode = #tpu.pipeline_mode<synchronous>, transform_indices = @transform_2, window_bounds = array<i64: 1, 32>}, {pipeline_mode = #tpu.pipeline_mode<synchronous>, transform_indices = @transform_3, window_bounds = array<i64: 1, 32>}, {pipeline_mode = #tpu.pipeline_mode<synchronous>, transform_indices = @transform_4, window_bounds = array<i64: 32, 32>}, {pipeline_mode = #tpu.pipeline_mode<synchronous>, transform_indices = @transform_5, window_bounds = array<i64: 1, 32>}, {pipeline_mode = #tpu.pipeline_mode<synchronous>, transform_indices = @transform_6, window_bounds = array<i64: 32, 64>}, {pipeline_mode = #tpu.pipeline_mode<synchronous>, transform_indices = @transform_7, window_bounds = array<i64: 1, 64>}, {pipeline_mode = #tpu.pipeline_mode<synchronous>, transform_indices = @transform_8, window_bounds = array<i64: 32, 32>}, {pipeline_mode = #tpu.pipeline_mode<synchronous>, transform_indices = @transform_9, window_bounds = array<i64: 1, 32>}, {pipeline_mode = #tpu.pipeline_mode<synchronous>, transform_indices = @transform_10, window_bounds = array<i64: 1, 32>}, {pipeline_mode = #tpu.pipeline_mode<synchronous>, transform_indices = @transform_11, window_bounds = array<i64: 1, 32>}, {pipeline_mode = #tpu.pipeline_mode<synchronous>, transform_indices = @transform_12, window_bounds = array<i64: 32, 32>}, {pipeline_mode = #tpu.pipeline_mode<synchronous>, transform_indices = @transform_13, window_bounds = array<i64: 1, 32>}, {pipeline_mode = #tpu.pipeline_mode<synchronous>, transform_indices = @transform_14, window_bounds = array<i64: 32, 64>}, {pipeline_mode = #tpu.pipeline_mode<synchronous>, transform_indices = @transform_15, window_bounds = array<i64: 1, 64>}, {pipeline_mode = #tpu.pipeline_mode<synchronous>, transform_indices = @transform_16, window_bounds = array<i64: 32, 32>}, {pipeline_mode = #tpu.pipeline_mode<synchronous>, transform_indices = @transform_17, window_bounds = array<i64: 1, 32>}, {pipeline_mode = #tpu.pipeline_mode<synchronous>, transform_indices = @transform_18, window_bounds = array<i64: 1, 32>}, {pipeline_mode = #tpu.pipeline_mode<synchronous>, transform_indices = @transform_19, window_bounds = array<i64: 1, 32>}, {pipeline_mode = #tpu.pipeline_mode<synchronous>, transform_indices = @transform_20, window_bounds = array<i64: 32, 64>}, {pipeline_mode = #tpu.pipeline_mode<synchronous>, transform_indices = @transform_21, window_bounds = array<i64: 1, 64>}, {pipeline_mode = #tpu.pipeline_mode<synchronous>, transform_indices = @transform_22, window_bounds = array<i64: 64, 32>}, {pipeline_mode = #tpu.pipeline_mode<synchronous>, transform_indices = @transform_23, window_bounds = array<i64: 1, 32>}, {transform_indices = @transform_24, window_bounds = array<i64: 1, 8, 32>}]} {
    %c0 = arith.constant 0 : index
    %c0_0 = arith.constant 0 : index
    %c0_1 = arith.constant 0 : index
    %0 = vector.load %arg3[%c0, %c0_0, %c0_1] : memref<1x8x32xf32, #tpu.memory_space<vmem>>, vector<1x8x32xf32>
    %1 = vector.shape_cast %0 : vector<1x8x32xf32> to vector<8x32xf32>
    %c0_2 = arith.constant 0 : index
    %c0_3 = arith.constant 0 : index
    %c0_4 = arith.constant 0 : index
    %2 = vector.load %arg4[%c0_2, %c0_3, %c0_4] : memref<1x10x32xf32, #tpu.memory_space<vmem>>, vector<1x10x32xf32>
    %3 = vector.shape_cast %2 : vector<1x10x32xf32> to vector<10x32xf32>
    %c0_5 = arith.constant 0 : index
    %c0_6 = arith.constant 0 : index
    %4 = vector.load %arg5[%c0_5, %c0_6] : memref<1x32xf32, #tpu.memory_space<vmem>>, vector<1x32xf32>
    %c0_7 = arith.constant 0 : index
    %c0_8 = arith.constant 0 : index
    %5 = vector.load %arg6[%c0_7, %c0_8] : memref<1x32xf32, #tpu.memory_space<vmem>>, vector<1x32xf32>
    %cst = arith.constant dense<0.000000e+00> : vector<8xf32>
    %6 = vector.multi_reduction <add>, %1, %cst [1] : vector<8x32xf32> to vector<8xf32>
    %7 = vector.shape_cast %6 : vector<8xf32> to vector<8x1xf32>
    %cst_9 = arith.constant 3.200000e+01 : f32
    %8 = vector.broadcast %cst_9 : f32 to vector<8x1xf32>
    %9 = arith.divf %7, %8 : vector<8x1xf32>
    %10 = vector.broadcast %9 : vector<8x1xf32> to vector<8x32xf32>
    %11 = arith.subf %1, %10 : vector<8x32xf32>
    %12 = arith.mulf %11, %11 : vector<8x32xf32>
    %cst_10 = arith.constant dense<0.000000e+00> : vector<8xf32>
    %13 = vector.multi_reduction <add>, %12, %cst_10 [1] : vector<8x32xf32> to vector<8xf32>
    %14 = vector.shape_cast %13 : vector<8xf32> to vector<8x1xf32>
    %cst_11 = arith.constant 3.200000e+01 : f32
    %15 = vector.broadcast %cst_11 : f32 to vector<8x1xf32>
    %16 = arith.divf %14, %15 : vector<8x1xf32>
    %17 = vector.broadcast %9 : vector<8x1xf32> to vector<8x32xf32>
    %18 = arith.subf %1, %17 : vector<8x32xf32>
    %cst_12 = arith.constant 9.99999974E-6 : f32
    %19 = vector.broadcast %cst_12 : f32 to vector<8x1xf32>
    %20 = arith.addf %16, %19 : vector<8x1xf32>
    %21 = math.rsqrt %20 : vector<8x1xf32>
    %22 = vector.broadcast %21 : vector<8x1xf32> to vector<8x32xf32>
    %23 = arith.mulf %18, %22 : vector<8x32xf32>
    %24 = vector.broadcast %4 : vector<1x32xf32> to vector<8x32xf32>
    %25 = arith.mulf %23, %24 : vector<8x32xf32>
    %26 = vector.broadcast %5 : vector<1x32xf32> to vector<8x32xf32>
    %27 = arith.addf %25, %26 : vector<8x32xf32>
    %28 = arith.index_cast %arg0 : i32 to index
    %29 = memref.load %arg1[%28] : memref<2xi32, #tpu.memory_space<smem>>
    %c0_13 = arith.constant 0 : index
    %c0_14 = arith.constant 0 : index
    %30 = vector.load %arg7[%c0_13, %c0_14] : memref<32x32xbf16, #tpu.memory_space<vmem>>, vector<32x32xbf16>
    %c0_15 = arith.constant 0 : index
    %c0_16 = arith.constant 0 : index
    %31 = vector.load %arg8[%c0_15, %c0_16] : memref<1x32xf32, #tpu.memory_space<vmem>>, vector<1x32xf32>
    %c0_17 = arith.constant 0 : index
    %c0_18 = arith.constant 0 : index
    %32 = vector.load %arg9[%c0_17, %c0_18] : memref<32x64xbf16, #tpu.memory_space<vmem>>, vector<32x64xbf16>
    %c0_19 = arith.constant 0 : index
    %c0_20 = arith.constant 0 : index
    %33 = vector.load %arg10[%c0_19, %c0_20] : memref<1x64xf32, #tpu.memory_space<vmem>>, vector<1x64xf32>
    %c0_21 = arith.constant 0 : index
    %c0_22 = arith.constant 0 : index
    %34 = vector.load %arg11[%c0_21, %c0_22] : memref<32x32xbf16, #tpu.memory_space<vmem>>, vector<32x32xbf16>
    %c0_23 = arith.constant 0 : index
    %c0_24 = arith.constant 0 : index
    %35 = vector.load %arg12[%c0_23, %c0_24] : memref<1x32xf32, #tpu.memory_space<vmem>>, vector<1x32xf32>
    %36 = arith.truncf %27 : vector<8x32xf32> to vector<8x32xbf16>
    %cst_25 = arith.constant dense<0.000000e+00> : vector<8x32xf32>
    %37 = tpu.matmul %36, %30, %cst_25 {dimension_numbers = #tpu.dot_dimension_numbers<[1], [0], [0], [1], [0, 0, 1, 1], [], []>} : vector<8x32xbf16>, vector<32x32xbf16>, vector<8x32xf32> -> vector<8x32xf32>
    %38 = vector.broadcast %31 : vector<1x32xf32> to vector<8x32xf32>
    %39 = arith.addf %37, %38 : vector<8x32xf32>
    %40 = arith.truncf %27 : vector<8x32xf32> to vector<8x32xbf16>
    %cst_26 = arith.constant dense<0.000000e+00> : vector<8x64xf32>
    %41 = tpu.matmul %40, %32, %cst_26 {dimension_numbers = #tpu.dot_dimension_numbers<[1], [0], [0], [1], [0, 0, 1, 1], [], []>} : vector<8x32xbf16>, vector<32x64xbf16>, vector<8x64xf32> -> vector<8x64xf32>
    %42 = vector.broadcast %33 : vector<1x64xf32> to vector<8x64xf32>
    %43 = arith.addf %41, %42 : vector<8x64xf32>
    %44 = vector.extract_strided_slice %43 {offsets = [0, 0], sizes = [8, 32], strides = [1, 1]} : vector<8x64xf32> to vector<8x32xf32>
    %45 = vector.extract_strided_slice %43 {offsets = [0, 32], sizes = [8, 32], strides = [1, 1]} : vector<8x64xf32> to vector<8x32xf32>
    %46 = vector.extract_strided_slice %39 {offsets = [0, 0], sizes = [8, 8], strides = [1, 1]} : vector<8x32xf32> to vector<8x8xf32>
    %47 = vector.extract_strided_slice %39 {offsets = [0, 8], sizes = [8, 8], strides = [1, 1]} : vector<8x32xf32> to vector<8x8xf32>
    %48 = vector.extract_strided_slice %39 {offsets = [0, 16], sizes = [8, 8], strides = [1, 1]} : vector<8x32xf32> to vector<8x8xf32>
    %49 = vector.extract_strided_slice %39 {offsets = [0, 24], sizes = [8, 8], strides = [1, 1]} : vector<8x32xf32> to vector<8x8xf32>
    %50 = vector.shape_cast %46 : vector<8x8xf32> to vector<1x8x8xf32>
    %51 = vector.shape_cast %47 : vector<8x8xf32> to vector<1x8x8xf32>
    %52 = vector.shape_cast %48 : vector<8x8xf32> to vector<1x8x8xf32>
    %53 = vector.shape_cast %49 : vector<8x8xf32> to vector<1x8x8xf32>
    %54 = tpu.concatenate %50, %51, %52, %53 in 0 : vector<1x8x8xf32>, vector<1x8x8xf32>, vector<1x8x8xf32>, vector<1x8x8xf32> -> vector<4x8x8xf32>
    %55 = vector.extract_strided_slice %44 {offsets = [0, 0], sizes = [8, 8], strides = [1, 1]} : vector<8x32xf32> to vector<8x8xf32>
    %56 = vector.extract_strided_slice %44 {offsets = [0, 8], sizes = [8, 8], strides = [1, 1]} : vector<8x32xf32> to vector<8x8xf32>
    %57 = vector.extract_strided_slice %44 {offsets = [0, 16], sizes = [8, 8], strides = [1, 1]} : vector<8x32xf32> to vector<8x8xf32>
    %58 = vector.extract_strided_slice %44 {offsets = [0, 24], sizes = [8, 8], strides = [1, 1]} : vector<8x32xf32> to vector<8x8xf32>
    %59 = vector.shape_cast %55 : vector<8x8xf32> to vector<1x8x8xf32>
    %60 = vector.shape_cast %56 : vector<8x8xf32> to vector<1x8x8xf32>
    %61 = vector.shape_cast %57 : vector<8x8xf32> to vector<1x8x8xf32>
    %62 = vector.shape_cast %58 : vector<8x8xf32> to vector<1x8x8xf32>
    %63 = tpu.concatenate %59, %60, %61, %62 in 0 : vector<1x8x8xf32>, vector<1x8x8xf32>, vector<1x8x8xf32>, vector<1x8x8xf32> -> vector<4x8x8xf32>
    %64 = vector.extract_strided_slice %45 {offsets = [0, 0], sizes = [8, 8], strides = [1, 1]} : vector<8x32xf32> to vector<8x8xf32>
    %65 = vector.extract_strided_slice %45 {offsets = [0, 8], sizes = [8, 8], strides = [1, 1]} : vector<8x32xf32> to vector<8x8xf32>
    %66 = vector.extract_strided_slice %45 {offsets = [0, 16], sizes = [8, 8], strides = [1, 1]} : vector<8x32xf32> to vector<8x8xf32>
    %67 = vector.extract_strided_slice %45 {offsets = [0, 24], sizes = [8, 8], strides = [1, 1]} : vector<8x32xf32> to vector<8x8xf32>
    %68 = vector.shape_cast %64 : vector<8x8xf32> to vector<1x8x8xf32>
    %69 = vector.shape_cast %65 : vector<8x8xf32> to vector<1x8x8xf32>
    %70 = vector.shape_cast %66 : vector<8x8xf32> to vector<1x8x8xf32>
    %71 = vector.shape_cast %67 : vector<8x8xf32> to vector<1x8x8xf32>
    %72 = tpu.concatenate %68, %69, %70, %71 in 0 : vector<1x8x8xf32>, vector<1x8x8xf32>, vector<1x8x8xf32>, vector<1x8x8xf32> -> vector<4x8x8xf32>
    %73 = arith.truncf %54 : vector<4x8x8xf32> to vector<4x8x8xbf16>
    %74 = arith.truncf %63 : vector<4x8x8xf32> to vector<4x8x8xbf16>
    "tpu.trace_start"() <{level = 10 : i32, message = "hqd,hkd->hqk"}> : () -> ()
    %cst_27 = arith.constant dense<0.000000e+00> : vector<4x8x8xf32>
    %75 = tpu.matmul %73, %74, %cst_27 {dimension_numbers = #tpu.dot_dimension_numbers<[2], [2], [1], [1], [0, 0, 0, 1, 1, 1], [0], [0]>} : vector<4x8x8xbf16>, vector<4x8x8xbf16>, vector<4x8x8xf32> -> vector<4x8x8xf32>
    "tpu.trace_stop"() : () -> ()
    %cst_28 = arith.constant 0.353553385 : f32
    %76 = vector.broadcast %cst_28 : f32 to vector<4x8x8xf32>
    %77 = arith.mulf %75, %76 : vector<4x8x8xf32>
    %78 = tpu.iota {dimensions = array<i32: 2>} : vector<4x8x8xi32>
    %79 = vector.broadcast %29 : i32 to vector<4x8x8xi32>
    %80 = arith.cmpi slt, %78, %79 : vector<4x8x8xi32>
    %81 = tpu.iota {dimensions = array<i32: 1>} : vector<4x8x8xi32>
    %82 = arith.cmpi sle, %78, %81 : vector<4x8x8xi32>
    %83 = arith.andi %80, %82 : vector<4x8x8xi1>
    %cst_29 = arith.constant -1.000000e+30 : f32
    %84 = vector.broadcast %cst_29 : f32 to vector<4x8x8xf32>
    %85 = arith.select %83, %77, %84 : vector<4x8x8xi1>, vector<4x8x8xf32>
    %cst_30 = arith.constant dense<0xFF800000> : vector<4x8xf32>
    %86 = vector.multi_reduction <maximumf>, %85, %cst_30 [2] : vector<4x8x8xf32> to vector<4x8xf32>
    %87 = vector.shape_cast %86 : vector<4x8xf32> to vector<4x8x1xf32>
    %88 = vector.broadcast %87 : vector<4x8x1xf32> to vector<4x8x8xf32>
    %89 = arith.subf %85, %88 : vector<4x8x8xf32>
    %90 = math.exp %89 : vector<4x8x8xf32>
    %cst_31 = arith.constant dense<0.000000e+00> : vector<4x8xf32>
    %91 = vector.multi_reduction <add>, %90, %cst_31 [2] : vector<4x8x8xf32> to vector<4x8xf32>
    %92 = vector.shape_cast %91 : vector<4x8xf32> to vector<4x8x1xf32>
    %93 = tpu.reciprocal %92 {approx = true} : vector<4x8x1xf32> -> vector<4x8x1xf32>
    %94 = vector.broadcast %93 : vector<4x8x1xf32> to vector<4x8x8xf32>
    %95 = arith.mulf %90, %94 : vector<4x8x8xf32>
    %96 = arith.truncf %95 : vector<4x8x8xf32> to vector<4x8x8xbf16>
    %97 = arith.truncf %72 : vector<4x8x8xf32> to vector<4x8x8xbf16>
    "tpu.trace_start"() <{level = 10 : i32, message = "hqk,hkd->hqd"}> : () -> ()
    %cst_32 = arith.constant dense<0.000000e+00> : vector<4x8x8xf32>
    %98 = tpu.matmul %96, %97, %cst_32 {dimension_numbers = #tpu.dot_dimension_numbers<[2], [1], [1], [2], [0, 0, 0, 1, 1, 2], [0], [0]>} : vector<4x8x8xbf16>, vector<4x8x8xbf16>, vector<4x8x8xf32> -> vector<4x8x8xf32>
    "tpu.trace_stop"() : () -> ()
    %99 = vector.extract_strided_slice %98 {offsets = [0, 0, 0], sizes = [1, 8, 8], strides = [1, 1, 1]} : vector<4x8x8xf32> to vector<1x8x8xf32>
    %100 = vector.shape_cast %99 : vector<1x8x8xf32> to vector<8x8xf32>
    %101 = vector.extract_strided_slice %98 {offsets = [1, 0, 0], sizes = [1, 8, 8], strides = [1, 1, 1]} : vector<4x8x8xf32> to vector<1x8x8xf32>
    %102 = vector.shape_cast %101 : vector<1x8x8xf32> to vector<8x8xf32>
    %103 = vector.extract_strided_slice %98 {offsets = [2, 0, 0], sizes = [1, 8, 8], strides = [1, 1, 1]} : vector<4x8x8xf32> to vector<1x8x8xf32>
    %104 = vector.shape_cast %103 : vector<1x8x8xf32> to vector<8x8xf32>
    %105 = vector.extract_strided_slice %98 {offsets = [3, 0, 0], sizes = [1, 8, 8], strides = [1, 1, 1]} : vector<4x8x8xf32> to vector<1x8x8xf32>
    %106 = vector.shape_cast %105 : vector<1x8x8xf32> to vector<8x8xf32>
    %107 = tpu.concatenate %100, %102, %104, %106 in 1 : vector<8x8xf32>, vector<8x8xf32>, vector<8x8xf32>, vector<8x8xf32> -> vector<8x32xf32>
    %108 = arith.truncf %107 : vector<8x32xf32> to vector<8x32xbf16>
    %cst_33 = arith.constant dense<0.000000e+00> : vector<8x32xf32>
    %109 = tpu.matmul %108, %34, %cst_33 {dimension_numbers = #tpu.dot_dimension_numbers<[1], [0], [0], [1], [0, 0, 1, 1], [], []>} : vector<8x32xbf16>, vector<32x32xbf16>, vector<8x32xf32> -> vector<8x32xf32>
    %110 = arith.addf %1, %109 : vector<8x32xf32>
    %111 = vector.broadcast %35 : vector<1x32xf32> to vector<8x32xf32>
    %112 = arith.addf %110, %111 : vector<8x32xf32>
    %c0_34 = arith.constant 0 : index
    %c0_35 = arith.constant 0 : index
    %113 = vector.load %arg13[%c0_34, %c0_35] : memref<1x32xf32, #tpu.memory_space<vmem>>, vector<1x32xf32>
    %c0_36 = arith.constant 0 : index
    %c0_37 = arith.constant 0 : index
    %114 = vector.load %arg14[%c0_36, %c0_37] : memref<1x32xf32, #tpu.memory_space<vmem>>, vector<1x32xf32>
    %cst_38 = arith.constant dense<0.000000e+00> : vector<8xf32>
    %115 = vector.multi_reduction <add>, %112, %cst_38 [1] : vector<8x32xf32> to vector<8xf32>
    %116 = vector.shape_cast %115 : vector<8xf32> to vector<8x1xf32>
    %cst_39 = arith.constant 3.200000e+01 : f32
    %117 = vector.broadcast %cst_39 : f32 to vector<8x1xf32>
    %118 = arith.divf %116, %117 : vector<8x1xf32>
    %119 = vector.broadcast %118 : vector<8x1xf32> to vector<8x32xf32>
    %120 = arith.subf %112, %119 : vector<8x32xf32>
    %121 = arith.mulf %120, %120 : vector<8x32xf32>
    %cst_40 = arith.constant dense<0.000000e+00> : vector<8xf32>
    %122 = vector.multi_reduction <add>, %121, %cst_40 [1] : vector<8x32xf32> to vector<8xf32>
    %123 = vector.shape_cast %122 : vector<8xf32> to vector<8x1xf32>
    %cst_41 = arith.constant 3.200000e+01 : f32
    %124 = vector.broadcast %cst_41 : f32 to vector<8x1xf32>
    %125 = arith.divf %123, %124 : vector<8x1xf32>
    %126 = vector.broadcast %118 : vector<8x1xf32> to vector<8x32xf32>
    %127 = arith.subf %112, %126 : vector<8x32xf32>
    %cst_42 = arith.constant 9.99999974E-6 : f32
    %128 = vector.broadcast %cst_42 : f32 to vector<8x1xf32>
    %129 = arith.addf %125, %128 : vector<8x1xf32>
    %130 = math.rsqrt %129 : vector<8x1xf32>
    %131 = vector.broadcast %130 : vector<8x1xf32> to vector<8x32xf32>
    %132 = arith.mulf %127, %131 : vector<8x32xf32>
    %133 = vector.broadcast %113 : vector<1x32xf32> to vector<8x32xf32>
    %134 = arith.mulf %132, %133 : vector<8x32xf32>
    %135 = vector.broadcast %114 : vector<1x32xf32> to vector<8x32xf32>
    %136 = arith.addf %134, %135 : vector<8x32xf32>
    %137 = arith.index_cast %arg0 : i32 to index
    %138 = memref.load %arg2[%137] : memref<2xi32, #tpu.memory_space<smem>>
    %c0_43 = arith.constant 0 : index
    %c0_44 = arith.constant 0 : index
    %139 = vector.load %arg15[%c0_43, %c0_44] : memref<32x32xbf16, #tpu.memory_space<vmem>>, vector<32x32xbf16>
    %c0_45 = arith.constant 0 : index
    %c0_46 = arith.constant 0 : index
    %140 = vector.load %arg16[%c0_45, %c0_46] : memref<1x32xf32, #tpu.memory_space<vmem>>, vector<1x32xf32>
    %c0_47 = arith.constant 0 : index
    %c0_48 = arith.constant 0 : index
    %141 = vector.load %arg17[%c0_47, %c0_48] : memref<32x64xbf16, #tpu.memory_space<vmem>>, vector<32x64xbf16>
    %c0_49 = arith.constant 0 : index
    %c0_50 = arith.constant 0 : index
    %142 = vector.load %arg18[%c0_49, %c0_50] : memref<1x64xf32, #tpu.memory_space<vmem>>, vector<1x64xf32>
    %c0_51 = arith.constant 0 : index
    %c0_52 = arith.constant 0 : index
    %143 = vector.load %arg19[%c0_51, %c0_52] : memref<32x32xbf16, #tpu.memory_space<vmem>>, vector<32x32xbf16>
    %c0_53 = arith.constant 0 : index
    %c0_54 = arith.constant 0 : index
    %144 = vector.load %arg20[%c0_53, %c0_54] : memref<1x32xf32, #tpu.memory_space<vmem>>, vector<1x32xf32>
    %145 = arith.truncf %136 : vector<8x32xf32> to vector<8x32xbf16>
    %cst_55 = arith.constant dense<0.000000e+00> : vector<8x32xf32>
    %146 = tpu.matmul %145, %139, %cst_55 {dimension_numbers = #tpu.dot_dimension_numbers<[1], [0], [0], [1], [0, 0, 1, 1], [], []>} : vector<8x32xbf16>, vector<32x32xbf16>, vector<8x32xf32> -> vector<8x32xf32>
    %147 = vector.broadcast %140 : vector<1x32xf32> to vector<8x32xf32>
    %148 = arith.addf %146, %147 : vector<8x32xf32>
    %149 = arith.truncf %3 : vector<10x32xf32> to vector<10x32xbf16>
    %cst_56 = arith.constant dense<0.000000e+00> : vector<10x64xf32>
    %150 = tpu.matmul %149, %141, %cst_56 {dimension_numbers = #tpu.dot_dimension_numbers<[1], [0], [0], [1], [0, 0, 1, 1], [], []>} : vector<10x32xbf16>, vector<32x64xbf16>, vector<10x64xf32> -> vector<10x64xf32>
    %151 = vector.broadcast %142 : vector<1x64xf32> to vector<10x64xf32>
    %152 = arith.addf %150, %151 : vector<10x64xf32>
    %153 = vector.extract_strided_slice %152 {offsets = [0, 0], sizes = [10, 32], strides = [1, 1]} : vector<10x64xf32> to vector<10x32xf32>
    %154 = vector.extract_strided_slice %152 {offsets = [0, 32], sizes = [10, 32], strides = [1, 1]} : vector<10x64xf32> to vector<10x32xf32>
    %155 = vector.extract_strided_slice %148 {offsets = [0, 0], sizes = [8, 8], strides = [1, 1]} : vector<8x32xf32> to vector<8x8xf32>
    %156 = vector.extract_strided_slice %148 {offsets = [0, 8], sizes = [8, 8], strides = [1, 1]} : vector<8x32xf32> to vector<8x8xf32>
    %157 = vector.extract_strided_slice %148 {offsets = [0, 16], sizes = [8, 8], strides = [1, 1]} : vector<8x32xf32> to vector<8x8xf32>
    %158 = vector.extract_strided_slice %148 {offsets = [0, 24], sizes = [8, 8], strides = [1, 1]} : vector<8x32xf32> to vector<8x8xf32>
    %159 = vector.shape_cast %155 : vector<8x8xf32> to vector<1x8x8xf32>
    %160 = vector.shape_cast %156 : vector<8x8xf32> to vector<1x8x8xf32>
    %161 = vector.shape_cast %157 : vector<8x8xf32> to vector<1x8x8xf32>
    %162 = vector.shape_cast %158 : vector<8x8xf32> to vector<1x8x8xf32>
    %163 = tpu.concatenate %159, %160, %161, %162 in 0 : vector<1x8x8xf32>, vector<1x8x8xf32>, vector<1x8x8xf32>, vector<1x8x8xf32> -> vector<4x8x8xf32>
    %164 = vector.extract_strided_slice %153 {offsets = [0, 0], sizes = [10, 8], strides = [1, 1]} : vector<10x32xf32> to vector<10x8xf32>
    %165 = vector.extract_strided_slice %153 {offsets = [0, 8], sizes = [10, 8], strides = [1, 1]} : vector<10x32xf32> to vector<10x8xf32>
    %166 = vector.extract_strided_slice %153 {offsets = [0, 16], sizes = [10, 8], strides = [1, 1]} : vector<10x32xf32> to vector<10x8xf32>
    %167 = vector.extract_strided_slice %153 {offsets = [0, 24], sizes = [10, 8], strides = [1, 1]} : vector<10x32xf32> to vector<10x8xf32>
    %168 = vector.shape_cast %164 : vector<10x8xf32> to vector<1x10x8xf32>
    %169 = vector.shape_cast %165 : vector<10x8xf32> to vector<1x10x8xf32>
    %170 = vector.shape_cast %166 : vector<10x8xf32> to vector<1x10x8xf32>
    %171 = vector.shape_cast %167 : vector<10x8xf32> to vector<1x10x8xf32>
    %172 = tpu.concatenate %168, %169, %170, %171 in 0 : vector<1x10x8xf32>, vector<1x10x8xf32>, vector<1x10x8xf32>, vector<1x10x8xf32> -> vector<4x10x8xf32>
    %173 = vector.extract_strided_slice %154 {offsets = [0, 0], sizes = [10, 8], strides = [1, 1]} : vector<10x32xf32> to vector<10x8xf32>
    %174 = vector.extract_strided_slice %154 {offsets = [0, 8], sizes = [10, 8], strides = [1, 1]} : vector<10x32xf32> to vector<10x8xf32>
    %175 = vector.extract_strided_slice %154 {offsets = [0, 16], sizes = [10, 8], strides = [1, 1]} : vector<10x32xf32> to vector<10x8xf32>
    %176 = vector.extract_strided_slice %154 {offsets = [0, 24], sizes = [10, 8], strides = [1, 1]} : vector<10x32xf32> to vector<10x8xf32>
    %177 = vector.shape_cast %173 : vector<10x8xf32> to vector<1x10x8xf32>
    %178 = vector.shape_cast %174 : vector<10x8xf32> to vector<1x10x8xf32>
    %179 = vector.shape_cast %175 : vector<10x8xf32> to vector<1x10x8xf32>
    %180 = vector.shape_cast %176 : vector<10x8xf32> to vector<1x10x8xf32>
    %181 = tpu.concatenate %177, %178, %179, %180 in 0 : vector<1x10x8xf32>, vector<1x10x8xf32>, vector<1x10x8xf32>, vector<1x10x8xf32> -> vector<4x10x8xf32>
    %182 = arith.truncf %163 : vector<4x8x8xf32> to vector<4x8x8xbf16>
    %183 = arith.truncf %172 : vector<4x10x8xf32> to vector<4x10x8xbf16>
    "tpu.trace_start"() <{level = 10 : i32, message = "hqd,hkd->hqk"}> : () -> ()
    %cst_57 = arith.constant dense<0.000000e+00> : vector<4x8x10xf32>
    %184 = tpu.matmul %182, %183, %cst_57 {dimension_numbers = #tpu.dot_dimension_numbers<[2], [2], [1], [1], [0, 0, 0, 1, 1, 1], [0], [0]>} : vector<4x8x8xbf16>, vector<4x10x8xbf16>, vector<4x8x10xf32> -> vector<4x8x10xf32>
    "tpu.trace_stop"() : () -> ()
    %cst_58 = arith.constant 0.353553385 : f32
    %185 = vector.broadcast %cst_58 : f32 to vector<4x8x10xf32>
    %186 = arith.mulf %184, %185 : vector<4x8x10xf32>
    %187 = tpu.iota {dimensions = array<i32: 2>} : vector<4x8x10xi32>
    %188 = vector.broadcast %138 : i32 to vector<4x8x10xi32>
    %189 = arith.cmpi slt, %187, %188 : vector<4x8x10xi32>
    %cst_59 = arith.constant -1.000000e+30 : f32
    %190 = vector.broadcast %cst_59 : f32 to vector<4x8x10xf32>
    %191 = arith.select %189, %186, %190 : vector<4x8x10xi1>, vector<4x8x10xf32>
    %cst_60 = arith.constant dense<0xFF800000> : vector<4x8xf32>
    %192 = vector.multi_reduction <maximumf>, %191, %cst_60 [2] : vector<4x8x10xf32> to vector<4x8xf32>
    %193 = vector.shape_cast %192 : vector<4x8xf32> to vector<4x8x1xf32>
    %194 = vector.broadcast %193 : vector<4x8x1xf32> to vector<4x8x10xf32>
    %195 = arith.subf %191, %194 : vector<4x8x10xf32>
    %196 = math.exp %195 : vector<4x8x10xf32>
    %cst_61 = arith.constant dense<0.000000e+00> : vector<4x8xf32>
    %197 = vector.multi_reduction <add>, %196, %cst_61 [2] : vector<4x8x10xf32> to vector<4x8xf32>
    %198 = vector.shape_cast %197 : vector<4x8xf32> to vector<4x8x1xf32>
    %199 = tpu.reciprocal %198 {approx = true} : vector<4x8x1xf32> -> vector<4x8x1xf32>
    %200 = vector.broadcast %199 : vector<4x8x1xf32> to vector<4x8x10xf32>
    %201 = arith.mulf %196, %200 : vector<4x8x10xf32>
    %202 = arith.truncf %201 : vector<4x8x10xf32> to vector<4x8x10xbf16>
    %203 = arith.truncf %181 : vector<4x10x8xf32> to vector<4x10x8xbf16>
    "tpu.trace_start"() <{level = 10 : i32, message = "hqk,hkd->hqd"}> : () -> ()
    %cst_62 = arith.constant dense<0.000000e+00> : vector<4x8x8xf32>
    %204 = tpu.matmul %202, %203, %cst_62 {dimension_numbers = #tpu.dot_dimension_numbers<[2], [1], [1], [2], [0, 0, 0, 1, 1, 2], [0], [0]>} : vector<4x8x10xbf16>, vector<4x10x8xbf16>, vector<4x8x8xf32> -> vector<4x8x8xf32>
    "tpu.trace_stop"() : () -> ()
    %205 = vector.extract_strided_slice %204 {offsets = [0, 0, 0], sizes = [1, 8, 8], strides = [1, 1, 1]} : vector<4x8x8xf32> to vector<1x8x8xf32>
    %206 = vector.shape_cast %205 : vector<1x8x8xf32> to vector<8x8xf32>
    %207 = vector.extract_strided_slice %204 {offsets = [1, 0, 0], sizes = [1, 8, 8], strides = [1, 1, 1]} : vector<4x8x8xf32> to vector<1x8x8xf32>
    %208 = vector.shape_cast %207 : vector<1x8x8xf32> to vector<8x8xf32>
    %209 = vector.extract_strided_slice %204 {offsets = [2, 0, 0], sizes = [1, 8, 8], strides = [1, 1, 1]} : vector<4x8x8xf32> to vector<1x8x8xf32>
    %210 = vector.shape_cast %209 : vector<1x8x8xf32> to vector<8x8xf32>
    %211 = vector.extract_strided_slice %204 {offsets = [3, 0, 0], sizes = [1, 8, 8], strides = [1, 1, 1]} : vector<4x8x8xf32> to vector<1x8x8xf32>
    %212 = vector.shape_cast %211 : vector<1x8x8xf32> to vector<8x8xf32>
    %213 = tpu.concatenate %206, %208, %210, %212 in 1 : vector<8x8xf32>, vector<8x8xf32>, vector<8x8xf32>, vector<8x8xf32> -> vector<8x32xf32>
    %214 = arith.truncf %213 : vector<8x32xf32> to vector<8x32xbf16>
    %cst_63 = arith.constant dense<0.000000e+00> : vector<8x32xf32>
    %215 = tpu.matmul %214, %143, %cst_63 {dimension_numbers = #tpu.dot_dimension_numbers<[1], [0], [0], [1], [0, 0, 1, 1], [], []>} : vector<8x32xbf16>, vector<32x32xbf16>, vector<8x32xf32> -> vector<8x32xf32>
    %216 = arith.addf %112, %215 : vector<8x32xf32>
    %217 = vector.broadcast %144 : vector<1x32xf32> to vector<8x32xf32>
    %218 = arith.addf %216, %217 : vector<8x32xf32>
    %c0_64 = arith.constant 0 : index
    %c0_65 = arith.constant 0 : index
    %219 = vector.load %arg21[%c0_64, %c0_65] : memref<1x32xf32, #tpu.memory_space<vmem>>, vector<1x32xf32>
    %c0_66 = arith.constant 0 : index
    %c0_67 = arith.constant 0 : index
    %220 = vector.load %arg22[%c0_66, %c0_67] : memref<1x32xf32, #tpu.memory_space<vmem>>, vector<1x32xf32>
    %cst_68 = arith.constant dense<0.000000e+00> : vector<8xf32>
    %221 = vector.multi_reduction <add>, %218, %cst_68 [1] : vector<8x32xf32> to vector<8xf32>
    %222 = vector.shape_cast %221 : vector<8xf32> to vector<8x1xf32>
    %cst_69 = arith.constant 3.200000e+01 : f32
    %223 = vector.broadcast %cst_69 : f32 to vector<8x1xf32>
    %224 = arith.divf %222, %223 : vector<8x1xf32>
    %225 = vector.broadcast %224 : vector<8x1xf32> to vector<8x32xf32>
    %226 = arith.subf %218, %225 : vector<8x32xf32>
    %227 = arith.mulf %226, %226 : vector<8x32xf32>
    %cst_70 = arith.constant dense<0.000000e+00> : vector<8xf32>
    %228 = vector.multi_reduction <add>, %227, %cst_70 [1] : vector<8x32xf32> to vector<8xf32>
    %229 = vector.shape_cast %228 : vector<8xf32> to vector<8x1xf32>
    %cst_71 = arith.constant 3.200000e+01 : f32
    %230 = vector.broadcast %cst_71 : f32 to vector<8x1xf32>
    %231 = arith.divf %229, %230 : vector<8x1xf32>
    %232 = vector.broadcast %224 : vector<8x1xf32> to vector<8x32xf32>
    %233 = arith.subf %218, %232 : vector<8x32xf32>
    %cst_72 = arith.constant 9.99999974E-6 : f32
    %234 = vector.broadcast %cst_72 : f32 to vector<8x1xf32>
    %235 = arith.addf %231, %234 : vector<8x1xf32>
    %236 = math.rsqrt %235 : vector<8x1xf32>
    %237 = vector.broadcast %236 : vector<8x1xf32> to vector<8x32xf32>
    %238 = arith.mulf %233, %237 : vector<8x32xf32>
    %239 = vector.broadcast %219 : vector<1x32xf32> to vector<8x32xf32>
    %240 = arith.mulf %238, %239 : vector<8x32xf32>
    %241 = vector.broadcast %220 : vector<1x32xf32> to vector<8x32xf32>
    %242 = arith.addf %240, %241 : vector<8x32xf32>
    %243 = arith.truncf %242 : vector<8x32xf32> to vector<8x32xbf16>
    %c0_73 = arith.constant 0 : index
    %c0_74 = arith.constant 0 : index
    %244 = vector.load %arg23[%c0_73, %c0_74] : memref<32x64xbf16, #tpu.memory_space<vmem>>, vector<32x64xbf16>
    %cst_75 = arith.constant dense<0.000000e+00> : vector<8x64xf32>
    %245 = tpu.matmul %243, %244, %cst_75 {dimension_numbers = #tpu.dot_dimension_numbers<[1], [0], [0], [1], [0, 0, 1, 1], [], []>} : vector<8x32xbf16>, vector<32x64xbf16>, vector<8x64xf32> -> vector<8x64xf32>
    %c0_76 = arith.constant 0 : index
    %c0_77 = arith.constant 0 : index
    %246 = vector.load %arg24[%c0_76, %c0_77] : memref<1x64xf32, #tpu.memory_space<vmem>>, vector<1x64xf32>
    %247 = vector.broadcast %246 : vector<1x64xf32> to vector<8x64xf32>
    %248 = arith.addf %245, %247 : vector<8x64xf32>
    %cst_78 = arith.constant 0.000000e+00 : f32
    %249 = vector.broadcast %cst_78 : f32 to vector<8x64xf32>
    %250 = arith.maximumf %248, %249 : vector<8x64xf32>
    %251 = arith.truncf %250 : vector<8x64xf32> to vector<8x64xbf16>
    %c0_79 = arith.constant 0 : index
    %c0_80 = arith.constant 0 : index
    %252 = vector.load %arg25[%c0_79, %c0_80] : memref<64x32xbf16, #tpu.memory_space<vmem>>, vector<64x32xbf16>
    %cst_81 = arith.constant dense<0.000000e+00> : vector<8x32xf32>
    %253 = tpu.matmul %251, %252, %cst_81 {dimension_numbers = #tpu.dot_dimension_numbers<[1], [0], [0], [1], [0, 0, 1, 1], [], []>} : vector<8x64xbf16>, vector<64x32xbf16>, vector<8x32xf32> -> vector<8x32xf32>
    %c0_82 = arith.constant 0 : index
    %c0_83 = arith.constant 0 : index
    %254 = vector.load %arg26[%c0_82, %c0_83] : memref<1x32xf32, #tpu.memory_space<vmem>>, vector<1x32xf32>
    %255 = vector.broadcast %254 : vector<1x32xf32> to vector<8x32xf32>
    %256 = arith.addf %253, %255 : vector<8x32xf32>
    %257 = arith.addf %218, %256 : vector<8x32xf32>
    %c0_84 = arith.constant 0 : index
    %c0_85 = arith.constant 0 : index
    %c0_86 = arith.constant 0 : index
    %258 = vector.load %arg27[%c0_84, %c0_85, %c0_86] : memref<1x8x32xf32, #tpu.memory_space<vmem>>, vector<1x8x32xf32>
    %259 = vector.shape_cast %258 : vector<1x8x32xf32> to vector<8x32xf32>
    %260 = vector.shape_cast %257 : vector<8x32xf32> to vector<1x8x32xf32>
    tpu.vector_store %arg27[%c0_84, %c0_85, %c0_86], %260 {strides = array<i32>} : memref<1x8x32xf32, #tpu.memory_space<vmem>>, vector<1x8x32xf32>,
    return
  }
  func.func @transform_0(%arg0: i32, %arg1: memref<2xi32, #tpu.memory_space<smem>>, %arg2: memref<2xi32, #tpu.memory_space<smem>>) -> (i32, i32, i32) {
    %c0_i32 = arith.constant 0 : i32
    %c0_i32_0 = arith.constant 0 : i32
    %c0_i32_1 = arith.constant 0 : i32
    return %arg0, %c0_i32, %c0_i32_0 : i32, i32, i32
  }
  func.func @transform_1(%arg0: i32, %arg1: memref<2xi32, #tpu.memory_space<smem>>, %arg2: memref<2xi32, #tpu.memory_space<smem>>) -> (i32, i32, i32) {
    %c0_i32 = arith.constant 0 : i32
    %c0_i32_0 = arith.constant 0 : i32
    %c0_i32_1 = arith.constant 0 : i32
    return %arg0, %c0_i32, %c0_i32_0 : i32, i32, i32
  }
  func.func @transform_2(%arg0: i32, %arg1: memref<2xi32, #tpu.memory_space<smem>>, %arg2: memref<2xi32, #tpu.memory_space<smem>>) -> (i32, i32) {
    %c0_i32 = arith.constant 0 : i32
    %c0_i32_0 = arith.constant 0 : i32
    %c0_i32_1 = arith.constant 0 : i32
    return %c0_i32, %c0_i32_0 : i32, i32
  }
  func.func @transform_3(%arg0: i32, %arg1: memref<2xi32, #tpu.memory_space<smem>>, %arg2: memref<2xi32, #tpu.memory_space<smem>>) -> (i32, i32) {
    %c0_i32 = arith.constant 0 : i32
    %c0_i32_0 = arith.constant 0 : i32
    %c0_i32_1 = arith.constant 0 : i32
    return %c0_i32, %c0_i32_0 : i32, i32
  }
  func.func @transform_4(%arg0: i32, %arg1: memref<2xi32, #tpu.memory_space<smem>>, %arg2: memref<2xi32, #tpu.memory_space<smem>>) -> (i32, i32) {
    %c0_i32 = arith.constant 0 : i32
    %c0_i32_0 = arith.constant 0 : i32
    %c0_i32_1 = arith.constant 0 : i32
    return %c0_i32, %c0_i32_0 : i32, i32
  }
  func.func @transform_5(%arg0: i32, %arg1: memref<2xi32, #tpu.memory_space<smem>>, %arg2: memref<2xi32, #tpu.memory_space<smem>>) -> (i32, i32) {
    %c0_i32 = arith.constant 0 : i32
    %c0_i32_0 = arith.constant 0 : i32
    %c0_i32_1 = arith.constant 0 : i32
    return %c0_i32, %c0_i32_0 : i32, i32
  }
  func.func @transform_6(%arg0: i32, %arg1: memref<2xi32, #tpu.memory_space<smem>>, %arg2: memref<2xi32, #tpu.memory_space<smem>>) -> (i32, i32) {
    %c0_i32 = arith.constant 0 : i32
    %c0_i32_0 = arith.constant 0 : i32
    %c0_i32_1 = arith.constant 0 : i32
    return %c0_i32, %c0_i32_0 : i32, i32
  }
  func.func @transform_7(%arg0: i32, %arg1: memref<2xi32, #tpu.memory_space<smem>>, %arg2: memref<2xi32, #tpu.memory_space<smem>>) -> (i32, i32) {
    %c0_i32 = arith.constant 0 : i32
    %c0_i32_0 = arith.constant 0 : i32
    %c0_i32_1 = arith.constant 0 : i32
    return %c0_i32, %c0_i32_0 : i32, i32
  }
  func.func @transform_8(%arg0: i32, %arg1: memref<2xi32, #tpu.memory_space<smem>>, %arg2: memref<2xi32, #tpu.memory_space<smem>>) -> (i32, i32) {
    %c0_i32 = arith.constant 0 : i32
    %c0_i32_0 = arith.constant 0 : i32
    %c0_i32_1 = arith.constant 0 : i32
    return %c0_i32, %c0_i32_0 : i32, i32
  }
  func.func @transform_9(%arg0: i32, %arg1: memref<2xi32, #tpu.memory_space<smem>>, %arg2: memref<2xi32, #tpu.memory_space<smem>>) -> (i32, i32) {
    %c0_i32 = arith.constant 0 : i32
    %c0_i32_0 = arith.constant 0 : i32
    %c0_i32_1 = arith.constant 0 : i32
    return %c0_i32, %c0_i32_0 : i32, i32
  }
  func.func @transform_10(%arg0: i32, %arg1: memref<2xi32, #tpu.memory_space<smem>>, %arg2: memref<2xi32, #tpu.memory_space<smem>>) -> (i32, i32) {
    %c0_i32 = arith.constant 0 : i32
    %c0_i32_0 = arith.constant 0 : i32
    %c0_i32_1 = arith.constant 0 : i32
    return %c0_i32, %c0_i32_0 : i32, i32
  }
  func.func @transform_11(%arg0: i32, %arg1: memref<2xi32, #tpu.memory_space<smem>>, %arg2: memref<2xi32, #tpu.memory_space<smem>>) -> (i32, i32) {
    %c0_i32 = arith.constant 0 : i32
    %c0_i32_0 = arith.constant 0 : i32
    %c0_i32_1 = arith.constant 0 : i32
    return %c0_i32, %c0_i32_0 : i32, i32
  }
  func.func @transform_12(%arg0: i32, %arg1: memref<2xi32, #tpu.memory_space<smem>>, %arg2: memref<2xi32, #tpu.memory_space<smem>>) -> (i32, i32) {
    %c0_i32 = arith.constant 0 : i32
    %c0_i32_0 = arith.constant 0 : i32
    %c0_i32_1 = arith.constant 0 : i32
    return %c0_i32, %c0_i32_0 : i32, i32
  }
  func.func @transform_13(%arg0: i32, %arg1: memref<2xi32, #tpu.memory_space<smem>>, %arg2: memref<2xi32, #tpu.memory_space<smem>>) -> (i32, i32) {
    %c0_i32 = arith.constant 0 : i32
    %c0_i32_0 = arith.constant 0 : i32
    %c0_i32_1 = arith.constant 0 : i32
    return %c0_i32, %c0_i32_0 : i32, i32
  }
  func.func @transform_14(%arg0: i32, %arg1: memref<2xi32, #tpu.memory_space<smem>>, %arg2: memref<2xi32, #tpu.memory_space<smem>>) -> (i32, i32) {
    %c0_i32 = arith.constant 0 : i32
    %c0_i32_0 = arith.constant 0 : i32
    %c0_i32_1 = arith.constant 0 : i32
    return %c0_i32, %c0_i32_0 : i32, i32
  }
  func.func @transform_15(%arg0: i32, %arg1: memref<2xi32, #tpu.memory_space<smem>>, %arg2: memref<2xi32, #tpu.memory_space<smem>>) -> (i32, i32) {
    %c0_i32 = arith.constant 0 : i32
    %c0_i32_0 = arith.constant 0 : i32
    %c0_i32_1 = arith.constant 0 : i32
    return %c0_i32, %c0_i32_0 : i32, i32
  }
  func.func @transform_16(%arg0: i32, %arg1: memref<2xi32, #tpu.memory_space<smem>>, %arg2: memref<2xi32, #tpu.memory_space<smem>>) -> (i32, i32) {
    %c0_i32 = arith.constant 0 : i32
    %c0_i32_0 = arith.constant 0 : i32
    %c0_i32_1 = arith.constant 0 : i32
    return %c0_i32, %c0_i32_0 : i32, i32
  }
  func.func @transform_17(%arg0: i32, %arg1: memref<2xi32, #tpu.memory_space<smem>>, %arg2: memref<2xi32, #tpu.memory_space<smem>>) -> (i32, i32) {
    %c0_i32 = arith.constant 0 : i32
    %c0_i32_0 = arith.constant 0 : i32
    %c0_i32_1 = arith.constant 0 : i32
    return %c0_i32, %c0_i32_0 : i32, i32
  }
  func.func @transform_18(%arg0: i32, %arg1: memref<2xi32, #tpu.memory_space<smem>>, %arg2: memref<2xi32, #tpu.memory_space<smem>>) -> (i32, i32) {
    %c0_i32 = arith.constant 0 : i32
    %c0_i32_0 = arith.constant 0 : i32
    %c0_i32_1 = arith.constant 0 : i32
    return %c0_i32, %c0_i32_0 : i32, i32
  }
  func.func @transform_19(%arg0: i32, %arg1: memref<2xi32, #tpu.memory_space<smem>>, %arg2: memref<2xi32, #tpu.memory_space<smem>>) -> (i32, i32) {
    %c0_i32 = arith.constant 0 : i32
    %c0_i32_0 = arith.constant 0 : i32
    %c0_i32_1 = arith.constant 0 : i32
    return %c0_i32, %c0_i32_0 : i32, i32
  }
  func.func @transform_20(%arg0: i32, %arg1: memref<2xi32, #tpu.memory_space<smem>>, %arg2: memref<2xi32, #tpu.memory_space<smem>>) -> (i32, i32) {
    %c0_i32 = arith.constant 0 : i32
    %c0_i32_0 = arith.constant 0 : i32
    %c0_i32_1 = arith.constant 0 : i32
    return %c0_i32, %c0_i32_0 : i32, i32
  }
  func.func @transform_21(%arg0: i32, %arg1: memref<2xi32, #tpu.memory_space<smem>>, %arg2: memref<2xi32, #tpu.memory_space<smem>>) -> (i32, i32) {
    %c0_i32 = arith.constant 0 : i32
    %c0_i32_0 = arith.constant 0 : i32
    %c0_i32_1 = arith.constant 0 : i32
    return %c0_i32, %c0_i32_0 : i32, i32
  }
  func.func @transform_22(%arg0: i32, %arg1: memref<2xi32, #tpu.memory_space<smem>>, %arg2: memref<2xi32, #tpu.memory_space<smem>>) -> (i32, i32) {
    %c0_i32 = arith.constant 0 : i32
    %c0_i32_0 = arith.constant 0 : i32
    %c0_i32_1 = arith.constant 0 : i32
    return %c0_i32, %c0_i32_0 : i32, i32
  }
  func.func @transform_23(%arg0: i32, %arg1: memref<2xi32, #tpu.memory_space<smem>>, %arg2: memref<2xi32, #tpu.memory_space<smem>>) -> (i32, i32) {
    %c0_i32 = arith.constant 0 : i32
    %c0_i32_0 = arith.constant 0 : i32
    %c0_i32_1 = arith.constant 0 : i32
    return %c0_i32, %c0_i32_0 : i32, i32
  }
  func.func @transform_24(%arg0: i32, %arg1: memref<2xi32, #tpu.memory_space<smem>>, %arg2: memref<2xi32, #tpu.memory_space<smem>>) -> (i32, i32, i32) {
    %c0_i32 = arith.constant 0 : i32
    %c0_i32_0 = arith.constant 0 : i32
    %c0_i32_1 = arith.constant 0 : i32
    return %arg0, %c0_i32, %c0_i32_0 : i32, i32, i32
  }
}

module attributes {stable_mosaic.version = 11 : i64} {
  func.func @decoder_layer_kernel(%arg0: i32, %arg1: memref<2xi32, #tpu.memory_space<smem>>, %arg2: memref<2xi32, #tpu.memory_space<smem>>, %arg3: memref<1x8x32xf32, #tpu.memory_space<vmem>>, %arg4: memref<1x10x32xf32, #tpu.memory_space<vmem>>, %arg5: memref<1x32xf32, #tpu.memory_space<vmem>>, %arg6: memref<1x32xf32, #tpu.memory_space<vmem>>, %arg7: memref<32x32xbf16, #tpu.memory_space<vmem>>, %arg8: memref<1x32xf32, #tpu.memory_space<vmem>>, %arg9: memref<32x64xbf16, #tpu.memory_space<vmem>>, %arg10: memref<1x64xf32, #tpu.memory_space<vmem>>, %arg11: memref<32x32xbf16, #tpu.memory_space<vmem>>, %arg12: memref<1x32xf32, #tpu.memory_space<vmem>>, %arg13: memref<1x32xf32, #tpu.memory_space<vmem>>, %arg14: memref<1x32xf32, #tpu.memory_space<vmem>>, %arg15: memref<32x32xbf16, #tpu.memory_space<vmem>>, %arg16: memref<1x32xf32, #tpu.memory_space<vmem>>, %arg17: memref<32x64xbf16, #tpu.memory_space<vmem>>, %arg18: memref<1x64xf32, #tpu.memory_space<vmem>>, %arg19: memref<32x32xbf16, #tpu.memory_space<vmem>>, %arg20: memref<1x32xf32, #tpu.memory_space<vmem>>, %arg21: memref<1x32xf32, #tpu.memory_space<vmem>>, %arg22: memref<1x32xf32, #tpu.memory_space<vmem>>, %arg23: memref<32x64xbf16, #tpu.memory_space<vmem>>, %arg24: memref<1x64xf32, #tpu.memory_space<vmem>>, %arg25: memref<64x32xbf16, #tpu.memory_space<vmem>>, %arg26: memref<1x32xf32, #tpu.memory_space<vmem>>, %arg27: memref<1x8x32xf32, #tpu.memory_space<vmem>>) attributes {dimension_semantics = [#tpu.dimension_semantics<parallel>], iteration_bounds = array<i64: 2>, scalar_prefetch = 2 : i64, scratch_operands = 0 : i64, tpu.core_type = #tpu.core_type<tc>, window_params = [{transform_indices = @transform_0, window_bounds = array<i64: 1, 8, 32>}, {transform_indices = @transform_1, window_bounds = array<i64: 1, 10, 32>}, {pipeline_mode = #tpu.pipeline_mode<synchronous>, transform_indices = @transform_2, window_bounds = array<i64: 1, 32>}, {pipeline_mode = #tpu.pipeline_mode<synchronous>, transform_indices = @transform_3, window_bounds = array<i64: 1, 32>}, {pipeline_mode = #tpu.pipeline_mode<synchronous>, transform_indices = @transform_4, window_bounds = array<i64: 32, 32>}, {pipeline_mode = #tpu.pipeline_mode<synchronous>, transform_indices = @transform_5, window_bounds = array<i64: 1, 32>}, {pipeline_mode = #tpu.pipeline_mode<synchronous>, transform_indices = @transform_6, window_bounds = array<i64: 32, 64>}, {pipeline_mode = #tpu.pipeline_mode<synchronous>, transform_indices = @transform_7, window_bounds = array<i64: 1, 64>}, {pipeline_mode = #tpu.pipeline_mode<synchronous>, transform_indices = @transform_8, window_bounds = array<i64: 32, 32>}, {pipeline_mode = #tpu.pipeline_mode<synchronous>, transform_indices = @transform_9, window_bounds = array<i64: 1, 32>}, {pipeline_mode = #tpu.pipeline_mode<synchronous>, transform_indices = @transform_10, window_bounds = array<i64: 1, 32>}, {pipeline_mode = #tpu.pipeline_mode<synchronous>, transform_indices = @transform_11, window_bounds = array<i64: 1, 32>}, {pipeline_mode = #tpu.pipeline_mode<synchronous>, transform_indices = @transform_12, window_bounds = array<i64: 32, 32>}, {pipeline_mode = #tpu.pipeline_mode<synchronous>, transform_indices = @transform_13, window_bounds = array<i64: 1, 32>}, {pipeline_mode = #tpu.pipeline_mode<synchronous>, transform_indices = @transform_14, window_bounds = array<i64: 32, 64>}, {pipeline_mode = #tpu.pipeline_mode<synchronous>, transform_indices = @transform_15, window_bounds = array<i64: 1, 64>}, {pipeline_mode = #tpu.pipeline_mode<synchronous>, transform_indices = @transform_16, window_bounds = array<i64: 32, 32>}, {pipeline_mode = #tpu.pipeline_mode<synchronous>, transform_indices = @transform_17, window_bounds = array<i64: 1, 32>}, {pipeline_mode = #tpu.pipeline_mode<synchronous>, transform_indices = @transform_18, window_bounds = array<i64: 1, 32>}, {pipeline_mode = #tpu.pipeline_mode<synchronous>, transform_indices = @transform_19, window_bounds = array<i64: 1, 32>}, {pipeline_mode = #tpu.pipeline_mode<synchronous>, transform_indices = @transform_20, window_bounds = array<i64: 32, 64>}, {pipeline_mode = #tpu.pipeline_mode<synchronous>, transform_indices = @transform_21, window_bounds = array<i64: 1, 64>}, {pipeline_mode = #tpu.pipeline_mode<synchronous>, transform_indices = @transform_22, window_bounds = array<i64: 64, 32>}, {pipeline_mode = #tpu.pipeline_mode<synchronous>, transform_indices = @transform_23, window_bounds = array<i64: 1, 32>}, {transform_indices = @transform_24, window_bounds = array<i64: 1, 8, 32>}]} {
    %c0 = arith.constant 0 : index
    %c0_0 = arith.constant 0 : index
    %c0_1 = arith.constant 0 : index
    %0 = vector.load %arg3[%c0, %c0_0, %c0_1] : memref<1x8x32xf32, #tpu.memory_space<vmem>>, vector<1x8x32xf32>
    %1 = vector.shape_cast %0 : vector<1x8x32xf32> to vector<8x32xf32>
    %c0_2 = arith.constant 0 : index
    %c0_3 = arith.constant 0 : index
    %c0_4 = arith.constant 0 : index
    %2 = vector.load %arg4[%c0_2, %c0_3, %c0_4] : memref<1x10x32xf32, #tpu.memory_space<vmem>>, vector<1x10x32xf32>
    %3 = vector.shape_cast %2 : vector<1x10x32xf32> to vector<10x32xf32>
    %c0_5 = arith.constant 0 : index
    %c0_6 = arith.constant 0 : index
    %4 = vector.load %arg5[%c0_5, %c0_6] : memref<1x32xf32, #tpu.memory_space<vmem>>, vector<1x32xf32>
    %c0_7 = arith.constant 0 : index
    %c0_8 = arith.constant 0 : index
    %5 = vector.load %arg6[%c0_7, %c0_8] : memref<1x32xf32, #tpu.memory_space<vmem>>, vector<1x32xf32>
    %cst = arith.constant dense<0.000000e+00> : vector<8xf32>
    %6 = vector.multi_reduction <add>, %1, %cst [1] : vector<8x32xf32> to vector<8xf32>
    %7 = vector.shape_cast %6 : vector<8xf32> to vector<8x1xf32>
    %cst_9 = arith.constant 3.200000e+01 : f32
    %8 = vector.broadcast %cst_9 : f32 to vector<8x1xf32>
    %9 = arith.divf %7, %8 : vector<8x1xf32>
    %10 = vector.broadcast %9 : vector<8x1xf32> to vector<8x32xf32>
    %11 = arith.subf %1, %10 : vector<8x32xf32>
    %12 = arith.mulf %11, %11 : vector<8x32xf32>
    %cst_10 = arith.constant dense<0.000000e+00> : vector<8xf32>
    %13 = vector.multi_reduction <add>, %12, %cst_10 [1] : vector<8x32xf32> to vector<8xf32>
    %14 = vector.shape_cast %13 : vector<8xf32> to vector<8x1xf32>
    %cst_11 = arith.constant 3.200000e+01 : f32
    %15 = vector.broadcast %cst_11 : f32 to vector<8x1xf32>
    %16 = arith.divf %14, %15 : vector<8x1xf32>
    %17 = vector.broadcast %9 : vector<8x1xf32> to vector<8x32xf32>
    %18 = arith.subf %1, %17 : vector<8x32xf32>
    %cst_12 = arith.constant 9.99999974E-6 : f32
    %19 = vector.broadcast %cst_12 : f32 to vector<8x1xf32>
    %20 = arith.addf %16, %19 : vector<8x1xf32>
    %21 = math.rsqrt %20 : vector<8x1xf32>
    %22 = vector.broadcast %21 : vector<8x1xf32> to vector<8x32xf32>
    %23 = arith.mulf %18, %22 : vector<8x32xf32>
    %24 = vector.broadcast %4 : vector<1x32xf32> to vector<8x32xf32>
    %25 = arith.mulf %23, %24 : vector<8x32xf32>
    %26 = vector.broadcast %5 : vector<1x32xf32> to vector<8x32xf32>
    %27 = arith.addf %25, %26 : vector<8x32xf32>
    %28 = arith.index_cast %arg0 : i32 to index
    %29 = memref.load %arg1[%28] : memref<2xi32, #tpu.memory_space<smem>>
    %c0_13 = arith.constant 0 : index
    %c0_14 = arith.constant 0 : index
    %30 = vector.load %arg7[%c0_13, %c0_14] : memref<32x32xbf16, #tpu.memory_space<vmem>>, vector<32x32xbf16>
    %c0_15 = arith.constant 0 : index
    %c0_16 = arith.constant 0 : index
    %31 = vector.load %arg8[%c0_15, %c0_16] : memref<1x32xf32, #tpu.memory_space<vmem>>, vector<1x32xf32>
    %c0_17 = arith.constant 0 : index
    %c0_18 = arith.constant 0 : index
    %32 = vector.load %arg9[%c0_17, %c0_18] : memref<32x64xbf16, #tpu.memory_space<vmem>>, vector<32x64xbf16>
    %c0_19 = arith.constant 0 : index
    %c0_20 = arith.constant 0 : index
    %33 = vector.load %arg10[%c0_19, %c0_20] : memref<1x64xf32, #tpu.memory_space<vmem>>, vector<1x64xf32>
    %c0_21 = arith.constant 0 : index
    %c0_22 = arith.constant 0 : index
    %34 = vector.load %arg11[%c0_21, %c0_22] : memref<32x32xbf16, #tpu.memory_space<vmem>>, vector<32x32xbf16>
    %c0_23 = arith.constant 0 : index
    %c0_24 = arith.constant 0 : index
    %35 = vector.load %arg12[%c0_23, %c0_24] : memref<1x32xf32, #tpu.memory_space<vmem>>, vector<1x32xf32>
    %36 = arith.truncf %27 : vector<8x32xf32> to vector<8x32xbf16>
    %cst_25 = arith.constant dense<0.000000e+00> : vector<8x32xf32>
    %37 = tpu.matmul %36, %30, %cst_25 {dimension_numbers = #tpu.dot_dimension_numbers<[1], [0], [0], [1], [0, 0, 1, 1], [], []>} : vector<8x32xbf16>, vector<32x32xbf16>, vector<8x32xf32> -> vector<8x32xf32>
    %38 = vector.broadcast %31 : vector<1x32xf32> to vector<8x32xf32>
    %39 = arith.addf %37, %38 : vector<8x32xf32>
    %40 = arith.truncf %27 : vector<8x32xf32> to vector<8x32xbf16>
    %cst_26 = arith.constant dense<0.000000e+00> : vector<8x64xf32>
    %41 = tpu.matmul %40, %32, %cst_26 {dimension_numbers = #tpu.dot_dimension_numbers<[1], [0], [0], [1], [0, 0, 1, 1], [], []>} : vector<8x32xbf16>, vector<32x64xbf16>, vector<8x64xf32> -> vector<8x64xf32>
    %42 = vector.broadcast %33 : vector<1x64xf32> to vector<8x64xf32>
    %43 = arith.addf %41, %42 : vector<8x64xf32>
    %44 = vector.extract_strided_slice %43 {offsets = [0, 0], sizes = [8, 32], strides = [1, 1]} : vector<8x64xf32> to vector<8x32xf32>
    %45 = vector.extract_strided_slice %43 {offsets = [0, 32], sizes = [8, 32], strides = [1, 1]} : vector<8x64xf32> to vector<8x32xf32>
    %46 = vector.extract_strided_slice %39 {offsets = [0, 0], sizes = [8, 8], strides = [1, 1]} : vector<8x32xf32> to vector<8x8xf32>
    %47 = vector.extract_strided_slice %39 {offsets = [0, 8], sizes = [8, 8], strides = [1, 1]} : vector<8x32xf32> to vector<8x8xf32>
    %48 = vector.extract_strided_slice %39 {offsets = [0, 16], sizes = [8, 8], strides = [1, 1]} : vector<8x32xf32> to vector<8x8xf32>
    %49 = vector.extract_strided_slice %39 {offsets = [0, 24], sizes = [8, 8], strides = [1, 1]} : vector<8x32xf32> to vector<8x8xf32>
    %50 = vector.shape_cast %46 : vector<8x8xf32> to vector<1x8x8xf32>
    %51 = vector.shape_cast %47 : vector<8x8xf32> to vector<1x8x8xf32>
    %52 = vector.shape_cast %48 : vector<8x8xf32> to vector<1x8x8xf32>
    %53 = vector.shape_cast %49 : vector<8x8xf32> to vector<1x8x8xf32>
    %54 = tpu.concatenate %50, %51, %52, %53 in 0 : vector<1x8x8xf32>, vector<1x8x8xf32>, vector<1x8x8xf32>, vector<1x8x8xf32> -> vector<4x8x8xf32>
    %55 = vector.extract_strided_slice %44 {offsets = [0, 0], sizes = [8, 8], strides = [1, 1]} : vector<8x32xf32> to vector<8x8xf32>
    %56 = vector.extract_strided_slice %44 {offsets = [0, 8], sizes = [8, 8], strides = [1, 1]} : vector<8x32xf32> to vector<8x8xf32>
    %57 = vector.extract_strided_slice %44 {offsets = [0, 16], sizes = [8, 8], strides = [1, 1]} : vector<8x32xf32> to vector<8x8xf32>
    %58 = vector.extract_strided_slice %44 {offsets = [0, 24], sizes = [8, 8], strides = [1, 1]} : vector<8x32xf32> to vector<8x8xf32>
    %59 = vector.shape_cast %55 : vector<8x8xf32> to vector<1x8x8xf32>
    %60 = vector.shape_cast %56 : vector<8x8xf32> to vector<1x8x8xf32>
    %61 = vector.shape_cast %57 : vector<8x8xf32> to vector<1x8x8xf32>
    %62 = vector.shape_cast %58 : vector<8x8xf32> to vector<1x8x8xf32>
    %63 = tpu.concatenate %59, %60, %61, %62 in 0 : vector<1x8x8xf32>, vector<1x8x8xf32>, vector<1x8x8xf32>, vector<1x8x8xf32> -> vector<4x8x8xf32>
    %64 = vector.extract_strided_slice %45 {offsets = [0, 0], sizes = [8, 8], strides = [1, 1]} : vector<8x32xf32> to vector<8x8xf32>
    %65 = vector.extract_strided_slice %45 {offsets = [0, 8], sizes = [8, 8], strides = [1, 1]} : vector<8x32xf32> to vector<8x8xf32>
    %66 = vector.extract_strided_slice %45 {offsets = [0, 16], sizes = [8, 8], strides = [1, 1]} : vector<8x32xf32> to vector<8x8xf32>
    %67 = vector.extract_strided_slice %45 {offsets = [0, 24], sizes = [8, 8], strides = [1, 1]} : vector<8x32xf32> to vector<8x8xf32>
    %68 = vector.shape_cast %64 : vector<8x8xf32> to vector<1x8x8xf32>
    %69 = vector.shape_cast %65 : vector<8x8xf32> to vector<1x8x8xf32>
    %70 = vector.shape_cast %66 : vector<8x8xf32> to vector<1x8x8xf32>
    %71 = vector.shape_cast %67 : vector<8x8xf32> to vector<1x8x8xf32>
    %72 = tpu.concatenate %68, %69, %70, %71 in 0 : vector<1x8x8xf32>, vector<1x8x8xf32>, vector<1x8x8xf32>, vector<1x8x8xf32> -> vector<4x8x8xf32>
    %73 = arith.truncf %54 : vector<4x8x8xf32> to vector<4x8x8xbf16>
    %74 = arith.truncf %63 : vector<4x8x8xf32> to vector<4x8x8xbf16>
    "tpu.trace_start"() <{level = 10 : i32, message = "hqd,hkd->hqk"}> : () -> ()
    %cst_27 = arith.constant dense<0.000000e+00> : vector<4x8x8xf32>
    %75 = tpu.matmul %73, %74, %cst_27 {dimension_numbers = #tpu.dot_dimension_numbers<[2], [2], [1], [1], [0, 0, 0, 1, 1, 1], [0], [0]>} : vector<4x8x8xbf16>, vector<4x8x8xbf16>, vector<4x8x8xf32> -> vector<4x8x8xf32>
    "tpu.trace_stop"() : () -> ()
    %cst_28 = arith.constant 0.353553385 : f32
    %76 = vector.broadcast %cst_28 : f32 to vector<4x8x8xf32>
    %77 = arith.mulf %75, %76 : vector<4x8x8xf32>
    %78 = tpu.iota {dimensions = array<i32: 2>} : vector<4x8x8xi32>
    %79 = vector.broadcast %29 : i32 to vector<4x8x8xi32>
    %80 = arith.cmpi slt, %78, %79 : vector<4x8x8xi32>
    %81 = tpu.iota {dimensions = array<i32: 1>} : vector<4x8x8xi32>
    %82 = arith.cmpi sle, %78, %81 : vector<4x8x8xi32>
    %83 = arith.andi %80, %82 : vector<4x8x8xi1>
    %cst_29 = arith.constant -1.000000e+30 : f32
    %84 = vector.broadcast %cst_29 : f32 to vector<4x8x8xf32>
    %85 = arith.select %83, %77, %84 : vector<4x8x8xi1>, vector<4x8x8xf32>
    %cst_30 = arith.constant dense<0xFF800000> : vector<4x8xf32>
    %86 = vector.multi_reduction <maximumf>, %85, %cst_30 [2] : vector<4x8x8xf32> to vector<4x8xf32>
    %87 = vector.shape_cast %86 : vector<4x8xf32> to vector<4x8x1xf32>
    %88 = vector.broadcast %87 : vector<4x8x1xf32> to vector<4x8x8xf32>
    %89 = arith.subf %85, %88 : vector<4x8x8xf32>
    %90 = math.exp %89 : vector<4x8x8xf32>
    %cst_31 = arith.constant dense<0.000000e+00> : vector<4x8xf32>
    %91 = vector.multi_reduction <add>, %90, %cst_31 [2] : vector<4x8x8xf32> to vector<4x8xf32>
    %92 = vector.shape_cast %91 : vector<4x8xf32> to vector<4x8x1xf32>
    %93 = tpu.reciprocal %92 {approx = true} : vector<4x8x1xf32> -> vector<4x8x1xf32>
    %94 = vector.broadcast %93 : vector<4x8x1xf32> to vector<4x8x8xf32>
    %95 = arith.mulf %90, %94 : vector<4x8x8xf32>
    %96 = arith.truncf %95 : vector<4x8x8xf32> to vector<4x8x8xbf16>
    %97 = arith.truncf %72 : vector<4x8x8xf32> to vector<4x8x8xbf16>
    "tpu.trace_start"() <{level = 10 : i32, message = "hqk,hkd->hqd"}> : () -> ()
    %cst_32 = arith.constant dense<0.000000e+00> : vector<4x8x8xf32>
    %98 = tpu.matmul %96, %97, %cst_32 {dimension_numbers = #tpu.dot_dimension_numbers<[2], [1], [1], [2], [0, 0, 0, 1, 1, 2], [0], [0]>} : vector<4x8x8xbf16>, vector<4x8x8xbf16>, vector<4x8x8xf32> -> vector<4x8x8xf32>
    "tpu.trace_stop"() : () -> ()
    %99 = vector.extract_strided_slice %98 {offsets = [0, 0, 0], sizes = [1, 8, 8], strides = [1, 1, 1]} : vector<4x8x8xf32> to vector<1x8x8xf32>
    %100 = vector.shape_cast %99 : vector<1x8x8xf32> to vector<8x8xf32>
    %101 = vector.extract_strided_slice %98 {offsets = [1, 0, 0], sizes = [1, 8, 8], strides = [1, 1, 1]} : vector<4x8x8xf32> to vector<1x8x8xf32>
    %102 = vector.shape_cast %101 : vector<1x8x8xf32> to vector<8x8xf32>
    %103 = vector.extract_strided_slice %98 {offsets = [2, 0, 0], sizes = [1, 8, 8], strides = [1, 1, 1]} : vector<4x8x8xf32> to vector<1x8x8xf32>
    %104 = vector.shape_cast %103 : vector<1x8x8xf32> to vector<8x8xf32>
    %105 = vector.extract_strided_slice %98 {offsets = [3, 0, 0], sizes = [1, 8, 8], strides = [1, 1, 1]} : vector<4x8x8xf32> to vector<1x8x8xf32>
    %106 = vector.shape_cast %105 : vector<1x8x8xf32> to vector<8x8xf32>
    %107 = tpu.concatenate %100, %102, %104, %106 in 1 : vector<8x8xf32>, vector<8x8xf32>, vector<8x8xf32>, vector<8x8xf32> -> vector<8x32xf32>
    %108 = arith.truncf %107 : vector<8x32xf32> to vector<8x32xbf16>
    %cst_33 = arith.constant dense<0.000000e+00> : vector<8x32xf32>
    %109 = tpu.matmul %108, %34, %cst_33 {dimension_numbers = #tpu.dot_dimension_numbers<[1], [0], [0], [1], [0, 0, 1, 1], [], []>} : vector<8x32xbf16>, vector<32x32xbf16>, vector<8x32xf32> -> vector<8x32xf32>
    %110 = arith.addf %1, %109 : vector<8x32xf32>
    %111 = vector.broadcast %35 : vector<1x32xf32> to vector<8x32xf32>
    %112 = arith.addf %110, %111 : vector<8x32xf32>
    %c0_34 = arith.constant 0 : index
    %c0_35 = arith.constant 0 : index
    %113 = vector.load %arg13[%c0_34, %c0_35] : memref<1x32xf32, #tpu.memory_space<vmem>>, vector<1x32xf32>
    %c0_36 = arith.constant 0 : index
    %c0_37 = arith.constant 0 : index
    %114 = vector.load %arg14[%c0_36, %c0_37] : memref<1x32xf32, #tpu.memory_space<vmem>>, vector<1x32xf32>
    %cst_38 = arith.constant dense<0.000000e+00> : vector<8xf32>
    %115 = vector.multi_reduction <add>, %112, %cst_38 [1] : vector<8x32xf32> to vector<8xf32>
    %116 = vector.shape_cast %115 : vector<8xf32> to vector<8x1xf32>
    %cst_39 = arith.constant 3.200000e+01 : f32
    %117 = vector.broadcast %cst_39 : f32 to vector<8x1xf32>
    %118 = arith.divf %116, %117 : vector<8x1xf32>
    %119 = vector.broadcast %118 : vector<8x1xf32> to vector<8x32xf32>
    %120 = arith.subf %112, %119 : vector<8x32xf32>
    %121 = arith.mulf %120, %120 : vector<8x32xf32>
    %cst_40 = arith.constant dense<0.000000e+00> : vector<8xf32>
    %122 = vector.multi_reduction <add>, %121, %cst_40 [1] : vector<8x32xf32> to vector<8xf32>
    %123 = vector.shape_cast %122 : vector<8xf32> to vector<8x1xf32>
    %cst_41 = arith.constant 3.200000e+01 : f32
    %124 = vector.broadcast %cst_41 : f32 to vector<8x1xf32>
    %125 = arith.divf %123, %124 : vector<8x1xf32>
    %126 = vector.broadcast %118 : vector<8x1xf32> to vector<8x32xf32>
    %127 = arith.subf %112, %126 : vector<8x32xf32>
    %cst_42 = arith.constant 9.99999974E-6 : f32
    %128 = vector.broadcast %cst_42 : f32 to vector<8x1xf32>
    %129 = arith.addf %125, %128 : vector<8x1xf32>
    %130 = math.rsqrt %129 : vector<8x1xf32>
    %131 = vector.broadcast %130 : vector<8x1xf32> to vector<8x32xf32>
    %132 = arith.mulf %127, %131 : vector<8x32xf32>
    %133 = vector.broadcast %113 : vector<1x32xf32> to vector<8x32xf32>
    %134 = arith.mulf %132, %133 : vector<8x32xf32>
    %135 = vector.broadcast %114 : vector<1x32xf32> to vector<8x32xf32>
    %136 = arith.addf %134, %135 : vector<8x32xf32>
    %137 = arith.index_cast %arg0 : i32 to index
    %138 = memref.load %arg2[%137] : memref<2xi32, #tpu.memory_space<smem>>
    %c0_43 = arith.constant 0 : index
    %c0_44 = arith.constant 0 : index
    %139 = vector.load %arg15[%c0_43, %c0_44] : memref<32x32xbf16, #tpu.memory_space<vmem>>, vector<32x32xbf16>
    %c0_45 = arith.constant 0 : index
    %c0_46 = arith.constant 0 : index
    %140 = vector.load %arg16[%c0_45, %c0_46] : memref<1x32xf32, #tpu.memory_space<vmem>>, vector<1x32xf32>
    %c0_47 = arith.constant 0 : index
    %c0_48 = arith.constant 0 : index
    %141 = vector.load %arg17[%c0_47, %c0_48] : memref<32x64xbf16, #tpu.memory_space<vmem>>, vector<32x64xbf16>
    %c0_49 = arith.constant 0 : index
    %c0_50 = arith.constant 0 : index
    %142 = vector.load %arg18[%c0_49, %c0_50] : memref<1x64xf32, #tpu.memory_space<vmem>>, vector<1x64xf32>
    %c0_51 = arith.constant 0 : index
    %c0_52 = arith.constant 0 : index
    %143 = vector.load %arg19[%c0_51, %c0_52] : memref<32x32xbf16, #tpu.memory_space<vmem>>, vector<32x32xbf16>
    %c0_53 = arith.constant 0 : index
    %c0_54 = arith.constant 0 : index
    %144 = vector.load %arg20[%c0_53, %c0_54] : memref<1x32xf32, #tpu.memory_space<vmem>>, vector<1x32xf32>
    %145 = arith.truncf %136 : vector<8x32xf32> to vector<8x32xbf16>
    %cst_55 = arith.constant dense<0.000000e+00> : vector<8x32xf32>
    %146 = tpu.matmul %145, %139, %cst_55 {dimension_numbers = #tpu.dot_dimension_numbers<[1], [0], [0], [1], [0, 0, 1, 1], [], []>} : vector<8x32xbf16>, vector<32x32xbf16>, vector<8x32xf32> -> vector<8x32xf32>
    %147 = vector.broadcast %140 : vector<1x32xf32> to vector<8x32xf32>
    %148 = arith.addf %146, %147 : vector<8x32xf32>
    %149 = arith.truncf %3 : vector<10x32xf32> to vector<10x32xbf16>
    %cst_56 = arith.constant dense<0.000000e+00> : vector<10x64xf32>
    %150 = tpu.matmul %149, %141, %cst_56 {dimension_numbers = #tpu.dot_dimension_numbers<[1], [0], [0], [1], [0, 0, 1, 1], [], []>} : vector<10x32xbf16>, vector<32x64xbf16>, vector<10x64xf32> -> vector<10x64xf32>
    %151 = vector.broadcast %142 : vector<1x64xf32> to vector<10x64xf32>
    %152 = arith.addf %150, %151 : vector<10x64xf32>
    %153 = vector.extract_strided_slice %152 {offsets = [0, 0], sizes = [10, 32], strides = [1, 1]} : vector<10x64xf32> to vector<10x32xf32>
    %154 = vector.extract_strided_slice %152 {offsets = [0, 32], sizes = [10, 32], strides = [1, 1]} : vector<10x64xf32> to vector<10x32xf32>
    %155 = vector.extract_strided_slice %148 {offsets = [0, 0], sizes = [8, 8], strides = [1, 1]} : vector<8x32xf32> to vector<8x8xf32>
    %156 = vector.extract_strided_slice %148 {offsets = [0, 8], sizes = [8, 8], strides = [1, 1]} : vector<8x32xf32> to vector<8x8xf32>
    %157 = vector.extract_strided_slice %148 {offsets = [0, 16], sizes = [8, 8], strides = [1, 1]} : vector<8x32xf32> to vector<8x8xf32>
    %158 = vector.extract_strided_slice %148 {offsets = [0, 24], sizes = [8, 8], strides = [1, 1]} : vector<8x32xf32> to vector<8x8xf32>
    %159 = vector.shape_cast %155 : vector<8x8xf32> to vector<1x8x8xf32>
    %160 = vector.shape_cast %156 : vector<8x8xf32> to vector<1x8x8xf32>
    %161 = vector.shape_cast %157 : vector<8x8xf32> to vector<1x8x8xf32>
    %162 = vector.shape_cast %158 : vector<8x8xf32> to vector<1x8x8xf32>
    %163 = tpu.concatenate %159, %160, %161, %162 in 0 : vector<1x8x8xf32>, vector<1x8x8xf32>, vector<1x8x8xf32>, vector<1x8x8xf32> -> vector<4x8x8xf32>
    %164 = vector.extract_strided_slice %153 {offsets = [0, 0], sizes = [10, 8], strides = [1, 1]} : vector<10x32xf32> to vector<10x8xf32>
    %165 = vector.extract_strided_slice %153 {offsets = [0, 8], sizes = [10, 8], strides = [1, 1]} : vector<10x32xf32> to vector<10x8xf32>
    %166 = vector.extract_strided_slice %153 {offsets = [0, 16], sizes = [10, 8], strides = [1, 1]} : vector<10x32xf32> to vector<10x8xf32>
    %167 = vector.extract_strided_slice %153 {offsets = [0, 24], sizes = [10, 8], strides = [1, 1]} : vector<10x32xf32> to vector<10x8xf32>
    %168 = vector.shape_cast %164 : vector<10x8xf32> to vector<1x10x8xf32>
    %169 = vector.shape_cast %165 : vector<10x8xf32> to vector<1x10x8xf32>
    %170 = vector.shape_cast %166 : vector<10x8xf32> to vector<1x10x8xf32>
    %171 = vector.shape_cast %167 : vector<10x8xf32> to vector<1x10x8xf32>
    %172 = tpu.concatenate %168, %169, %170, %171 in 0 : vector<1x10x8xf32>, vector<1x10x8xf32>, vector<1x10x8xf32>, vector<1x10x8xf32> -> vector<4x10x8xf32>
    %173 = vector.extract_strided_slice %154 {offsets = [0, 0], sizes = [10, 8], strides = [1, 1]} : vector<10x32xf32> to vector<10x8xf32>
    %174 = vector.extract_strided_slice %154 {offsets = [0, 8], sizes = [10, 8], strides = [1, 1]} : vector<10x32xf32> to vector<10x8xf32>
    %175 = vector.extract_strided_slice %154 {offsets = [0, 16], sizes = [10, 8], strides = [1, 1]} : vector<10x32xf32> to vector<10x8xf32>
    %176 = vector.extract_strided_slice %154 {offsets = [0, 24], sizes = [10, 8], strides = [1, 1]} : vector<10x32xf32> to vector<10x8xf32>
    %177 = vector.shape_cast %173 : vector<10x8xf32> to vector<1x10x8xf32>
    %178 = vector.shape_cast %174 : vector<10x8xf32> to vector<1x10x8xf32>
    %179 = vector.shape_cast %175 : vector<10x8xf32> to vector<1x10x8xf32>
    %180 = vector.shape_cast %176 : vector<10x8xf32> to vector<1x10x8xf32>
    %181 = tpu.concatenate %177, %178, %179, %180 in 0 : vector<1x10x8xf32>, vector<1x10x8xf32>, vector<1x10x8xf32>, vector<1x10x8xf32> -> vector<4x10x8xf32>
    %182 = arith.truncf %163 : vector<4x8x8xf32> to vector<4x8x8xbf16>
    %183 = arith.truncf %172 : vector<4x10x8xf32> to vector<4x10x8xbf16>
    "tpu.trace_start"() <{level = 10 : i32, message = "hqd,hkd->hqk"}> : () -> ()
    %cst_57 = arith.constant dense<0.000000e+00> : vector<4x8x10xf32>
    %184 = tpu.matmul %182, %183, %cst_57 {dimension_numbers = #tpu.dot_dimension_numbers<[2], [2], [1], [1], [0, 0, 0, 1, 1, 1], [0], [0]>} : vector<4x8x8xbf16>, vector<4x10x8xbf16>, vector<4x8x10xf32> -> vector<4x8x10xf32>
    "tpu.trace_stop"() : () -> ()
    %cst_58 = arith.constant 0.353553385 : f32
    %185 = vector.broadcast %cst_58 : f32 to vector<4x8x10xf32>
    %186 = arith.mulf %184, %185 : vector<4x8x10xf32>
    %187 = tpu.iota {dimensions = array<i32: 2>} : vector<4x8x10xi32>
    %188 = vector.broadcast %138 : i32 to vector<4x8x10xi32>
    %189 = arith.cmpi slt, %187, %188 : vector<4x8x10xi32>
    %cst_59 = arith.constant -1.000000e+30 : f32
    %190 = vector.broadcast %cst_59 : f32 to vector<4x8x10xf32>
    %191 = arith.select %189, %186, %190 : vector<4x8x10xi1>, vector<4x8x10xf32>
    %cst_60 = arith.constant dense<0xFF800000> : vector<4x8xf32>
    %192 = vector.multi_reduction <maximumf>, %191, %cst_60 [2] : vector<4x8x10xf32> to vector<4x8xf32>
    %193 = vector.shape_cast %192 : vector<4x8xf32> to vector<4x8x1xf32>
    %194 = vector.broadcast %193 : vector<4x8x1xf32> to vector<4x8x10xf32>
    %195 = arith.subf %191, %194 : vector<4x8x10xf32>
    %196 = math.exp %195 : vector<4x8x10xf32>
    %cst_61 = arith.constant dense<0.000000e+00> : vector<4x8xf32>
    %197 = vector.multi_reduction <add>, %196, %cst_61 [2] : vector<4x8x10xf32> to vector<4x8xf32>
    %198 = vector.shape_cast %197 : vector<4x8xf32> to vector<4x8x1xf32>
    %199 = tpu.reciprocal %198 {approx = true} : vector<4x8x1xf32> -> vector<4x8x1xf32>
    %200 = vector.broadcast %199 : vector<4x8x1xf32> to vector<4x8x10xf32>
    %201 = arith.mulf %196, %200 : vector<4x8x10xf32>
    %202 = arith.truncf %201 : vector<4x8x10xf32> to vector<4x8x10xbf16>
    %203 = arith.truncf %181 : vector<4x10x8xf32> to vector<4x10x8xbf16>
    "tpu.trace_start"() <{level = 10 : i32, message = "hqk,hkd->hqd"}> : () -> ()
    %cst_62 = arith.constant dense<0.000000e+00> : vector<4x8x8xf32>
    %204 = tpu.matmul %202, %203, %cst_62 {dimension_numbers = #tpu.dot_dimension_numbers<[2], [1], [1], [2], [0, 0, 0, 1, 1, 2], [0], [0]>} : vector<4x8x10xbf16>, vector<4x10x8xbf16>, vector<4x8x8xf32> -> vector<4x8x8xf32>
    "tpu.trace_stop"() : () -> ()
    %205 = vector.extract_strided_slice %204 {offsets = [0, 0, 0], sizes = [1, 8, 8], strides = [1, 1, 1]} : vector<4x8x8xf32> to vector<1x8x8xf32>
    %206 = vector.shape_cast %205 : vector<1x8x8xf32> to vector<8x8xf32>
    %207 = vector.extract_strided_slice %204 {offsets = [1, 0, 0], sizes = [1, 8, 8], strides = [1, 1, 1]} : vector<4x8x8xf32> to vector<1x8x8xf32>
    %208 = vector.shape_cast %207 : vector<1x8x8xf32> to vector<8x8xf32>
    %209 = vector.extract_strided_slice %204 {offsets = [2, 0, 0], sizes = [1, 8, 8], strides = [1, 1, 1]} : vector<4x8x8xf32> to vector<1x8x8xf32>
    %210 = vector.shape_cast %209 : vector<1x8x8xf32> to vector<8x8xf32>
    %211 = vector.extract_strided_slice %204 {offsets = [3, 0, 0], sizes = [1, 8, 8], strides = [1, 1, 1]} : vector<4x8x8xf32> to vector<1x8x8xf32>
    %212 = vector.shape_cast %211 : vector<1x8x8xf32> to vector<8x8xf32>
    %213 = tpu.concatenate %206, %208, %210, %212 in 1 : vector<8x8xf32>, vector<8x8xf32>, vector<8x8xf32>, vector<8x8xf32> -> vector<8x32xf32>
    %214 = arith.truncf %213 : vector<8x32xf32> to vector<8x32xbf16>
    %cst_63 = arith.constant dense<0.000000e+00> : vector<8x32xf32>
    %215 = tpu.matmul %214, %143, %cst_63 {dimension_numbers = #tpu.dot_dimension_numbers<[1], [0], [0], [1], [0, 0, 1, 1], [], []>} : vector<8x32xbf16>, vector<32x32xbf16>, vector<8x32xf32> -> vector<8x32xf32>
    %216 = arith.addf %112, %215 : vector<8x32xf32>
    %217 = vector.broadcast %144 : vector<1x32xf32> to vector<8x32xf32>
    %218 = arith.addf %216, %217 : vector<8x32xf32>
    %c0_64 = arith.constant 0 : index
    %c0_65 = arith.constant 0 : index
    %219 = vector.load %arg21[%c0_64, %c0_65] : memref<1x32xf32, #tpu.memory_space<vmem>>, vector<1x32xf32>
    %c0_66 = arith.constant 0 : index
    %c0_67 = arith.constant 0 : index
    %220 = vector.load %arg22[%c0_66, %c0_67] : memref<1x32xf32, #tpu.memory_space<vmem>>, vector<1x32xf32>
    %cst_68 = arith.constant dense<0.000000e+00> : vector<8xf32>
    %221 = vector.multi_reduction <add>, %218, %cst_68 [1] : vector<8x32xf32> to vector<8xf32>
    %222 = vector.shape_cast %221 : vector<8xf32> to vector<8x1xf32>
    %cst_69 = arith.constant 3.200000e+01 : f32
    %223 = vector.broadcast %cst_69 : f32 to vector<8x1xf32>
    %224 = arith.divf %222, %223 : vector<8x1xf32>
    %225 = vector.broadcast %224 : vector<8x1xf32> to vector<8x32xf32>
    %226 = arith.subf %218, %225 : vector<8x32xf32>
    %227 = arith.mulf %226, %226 : vector<8x32xf32>
    %cst_70 = arith.constant dense<0.000000e+00> : vector<8xf32>
    %228 = vector.multi_reduction <add>, %227, %cst_70 [1] : vector<8x32xf32> to vector<8xf32>
    %229 = vector.shape_cast %228 : vector<8xf32> to vector<8x1xf32>
    %cst_71 = arith.constant 3.200000e+01 : f32
    %230 = vector.broadcast %cst_71 : f32 to vector<8x1xf32>
    %231 = arith.divf %229, %230 : vector<8x1xf32>
    %232 = vector.broadcast %224 : vector<8x1xf32> to vector<8x32xf32>
    %233 = arith.subf %218, %232 : vector<8x32xf32>
    %cst_72 = arith.constant 9.99999974E-6 : f32
    %234 = vector.broadcast %cst_72 : f32 to vector<8x1xf32>
    %235 = arith.addf %231, %234 : vector<8x1xf32>
    %236 = math.rsqrt %235 : vector<8x1xf32>
    %237 = vector.broadcast %236 : vector<8x1xf32> to vector<8x32xf32>
    %238 = arith.mulf %233, %237 : vector<8x32xf32>
    %239 = vector.broadcast %219 : vector<1x32xf32> to vector<8x32xf32>
    %240 = arith.mulf %238, %239 : vector<8x32xf32>
    %241 = vector.broadcast %220 : vector<1x32xf32> to vector<8x32xf32>
    %242 = arith.addf %240, %241 : vector<8x32xf32>
    %243 = arith.truncf %242 : vector<8x32xf32> to vector<8x32xbf16>
    %c0_73 = arith.constant 0 : index
    %c0_74 = arith.constant 0 : index
    %244 = vector.load %arg23[%c0_73, %c0_74] : memref<32x64xbf16, #tpu.memory_space<vmem>>, vector<32x64xbf16>
    %cst_75 = arith.constant dense<0.000000e+00> : vector<8x64xf32>
    %245 = tpu.matmul %243, %244, %cst_75 {dimension_numbers = #tpu.dot_dimension_numbers<[1], [0], [0], [1], [0, 0, 1, 1], [], []>} : vector<8x32xbf16>, vector<32x64xbf16>, vector<8x64xf32> -> vector<8x64xf32>
    %c0_76 = arith.constant 0 : index
    %c0_77 = arith.constant 0 : index
    %246 = vector.load %arg24[%c0_76, %c0_77] : memref<1x64xf32, #tpu.memory_space<vmem>>, vector<1x64xf32>
    %247 = vector.broadcast %246 : vector<1x64xf32> to vector<8x64xf32>
    %248 = arith.addf %245, %247 : vector<8x64xf32>
    %cst_78 = arith.constant 0.000000e+00 : f32
    %249 = vector.broadcast %cst_78 : f32 to vector<8x64xf32>
    %250 = arith.maximumf %248, %249 : vector<8x64xf32>
    %251 = arith.truncf %250 : vector<8x64xf32> to vector<8x64xbf16>
    %c0_79 = arith.constant 0 : index
    %c0_80 = arith.constant 0 : index
    %252 = vector.load %arg25[%c0_79, %c0_80] : memref<64x32xbf16, #tpu.memory_space<vmem>>, vector<64x32xbf16>
    %cst_81 = arith.constant dense<0.000000e+00> : vector<8x32xf32>
    %253 = tpu.matmul %251, %252, %cst_81 {dimension_numbers = #tpu.dot_dimension_numbers<[1], [0], [0], [1], [0, 0, 1, 1], [], []>} : vector<8x64xbf16>, vector<64x32xbf16>, vector<8x32xf32> -> vector<8x32xf32>
    %c0_82 = arith.constant 0 : index
    %c0_83 = arith.constant 0 : index
    %254 = vector.load %arg26[%c0_82, %c0_83] : memref<1x32xf32, #tpu.memory_space<vmem>>, vector<1x32xf32>
    %255 = vector.broadcast %254 : vector<1x32xf32> to vector<8x32xf32>
    %256 = arith.addf %253, %255 : vector<8x32xf32>
    %257 = arith.addf %218, %256 : vector<8x32xf32>
    %c0_84 = arith.constant 0 : index
    %c0_85 = arith.constant 0 : index
    %c0_86 = arith.constant 0 : index
    %258 = vector.load %arg27[%c0_84, %c0_85, %c0_86] : memref<1x8x32xf32, #tpu.memory_space<vmem>>, vector<1x8x32xf32>
    %259 = vector.shape_cast %258 : vector<1x8x32xf32> to vector<8x32xf32>
    %260 = vector.shape_cast %257 : vector<8x32xf32> to vector<1x8x32xf32>
    tpu.vector_store %arg27[%c0_84, %c0_85, %c0_86], %260 {strides = array<i32>} : memref<1x8x32xf32, #tpu.memory_space<vmem>>, vector<1x8x32xf32>,
    return
  }
  func.func @transform_0(%arg0: i32, %arg1: memref<2xi32, #tpu.memory_space<smem>>, %arg2: memref<2xi32, #tpu.memory_space<smem>>) -> (i32, i32, i32) {
    %c0_i32 = arith.constant 0 : i32
    %c0_i32_0 = arith.constant 0 : i32
    %c0_i32_1 = arith.constant 0 : i32
    return %arg0, %c0_i32, %c0_i32_0 : i32, i32, i32
  }
  func.func @transform_1(%arg0: i32, %arg1: memref<2xi32, #tpu.memory_space<smem>>, %arg2: memref<2xi32, #tpu.memory_space<smem>>) -> (i32, i32, i32) {
    %c0_i32 = arith.constant 0 : i32
    %c0_i32_0 = arith.constant 0 : i32
    %c0_i32_1 = arith.constant 0 : i32
    return %arg0, %c0_i32, %c0_i32_0 : i32, i32, i32
  }
  func.func @transform_2(%arg0: i32, %arg1: memref<2xi32, #tpu.memory_space<smem>>, %arg2: memref<2xi32, #tpu.memory_space<smem>>) -> (i32, i32) {
    %c0_i32 = arith.constant 0 : i32
    %c0_i32_0 = arith.constant 0 : i32
    %c0_i32_1 = arith.constant 0 : i32
    return %c0_i32, %c0_i32_0 : i32, i32
  }
  func.func @transform_3(%arg0: i32, %arg1: memref<2xi32, #tpu.memory_space<smem>>, %arg2: memref<2xi32, #tpu.memory_space<smem>>) -> (i32, i32) {
    %c0_i32 = arith.constant 0 : i32
    %c0_i32_0 = arith.constant 0 : i32
    %c0_i32_1 = arith.constant 0 : i32
    return %c0_i32, %c0_i32_0 : i32, i32
  }
  func.func @transform_4(%arg0: i32, %arg1: memref<2xi32, #tpu.memory_space<smem>>, %arg2: memref<2xi32, #tpu.memory_space<smem>>) -> (i32, i32) {
    %c0_i32 = arith.constant 0 : i32
    %c0_i32_0 = arith.constant 0 : i32
    %c0_i32_1 = arith.constant 0 : i32
    return %c0_i32, %c0_i32_0 : i32, i32
  }
  func.func @transform_5(%arg0: i32, %arg1: memref<2xi32, #tpu.memory_space<smem>>, %arg2: memref<2xi32, #tpu.memory_space<smem>>) -> (i32, i32) {
    %c0_i32 = arith.constant 0 : i32
    %c0_i32_0 = arith.constant 0 : i32
    %c0_i32_1 = arith.constant 0 : i32
    return %c0_i32, %c0_i32_0 : i32, i32
  }
  func.func @transform_6(%arg0: i32, %arg1: memref<2xi32, #tpu.memory_space<smem>>, %arg2: memref<2xi32, #tpu.memory_space<smem>>) -> (i32, i32) {
    %c0_i32 = arith.constant 0 : i32
    %c0_i32_0 = arith.constant 0 : i32
    %c0_i32_1 = arith.constant 0 : i32
    return %c0_i32, %c0_i32_0 : i32, i32
  }
  func.func @transform_7(%arg0: i32, %arg1: memref<2xi32, #tpu.memory_space<smem>>, %arg2: memref<2xi32, #tpu.memory_space<smem>>) -> (i32, i32) {
    %c0_i32 = arith.constant 0 : i32
    %c0_i32_0 = arith.constant 0 : i32
    %c0_i32_1 = arith.constant 0 : i32
    return %c0_i32, %c0_i32_0 : i32, i32
  }
  func.func @transform_8(%arg0: i32, %arg1: memref<2xi32, #tpu.memory_space<smem>>, %arg2: memref<2xi32, #tpu.memory_space<smem>>) -> (i32, i32) {
    %c0_i32 = arith.constant 0 : i32
    %c0_i32_0 = arith.constant 0 : i32
    %c0_i32_1 = arith.constant 0 : i32
    return %c0_i32, %c0_i32_0 : i32, i32
  }
  func.func @transform_9(%arg0: i32, %arg1: memref<2xi32, #tpu.memory_space<smem>>, %arg2: memref<2xi32, #tpu.memory_space<smem>>) -> (i32, i32) {
    %c0_i32 = arith.constant 0 : i32
    %c0_i32_0 = arith.constant 0 : i32
    %c0_i32_1 = arith.constant 0 : i32
    return %c0_i32, %c0_i32_0 : i32, i32
  }
  func.func @transform_10(%arg0: i32, %arg1: memref<2xi32, #tpu.memory_space<smem>>, %arg2: memref<2xi32, #tpu.memory_space<smem>>) -> (i32, i32) {
    %c0_i32 = arith.constant 0 : i32
    %c0_i32_0 = arith.constant 0 : i32
    %c0_i32_1 = arith.constant 0 : i32
    return %c0_i32, %c0_i32_0 : i32, i32
  }
  func.func @transform_11(%arg0: i32, %arg1: memref<2xi32, #tpu.memory_space<smem>>, %arg2: memref<2xi32, #tpu.memory_space<smem>>) -> (i32, i32) {
    %c0_i32 = arith.constant 0 : i32
    %c0_i32_0 = arith.constant 0 : i32
    %c0_i32_1 = arith.constant 0 : i32
    return %c0_i32, %c0_i32_0 : i32, i32
  }
  func.func @transform_12(%arg0: i32, %arg1: memref<2xi32, #tpu.memory_space<smem>>, %arg2: memref<2xi32, #tpu.memory_space<smem>>) -> (i32, i32) {
    %c0_i32 = arith.constant 0 : i32
    %c0_i32_0 = arith.constant 0 : i32
    %c0_i32_1 = arith.constant 0 : i32
    return %c0_i32, %c0_i32_0 : i32, i32
  }
  func.func @transform_13(%arg0: i32, %arg1: memref<2xi32, #tpu.memory_space<smem>>, %arg2: memref<2xi32, #tpu.memory_space<smem>>) -> (i32, i32) {
    %c0_i32 = arith.constant 0 : i32
    %c0_i32_0 = arith.constant 0 : i32
    %c0_i32_1 = arith.constant 0 : i32
    return %c0_i32, %c0_i32_0 : i32, i32
  }
  func.func @transform_14(%arg0: i32, %arg1: memref<2xi32, #tpu.memory_space<smem>>, %arg2: memref<2xi32, #tpu.memory_space<smem>>) -> (i32, i32) {
    %c0_i32 = arith.constant 0 : i32
    %c0_i32_0 = arith.constant 0 : i32
    %c0_i32_1 = arith.constant 0 : i32
    return %c0_i32, %c0_i32_0 : i32, i32
  }
  func.func @transform_15(%arg0: i32, %arg1: memref<2xi32, #tpu.memory_space<smem>>, %arg2: memref<2xi32, #tpu.memory_space<smem>>) -> (i32, i32) {
    %c0_i32 = arith.constant 0 : i32
    %c0_i32_0 = arith.constant 0 : i32
    %c0_i32_1 = arith.constant 0 : i32
    return %c0_i32, %c0_i32_0 : i32, i32
  }
  func.func @transform_16(%arg0: i32, %arg1: memref<2xi32, #tpu.memory_space<smem>>, %arg2: memref<2xi32, #tpu.memory_space<smem>>) -> (i32, i32) {
    %c0_i32 = arith.constant 0 : i32
    %c0_i32_0 = arith.constant 0 : i32
    %c0_i32_1 = arith.constant 0 : i32
    return %c0_i32, %c0_i32_0 : i32, i32
  }
  func.func @transform_17(%arg0: i32, %arg1: memref<2xi32, #tpu.memory_space<smem>>, %arg2: memref<2xi32, #tpu.memory_space<smem>>) -> (i32, i32) {
    %c0_i32 = arith.constant 0 : i32
    %c0_i32_0 = arith.constant 0 : i32
    %c0_i32_1 = arith.constant 0 : i32
    return %c0_i32, %c0_i32_0 : i32, i32
  }
  func.func @transform_18(%arg0: i32, %arg1: memref<2xi32, #tpu.memory_space<smem>>, %arg2: memref<2xi32, #tpu.memory_space<smem>>) -> (i32, i32) {
    %c0_i32 = arith.constant 0 : i32
    %c0_i32_0 = arith.constant 0 : i32
    %c0_i32_1 = arith.constant 0 : i32
    return %c0_i32, %c0_i32_0 : i32, i32
  }
  func.func @transform_19(%arg0: i32, %arg1: memref<2xi32, #tpu.memory_space<smem>>, %arg2: memref<2xi32, #tpu.memory_space<smem>>) -> (i32, i32) {
    %c0_i32 = arith.constant 0 : i32
    %c0_i32_0 = arith.constant 0 : i32
    %c0_i32_1 = arith.constant 0 : i32
    return %c0_i32, %c0_i32_0 : i32, i32
  }
  func.func @transform_20(%arg0: i32, %arg1: memref<2xi32, #tpu.memory_space<smem>>, %arg2: memref<2xi32, #tpu.memory_space<smem>>) -> (i32, i32) {
    %c0_i32 = arith.constant 0 : i32
    %c0_i32_0 = arith.constant 0 : i32
    %c0_i32_1 = arith.constant 0 : i32
    return %c0_i32, %c0_i32_0 : i32, i32
  }
  func.func @transform_21(%arg0: i32, %arg1: memref<2xi32, #tpu.memory_space<smem>>, %arg2: memref<2xi32, #tpu.memory_space<smem>>) -> (i32, i32) {
    %c0_i32 = arith.constant 0 : i32
    %c0_i32_0 = arith.constant 0 : i32
    %c0_i32_1 = arith.constant 0 : i32
    return %c0_i32, %c0_i32_0 : i32, i32
  }
  func.func @transform_22(%arg0: i32, %arg1: memref<2xi32, #tpu.memory_space<smem>>, %arg2: memref<2xi32, #tpu.memory_space<smem>>) -> (i32, i32) {
    %c0_i32 = arith.constant 0 : i32
    %c0_i32_0 = arith.constant 0 : i32
    %c0_i32_1 = arith.constant 0 : i32
    return %c0_i32, %c0_i32_0 : i32, i32
  }
  func.func @transform_23(%arg0: i32, %arg1: memref<2xi32, #tpu.memory_space<smem>>, %arg2: memref<2xi32, #tpu.memory_space<smem>>) -> (i32, i32) {
    %c0_i32 = arith.constant 0 : i32
    %c0_i32_0 = arith.constant 0 : i32
    %c0_i32_1 = arith.constant 0 : i32
    return %c0_i32, %c0_i32_0 : i32, i32
  }
  func.func @transform_24(%arg0: i32, %arg1: memref<2xi32, #tpu.memory_space<smem>>, %arg2: memref<2xi32, #tpu.memory_space<smem>>) -> (i32, i32, i32) {
    %c0_i32 = arith.constant 0 : i32
    %c0_i32_0 = arith.constant 0 : i32
    %c0_i32_1 = arith.constant 0 : i32
    return %arg0, %c0_i32, %c0_i32_0 : i32, i32, i32
  }
}

</mosaic_0001>

<bundles_post_ra>
// kernel: _lambda_.5
= control target key start
LH: loop header
LB: loop body
LE: loop exit
PB: predicated region body
PF: predicated region fallthrough
CT: control target
= control target key end

     0   :  { %10 = vsyncpa [#allocation3], 0  ;;  %s811_s0 = inlined_call_operand.vmem [shape: f32[2,8,32], index: 0, kind: input, shape index: {}]   ;;  %s812_s1 = inlined_call_operand.vmem [shape: f32[1,32], index: 1, kind: input, shape index: {}]   ;;  %s813_s2 = inlined_call_operand.vmem [shape: f32[1,32], index: 2, kind: input, shape index: {}]   ;;  %s814_s3 = inlined_call_operand.vmem [shape: bf16[32,50], index: 3, kind: input, shape index: {}]   ;;  %s815_s4 = inlined_call_operand.vmem [shape: f32[1,50], index: 4, kind: input, shape index: {}]   ;;  %s816_s5 = inlined_call_operand.hbm [shape: f32[2,8,50], index: 5, kind: output, shape index: {}]  }
   0x1   :  { %12 = vsyncpa [#allocation3 + $0x1], 0  ;;  %s681_s18 = smov 0   ;;  %s683_s19 = smov 0  }
   0x2   :  { %s685_s20 = smov 0   ;;  %s687_s21 = smov 0  }
   0x3   :  { %s689_s22 = smov 0   ;;  %s691_s23 = smov 0  }
   0x4 LB: > { %s477_s24 = sadd.s32 4294967295, %s646_s23   ;;  %s478_s25 = sadd.s32 4294967294, %s646_s23   ;;  %s646_s23 = sphi %s691_s23, %s18_s23   ;;  %s642_s22 = sphi %s689_s22, %s823_s22   ;;  %s638_s21 = sphi %s687_s21, %s822_s21   ;;  %s634_s20 = sphi %s685_s20, %s821_s20   ;;  %s630_s19 = sphi %s683_s19, %s820_s19   ;;  %s626_s18 = sphi %s681_s18, %s819_s18  }
   0x5   : > { %s30_s26 = sadd.s32 1, %s642_s22  ;;  %s159_s27 = sadd.s32 1, %s634_s20 }
   0x6   : > { %p32_p0 = scmp.ge.s32.totalorder %s30_s26, 2  ;;  %p169_p1 = scmp.ne.s32.totalorder %s634_s20, %s630_s19 }
   0x7   : > { %p170_p2 = scmp.eq.s32.totalorder %s477_s24, 1  ;;  %p175_p3 = scmp.ne.s32.totalorder %s630_s19, %s626_s18 }
   0x8   : > { %s825_s26 = smov (%p32_p0, %s30_s26), 0  ;;  %p176_p5 = scmp.eq.s32.totalorder %s478_s25, 1 }
   0x9   : > { %p721_p4 = por %p170_p2, %p169_p1  ;;  %s154_s29 = ssub.s32 %s642_s22, %s825_s26 }
   0xa   : > { %p483_p6 = scmp.ge.s32.totalorder %s646_s23, 1  ;;  %p157_p7 = scmp.eq.s32.totalorder %s154_s29, 0 }
   0xb   : > { %p728_p8 = por %p176_p5, %p175_p3  ;;  %p220_p9 = scmp.lt.s32.totalorder %s646_s23, 3 }
   0xc   : > { %s734_s6 = scalar_select %p157_p7, %s634_s20, %s159_s27  }
   0xd   : > { %p221_p10 = pnand %p483_p6, %p220_p9 }
   0xe   : > { %p254_p11 = scmp.lt.s32.totalorder (!%p221_p10), %s638_s21, 1  ;;  %vm269_vm0 = vcmask (!%p221_p10), 261120   ;;  %v564_v7 = vld [vmem:[%s814_s3] sm:$0xff] (!%p221_p10)   ;;  %v648_v8 = vmov (!%p221_p10), 0.0   ;;  %v565_v9 = vld [vmem:[%s814_s3 + $0x8] sm:$0xff] (!%p221_p10)   ;;  %vm649_vm1 = vmmov (!%p221_p10), 0  }
   0xf   : > { %224 = sbr.rel (%p221_p10) target bundleno = 570 (0x23a), region = 40  ;;  %499 = vmatprep.subr.bf16.mxu0 (!%p221_p10), %v648_v8  ;;  %503 = vmatprep.mubr.msk.bf16.mxu0 (!%p221_p10), %vm649_vm1, %v648_v8  ;;  %v486_v14 = vld [vmem:[%s812_s1] ss:$0 sm:$0xff] (!%p221_p10)  ;;  %s251_s27 = sand.u32 (!%p221_p10), 1, %s630_s19   ;;  %vm365_vm2 = vcmask (!%p221_p10), 408576  }
  0x10   : > { %500 = vmatpush3.bf16.msra.mxu0 (!%p221_p10), %v564_v7  ;;  %v487_v16 = vld [vmem:[%s813_s2] ss:$0 sm:$0xff] (!%p221_p10)  ;;  %s484_s29 = sshll.u32 (!%p221_p10), %s251_s27, 3  ;;  %s493_s9 = sshll.u32 (!%p221_p10), %s638_s21, 7 }
  0x11   : > { %501 = vmatprep.subr.bf16.mxu0 (!%p221_p10), %v648_v8  ;;  %v488_v20 = vld [vmem:[%s815_s4] ss:$0 sm:$0xff] (!%p221_p10)  ;;  %s253_s10 = scalar_lea.vmem (!%p221_p10), [#allocation2], %s484_s29  ;;  %s764_s14 = scalar_lea.hbm (!%p221_p10), %s816_s5, %s493_s9 }
  0x12   : > { %s650_s16 = smov (!%p221_p10), [#allocation2]  }
  0x13   : > { %s572_s17 = sshll.u32 (!%p221_p10), %s650_s16, 4  ;;  %s573_s17 = int_to_ptr.vmem [resolvable:$false] %s572_s17 }
  0x14   : > { %502 = vmatpush3.bf16.msra.mxu0 (!%p221_p10), %v565_v9  ;;  %s574_s24 = scalar_lea.vmem (!%p221_p10), %s573_s17, 256 }
  0x16   : > { %s255_s7 = scalar_select %p254_p11, %s638_s21, 1 }
  0x17   : > { %s368_s21 = scalar_lea.sflag [#allocation3], %s251_s27 }
  0x18   : > { %s485_s8 = sshll.u32 %s255_s7, 3 }
  0x19   : > { %s257_s11 = scalar_lea.vmem %s811_s0, %s485_s8 }
  0x1a   : > { %v266_v0 = vld [vmem:[%s257_s11] sm:$0xff]  ;;  %s382_s11 = sshll.u32 %s253_s10, 4  ;;  %s766_s11 = int_to_ptr.vmem [resolvable:$true] %s382_s11 }
  0x1b   : > { %v270_v1 = vsel %vm269_vm0, %v266_v0, 0.0  ;;  %s568_s15 = scalar_lea.vmem %s766_s11, 128  ;;  %p575_p1 = scmp.lt.s32.totalorder %s766_s11, %s573_s17 }
  0x1c   : > { %271 = vadd.xlane.f32.xlu0 %v270_v1  ;;  %p569_p12 = scmp.ne.s32.totalorder %s766_s11, %s568_s15  ;;  %p576_p2 = scmp.lt.s32.totalorder %s574_s24, %s568_s15 }
  0x1e   : > { %p570_p13 = pnand %p569_p12, %p721_p4  ;;  %p577_p3 = por %p576_p2, %p575_p1 }
  0x20   : > { %p571_p0 = pneg %p570_p13 }
  0x22   : > { %p578_p5 = pnand %p577_p3, %p571_p0 }
  0xa9   : > { %v272_v2 = vpop.xlane.xlu0 %271 }
  0xaa   : > { %v274_v3 = vmul.f32 0.03125, %v272_v2 }
  0xac   : > { %v275_v4 = vsub.f32 %v266_v0, %v274_v3 }
  0xae   : > { %v276_v5 = vmul.f32 %v275_v4, %v275_v4 }
  0xb0   : > { %v277_v6 = vsel %vm269_vm0, %v276_v5, 0.0 }
  0xb1   : > { %278 = vadd.xlane.f32.xlu0 %v277_v6 }
 0x13e   : > { %v279_v10 = vpop.xlane.xlu0 %278 }
 0x13f   : > { %v280_v11 = vmul.f32 0.03125, %v279_v10 }
 0x141   : > { %v281_v12 = vadd.f32 1e-05, %v280_v11 }
 0x143   : > { %566 = vrsqrt.f32 %v281_v12 }
 0x14d   : > { %v567_v13 = vpop.eup %566 }
 0x14e   : > { %v283_v15 = vmul.f32 %v567_v13, %v275_v4 }
 0x150   : > { %v290_v17 = vmul.f32 %v486_v14, %v283_v15 }
 0x152   : > { %v297_v18 = vadd.f32 %v487_v16, %v290_v17 }
 0x154   : > { %v298_v19 = vpack.c.bf16 %v297_v18, %v297_v18 }
 0x156   : > { %504 = vmatmul.mubr.msk.bf16.vlgmr.msra.gmra.mrb[0].mxu0 %vm269_vm0, %v298_v19 }
 0x229   : > { %v359_v21 = vpop.f32.mrb[0].mxu0 }
 0x22a   : > { %v360_v22 = vadd.f32 %v488_v20, %v359_v21  ;;  %v505_v23 = vpop.f32.mrb[1].mxu0 }
 0x22b   : > { %v362_v24 = vpop.f32.mrb[2].mxu0 }
 0x22c   : > { %v506_v25 = vpop.f32.mrb[3].mxu0  ;;  %366 = vst.msk [vmem:[%s253_s10] sm:$0xff] %vm365_vm2, %v360_v22 }
 0x22d   : > { %581 = shalt.err (!%p578_p5)
}
 0x22e   : > { %s582_s25 = scalar_lea.hbm %s764_s14, 128  ;;  %s586_s7 = scalar_lea.hbm %s816_s5, 256 }
 0x22f   : > { %p583_p6 = scmp.ne.s32.totalorder %s764_s14, %s582_s25  ;;  %p587_p10 = scmp.lt.u32.totalorder %s764_s14, %s816_s5 }
 0x230   : > { %p588_p11 = scmp.lt.u32.totalorder %s586_s7, %s582_s25  ;;  %p590_p13 = scmp.lt.u32.totalorder %s582_s25, %s764_s14 }
 0x231   : > { %p584_p7 = pnand %p583_p6, %p721_p4 }
 0x232   : > { %p589_p12 = por %p588_p11, %p587_p10 }
 0x233   : > { %p585_p9 = pneg %p584_p7 }
 0x234   : > { %p591_p0 = por %p590_p13, %p589_p12 }
 0x236   : > { %p592_p1 = pnand %p591_p0, %p585_p9 }
 0x238   : > { %595 = shalt.err (!%p592_p1)
}
 0x239   : > { %507 = dma.vmem_to_hbm [thread:$0]  (%p721_p4), %s766_s11, 128, %s764_s14, %s368_s21  }
 0x23a PF: > { %p513_p2 = scmp.ge.s32.totalorder %s646_s23, 2  ;;  %s394_s10 = sand.u32 1, %s626_s18  }
 0x23b   : > { %s395_s12 = scalar_lea.sflag [#allocation3], %s394_s10 }
 0x23c   : > { %p510_p3 = pnand %p513_p2, %p728_p8 }
 0x23e   : > { %621 = dma.done.wait (!%p510_p3), %s395_s12, 128  }
 0x23f   : > { %623 = vsyncadd (!%p510_p3), %s395_s12, 4294967168  ;;  %s18_s23 = sadd.s32 1, %s646_s23   ;;  %s819_s18 = smov %s630_s19 }
 0x240   : > { %p15_p5 = scmp.ge.s32.totalorder %s18_s23, 4   ;;  %s820_s19 = smov %s634_s20 }
 0x241   : > { %s821_s20 = smov %s734_s6  ;;  %s822_s21 = smov %s642_s22 }
 0x242   : > { %s823_s22 = smov %s825_s26  ;;  %17 = sbr.rel (!%p15_p5) target bundleno = 4 (0x4), region = 81 }
 0x249   :  { %400 = vsyncpa [#allocation3], 1 }
 0x24a   :  { %402 = vsyncpa [#allocation3 + $0x1], 1 }

// kernel: _lambda_.3
= control target key start
LH: loop header
LB: loop body
LE: loop exit
PB: predicated region body
PF: predicated region fallthrough
CT: control target
= control target key end

     0   :  { %s3409_s0 = inlined_call_operand.vmem [shape: s32[2], index: 0, kind: input, shape index: {}]   ;;  %s3410_s2 = inlined_call_operand.vmem [shape: f32[2,8,32], index: 2, kind: input, shape index: {}]   ;;  %s3411_s3 = inlined_call_operand.vmem [shape: f32[2,10,32], index: 3, kind: input, shape index: {}]   ;;  %s3412_s4 = inlined_call_operand.vmem [shape: f32[1,32], index: 4, kind: input, shape index: {}]   ;;  %s3413_s5 = inlined_call_operand.vmem [shape: f32[1,32], index: 5, kind: input, shape index: {}]   ;;  %s3414_s6 = inlined_call_operand.vmem [shape: bf16[32,32], index: 6, kind: input, shape index: {}]   ;;  %s3415_s7 = inlined_call_operand.vmem [shape: f32[1,32], index: 7, kind: input, shape index: {}]   ;;  %s3416_s8 = inlined_call_operand.vmem [shape: bf16[32,64], index: 8, kind: input, shape index: {}]   ;;  %s3417_s9 = inlined_call_operand.vmem [shape: f32[1,64], index: 9, kind: input, shape index: {}]   ;;  %s3418_s10 = inlined_call_operand.vmem [shape: bf16[32,32], index: 10, kind: input, shape index: {}]   ;;  %s3419_s11 = inlined_call_operand.vmem [shape: f32[1,32], index: 11, kind: input, shape index: {}]   ;;  %s3420_s12 = inlined_call_operand.vmem [shape: f32[1,32], index: 12, kind: input, shape index: {}]   ;;  %s3421_s13 = inlined_call_operand.vmem [shape: f32[1,32], index: 13, kind: input, shape index: {}]   ;;  %s3422_s14 = inlined_call_operand.vmem [shape: bf16[32,32], index: 14, kind: input, shape index: {}]   ;;  %s3423_s15 = inlined_call_operand.vmem [shape: f32[1,32], index: 15, kind: input, shape index: {}]   ;;  %s3424_s16 = inlined_call_operand.vmem [shape: bf16[32,64], index: 16, kind: input, shape index: {}]   ;;  %s3425_s17 = inlined_call_operand.vmem [shape: f32[1,64], index: 17, kind: input, shape index: {}]   ;;  %s3426_s18 = inlined_call_operand.vmem [shape: bf16[32,32], index: 18, kind: input, shape index: {}]   ;;  %s3427_s19 = inlined_call_operand.vmem [shape: f32[1,32], index: 19, kind: input, shape index: {}]   ;;  %s3428_s20 = inlined_call_operand.vmem [shape: f32[1,32], index: 20, kind: input, shape index: {}]   ;;  %s3429_s21 = inlined_call_operand.vmem [shape: f32[1,32], index: 21, kind: input, shape index: {}]   ;;  %s3430_s22 = inlined_call_operand.vmem [shape: bf16[32,64], index: 22, kind: input, shape index: {}]   ;;  %s3431_s23 = inlined_call_operand.vmem [shape: f32[1,64], index: 23, kind: input, shape index: {}]   ;;  %s3432_s24 = inlined_call_operand.vmem [shape: bf16[64,32], index: 24, kind: input, shape index: {}]   ;;  %s3433_s25 = inlined_call_operand.vmem [shape: f32[1,32], index: 25, kind: input, shape index: {}]   ;;  %s3434_s26 = inlined_call_operand.vmem [shape: f32[2,8,32], index: 26, kind: output, shape index: {}]   ;;  %s3435_s1 = inlined_call_operand.vmem [shape: s32[2], index: 1, kind: input, shape index: {}]  }
   0x1   :  { %3447 = sst [smem:[#allocation6_spill]] %s3409_s0 }
   0x2   :  { %3448 = sst [smem:[#allocation7_spill]] %s3410_s2 }
   0x3   :  { %3449 = sst [smem:[#allocation8_spill]] %s3411_s3 }
   0x4   :  { %3450 = sst [smem:[#allocation9_spill]] %s3412_s4 }
   0x5   :  { %3451 = sst [smem:[#allocation10_spill]] %s3413_s5  ;;  %s35_s5 = sshll.u32 %s3435_s1, 4  ;;  %s36_s5 = int_to_ptr.vmem [resolvable:$true] %s35_s5 }
   0x6   :  { %3452 = sst [smem:[#allocation11_spill]] %s3414_s6 }
   0x7   :  { %3453 = sst [smem:[#allocation12_spill]] %s3415_s7 }
   0x8   :  { %3454 = sst [smem:[#allocation13_spill]] %s3416_s8  ;;  %s3459_s8 = sld [smem:[#allocation6_spill]] }
   0x9   :  { %3455 = sst [smem:[#allocation14_spill]] %s3417_s9 }
   0xa   :  { %3456 = sst [smem:[#allocation15_spill]] %s3418_s10 }
   0xb   :  { %3457 = sst [smem:[#allocation16_spill]] %s3419_s11 }
   0xc   :  { %3458 = sst [smem:[#allocation17_spill]] %s3429_s21 }
   0xe   :  { %s31_s21 = sshll.u32 %s3459_s8, 4  ;;  %s32_s21 = int_to_ptr.vmem [resolvable:$true] %s31_s21 }
   0xf   :  { %s2846_s29 = scalar_lea.vmem %s32_s21, 16  ;;  %p2851_p1 = scmp.lt.s32.totalorder %s32_s21, %s32_s21 }
  0x10   :  { %p2847_p0 = scmp.ne.s32.totalorder %s32_s21, %s2846_s29  ;;  %p2852_p2 = scmp.lt.s32.totalorder %s2846_s29, %s2846_s29 }
  0x12   :  { %p2853_p3 = por %p2852_p2, %p2851_p1 }
  0x14   :  { %p2854_p4 = pnand %p2853_p3, %p2847_p0 }
  0x16   :  { %2857 = shalt.err (!%p2854_p4)  }
  0x17   :  { %s2880_s0 = smov [#allocation3]   ;;  %s2858_s10 = scalar_lea.vmem %s36_s5, 16 }
  0x18   :  { %34 = dma.vmem_to_smem %s32_s21, 16, %s2880_s0, [#allocation2] }
  0x19   :  { %p2859_p5 = scmp.ne.s32.totalorder %s36_s5, %s2858_s10  ;;  %p2863_p6 = scmp.lt.s32.totalorder %s36_s5, %s36_s5 }
  0x1a   :  { %p2864_p7 = scmp.lt.s32.totalorder %s2858_s10, %s2858_s10 }
  0x1c   :  { %p2865_p8 = por %p2864_p7, %p2863_p6 }
  0x1e   :  { %p2866_p9 = pnand %p2865_p8, %p2859_p5 }
  0x20   :  { %2869 = shalt.err (!%p2866_p9)  }
  0x21   :  { %s2881_s30 = smov [#allocation4]  }
  0x22   :  { %38 = dma.vmem_to_smem %s36_s5, 16, %s2881_s30, [#allocation2] }
  0x23   :  { %2874 = dma.done.wait [#allocation2], 32 }
  0x24   :  { %2875 = vsyncadd [#allocation2], 4294967264 }
  0x25   :  { %40 = sfence }
  0x26   :  { %s3032_s1 = smov 0  }
  0x27 LB: > { %s3038_s21 = sadd.s32 4294967295, %s2878_s1   ;;  %p2470_p10 = scmp.ge.s32.totalorder %s2878_s1, 1  ;;  %s2878_s1 = sphi %s3032_s1, %s46_s1  }
  0x28   : > { %p683_p11 = scmp.lt.s32.totalorder %s2878_s1, 3 }
  0x2a   : > { %p684_p12 = pnand %p2470_p10, %p683_p11 }
  0x2b   : > { %p752_p13 = scmp.lt.s32.totalorder (!%p684_p12), %s3038_s21, 1  ;;  %vm771_vm0 = vcmask (!%p684_p12), 261120   ;;  %s3460_s2 = sld [smem:[#allocation7_spill]] (!%p684_p12)  ;;  %v2882_v9 = vmov (!%p684_p12), 0.0   ;;  %vm2883_vm1 = vmmov (!%p684_p12), 0   ;;  %vm964_vm2 = vcmask (!%p684_p12), 64512  }
  0x2c   : > { %687 = sbr.rel (%p684_p12) target bundleno = 4277 (0x10b5), region = 116  ;;  %s3461_s28 = sld [smem:[#allocation11_spill]] (!%p684_p12)  ;;  %2592 = vmatprep.subr.bf16.mxu0 (!%p684_p12), %v2882_v9  ;;  %2600 = vmatprep.subr.bf16.mxu1 (!%p684_p12), %v2882_v9  ;;  %v1153_v52 = vlaneseq (!%p684_p12)  ;;  %vm1219_vm6 = vcmask (!%p684_p12), 1043456   ;;  %vm1423_vm7 = vcmask (!%p684_p12), 130048   ;;  %vm1425_vm8 = vcmask (!%p684_p12), 195584  }
  0x2d   : > { %s3462_s29 = sld [smem:[#allocation13_spill]] (!%p684_p12)  ;;  %2596 = vmatprep.mubr.msk.bf16.mxu0 (!%p684_p12), %vm2883_vm1, %v2882_v9  ;;  %2604 = vmatprep.mubr.msk.bf16.mxu1 (!%p684_p12), %vm2883_vm1, %v2882_v9  ;;  %s3464_s9 = sld [smem:[#allocation10_spill]] (!%p684_p12)  ;;  %vm1893_vm10 = vcmask (!%p684_p12), 80896   ;;  %vm1948_vm11 = vcmask (!%p684_p12), 1044480   ;;  %vm2355_vm12 = vcmask (!%p684_p12), 523264  }
  0x2e   : > { %s3465_s10 = sld [smem:[#allocation12_spill]] (!%p684_p12)  ;;  %s3466_s7 = sld [smem:[#allocation14_spill]] (!%p684_p12)  ;;  %v3137_v53 = vand.u32 (!%p684_p12), 127, %v1153_v52  ;;  %v1158_v54 = vshrl.u32 (!%p684_p12), %v1153_v52, 7 }
  0x2f   : > { %s3445_s4 = smov (!%p684_p12), 104   ;;  %s800_s8 = sld [smem:[#allocation3 + %s3038_s21]] (!%p684_p12) }
  0x30   : > { %vm1159_vm4 = vcmp.le.s32.totalorder (!%p684_p12), %v3137_v53, %v1158_v54  ;;  %s3440_s5 = smov (!%p684_p12), 24   ;;  %s3470_s11 = sld [smem:[#allocation16_spill]] (!%p684_p12) }
  0x32   : > { %v2790_v7 = vld [vmem:[%s3461_s28] sm:$0xff] (!%p684_p12)   ;;  %v2792_v10 = vld [vmem:[%s3461_s28 + $0x8] sm:$0xff] (!%p684_p12)  }
  0x33   : > { %s3044_s3 = scalar_select %p752_p13, %s3038_s21, 1  ;;  %v2791_v8 = vld [vmem:[%s3462_s29] sm:$0xff]   ;;  %2593 = vmatpush3.bf16.msra.mxu0 %v2790_v7  ;;  %v2793_v11 = vld [vmem:[%s3462_s29 + $0x8] sm:$0xff]  }
  0x34   : > { %2601 = vmatpush3.bf16.msra.mxu1 %v2791_v8  ;;  %2594 = vmatprep.subr.bf16.mxu0 %v2882_v9  ;;  %v2476_v18 = vld [vmem:[%s3464_s9] ss:$0 sm:$0xff]  ;;  %s3443_s9 = smov 96  }
  0x35   : > { %s3439_s6 = sshll.u32 %s3044_s3, 3  ;;  %2602 = vmatprep.subr.bf16.mxu1 %v2882_v9  ;;  %v2477_v22 = vld [vmem:[%s3465_s10] ss:$0 sm:$0xff]  ;;  %v1155_v55 = vstv %s800_s8  ;;  %s3469_s10 = sld [smem:[#allocation15_spill]] }
  0x36   : > { %s755_s27 = scalar_lea.vmem %s3460_s2, %s3439_s6  ;;  %v2481_v23 = vld [vmem:[%s3466_s7] ss:$0 sm:$0xff]  ;;  %s2884_s2 = smov 120   ;;  %vm1156_vm3 = vcmp.lt.s32.totalorder %v3137_v53, %v1155_v55 }
  0x37   : > { %v3052_v0 = vld [vmem:[%s755_s27] sm:$0xff]  ;;  %2595 = vmatpush3.bf16.msra.mxu0 %v2792_v10  ;;  %s3463_s27 = sld [smem:[#allocation9_spill]]  ;;  %vm3141_vm5 = vmand %vm1156_vm3, %vm1159_vm4  ;;  %s3442_s7 = smov 8  }
  0x38   : > { %v772_v1 = vsel %vm771_vm0, %v3052_v0, 0.0  ;;  %2603 = vmatpush3.bf16.msra.mxu1 %v2793_v11  ;;  %2608 = vmatprep.subr.bf16.mxu0 %v2882_v9  ;;  %s3441_s8 = smov 16   ;;  %s2533_s0 = sshll.u32 %s3044_s3, 4 }
  0x39   : > { %773 = vadd.xlane.f32.xlu0 %v772_v1  ;;  %2614 = vmatprep.subr.bf16.mxu1 %v2882_v9  ;;  %s3478_s6 = smov 24  }
  0x3d   : > { %v2475_v16 = vld [vmem:[%s3463_s27] ss:$0 sm:$0xff]  ;;  %s2885_s27 = smov 112  }
  0xc6   : > { %v774_v2 = vpop.xlane.xlu0 %773 }
  0xc7   : > { %v776_v3 = vmul.f32 0.03125, %v774_v2 }
  0xc9   : > { %v777_v4 = vsub.f32 %v3052_v0, %v776_v3 }
  0xcb   : > { %v778_v5 = vmul.f32 %v777_v4, %v777_v4 }
  0xcd   : > { %v779_v6 = vsel %vm771_vm0, %v778_v5, 0.0 }
  0xce   : > { %780 = vadd.xlane.f32.xlu0 %v779_v6 }
 0x15b   : > { %v781_v12 = vpop.xlane.xlu0 %780 }
 0x15c   : > { %v782_v13 = vmul.f32 0.03125, %v781_v12 }
 0x15e   : > { %v783_v14 = vadd.f32 1e-05, %v782_v13 }
 0x160   : > { %2808 = vrsqrt.f32 %v783_v14 }
 0x16a   : > { %v2809_v15 = vpop.eup %2808 }
 0x16b   : > { %v785_v17 = vmul.f32 %v2809_v15, %v777_v4 }
 0x16d   : > { %v792_v19 = vmul.f32 %v2475_v16, %v785_v17 }
 0x16f   : > { %v799_v20 = vadd.f32 %v2476_v18, %v792_v19 }
 0x171   : > { %v816_v21 = vpack.c.bf16 %v799_v20, %v799_v20 }
 0x173   : > { %2597 = vmatmul.mubr.msk.bf16.vlgmr.msra.gmra.mrb[0].mxu0 %vm771_vm0, %v816_v21  ;;  %2605 = vmatmul.mubr.msk.bf16.vlgmr.msra.gmra.mrb[0].mxu1 %vm771_vm0, %v816_v21 }
 0x174   : > { %2610 = vmatprep.mubr.msk.bf16.mxu0 %vm2883_vm1, %v2882_v9  ;;  %2616 = vmatprep.mubr.msk.bf16.mxu1 %vm2883_vm1, %v2882_v9 }
 0x246   : > { %v872_v24 = vpop.f32.mrb[0].mxu0  ;;  %v930_v25 = vpop.f32.mrb[0].mxu1 }
 0x247   : > { %v873_v26 = vadd.f32 %v2477_v22, %v872_v24  ;;  %v931_v27 = vadd.f32 %v2481_v23, %v930_v25  ;;  %v2598_v28 = vpop.f32.mrb[1].mxu0  ;;  %v2606_v29 = vpop.f32.mrb[1].mxu1 }
 0x248   : > { %v875_v30 = vpop.f32.mrb[2].mxu0  ;;  %v933_v31 = vpop.f32.mrb[2].mxu1 }
 0x249   : > { %947 = vrot.lane.b32.xlu1 %v931_v27, %s2884_s2  ;;  %v2607_v32 = vpop.f32.mrb[3].mxu1  ;;  %937 = vrot.lane.b32.xlu0 %v873_v26, %s2884_s2  ;;  %v2599_v33 = vpop.f32.mrb[3].mxu0  ;;  %v3100_v34 = vpack.c.bf16 %v931_v27, %v931_v27  ;;  %v956_v36 = vpack.c.bf16 %v873_v26, %v873_v26 }
 0x24b   : > { %v969_v35 = vsel %vm964_vm2, %v3100_v34, 0 }
 0x24c   : > { %2609 = vmatpush3.bf16.xpose.msra.mxu0 %v969_v35 }
 0x24d   : > { %950 = vrot.lane.b32.xlu1 %v931_v27, %s2885_s27  ;;  %2620 = vmatprep.subr.bf16.mxu0 %v2882_v9 }
 0x251   : > { %953 = vrot.lane.b32.xlu1 %v931_v27, %s3445_s4 }
 0x253   : > { %2611 = vmatmul.mubr.msk.bf16.vlgmr.msra.gmra.mrb[4].mxu0 %vm964_vm2, %v956_v36 }
 0x254   : > { %2622 = vmatprep.mubr.msk.bf16.mxu0 %vm2883_vm1, %v2882_v9 }
 0x255   : > { %940 = vrot.lane.b32.xlu1 %v873_v26, %s2885_s27 }
 0x259   : > { %943 = vrot.lane.b32.xlu1 %v873_v26, %s3445_s4 }
 0x2bb   : > { %v948_v37 = vpop.permute.xlu1 %947  ;;  %v938_v42 = vpop.permute.xlu0 %937 }
 0x2bc   : > { %v3112_v38 = vpack.c.bf16 %v948_v37, %v948_v37  ;;  %v957_v45 = vpack.c.bf16 %v938_v42, %v938_v42 }
 0x2be   : > { %v1015_v39 = vsel %vm964_vm2, %v3112_v38, 0 }
 0x2bf   : > { %2615 = vmatpush3.bf16.xpose.msra.mxu1 %v1015_v39  ;;  %v951_v40 = vpop.permute.xlu1 %950 }
 0x2c0   : > { %v3116_v41 = vpack.c.bf16 %v951_v40, %v951_v40  ;;  %2626 = vmatprep.subr.bf16.mxu1 %v2882_v9 }
 0x2c2   : > { %v1061_v43 = vsel %vm964_vm2, %v3116_v41, 0 }
 0x2c3   : > { %v954_v44 = vpop.permute.xlu1 %953  ;;  %2621 = vmatpush3.bf16.xpose.msra.mxu0 %v1061_v43 }
 0x2c4   : > { %v3121_v46 = vpack.c.bf16 %v954_v44, %v954_v44  ;;  %2632 = vmatprep.subr.bf16.mxu0 %v2882_v9 }
 0x2c6   : > { %v1107_v47 = vsel %vm964_vm2, %v3121_v46, 0  ;;  %2617 = vmatmul.mubr.msk.bf16.vlgmr.msra.gmra.mrb[4].mxu1 %vm964_vm2, %v957_v45 }
 0x2c7   : > { %v941_v48 = vpop.permute.xlu1 %940  ;;  %2627 = vmatpush3.bf16.xpose.msra.mxu1 %v1107_v47  ;;  %2628 = vmatprep.mubr.msk.bf16.mxu1 %vm2883_vm1, %v2882_v9 }
 0x2c8   : > { %v958_v49 = vpack.c.bf16 %v941_v48, %v941_v48  ;;  %2638 = vmatprep.subr.bf16.mxu1 %v2882_v9 }
 0x2ca   : > { %2623 = vmatmul.mubr.msk.bf16.vlgmr.msra.gmra.mrb[8].mxu0 %vm964_vm2, %v958_v49 }
 0x2cb   : > { %v944_v50 = vpop.permute.xlu1 %943  ;;  %2634 = vmatprep.mubr.msk.bf16.mxu0 %vm2883_vm1, %v2882_v9 }
 0x2cc   : > { %v959_v51 = vpack.c.bf16 %v944_v50, %v944_v50 }
 0x2ce   : > { %2629 = vmatmul.mubr.msk.bf16.vlgmr.msra.gmra.mrb[8].mxu1 %vm964_vm2, %v959_v51 }
 0x2cf   : > { %2640 = vmatprep.mubr.msk.bf16.mxu1 %vm2883_vm1, %v2882_v9 }
 0x326   : > { %v1005_v56 = vpop.f32.mrb[4].mxu0 }
 0x327   : > { %v1149_v58 = vmul.f32 0.35355338, %v1005_v56  ;;  %v2612_v59 = vpop.f32.mrb[5].mxu0 }
 0x328   : > { %v1008_v60 = vpop.f32.mrb[6].mxu0 }
 0x329   : > { %v2613_v61 = vpop.f32.mrb[7].mxu0  ;;  %v1161_v62 = vsel %vm3141_vm5, %v1149_v58, -1e+30 }
 0x32a   : > { %v1165_v63 = vsel %vm964_vm2, %v1161_v62, -inf }
 0x32b   : > { %1166 = vmax.xlane.f32.xlu1 %v1165_v63 }
 0x399   : > { %v1051_v1 = vpop.f32.mrb[4].mxu1 }
 0x39a   : > { %v1150_v2 = vmul.f32 0.35355338, %v1051_v1  ;;  %v2618_v3 = vpop.f32.mrb[5].mxu1 }
 0x39b   : > { %v1054_v4 = vpop.f32.mrb[6].mxu1 }
 0x39c   : > { %v2619_v5 = vpop.f32.mrb[7].mxu1  ;;  %v1162_v6 = vsel %vm3141_vm5, %v1150_v2, -1e+30 }
 0x39d   : > { %v1097_v7 = vpop.f32.mrb[8].mxu0  ;;  %v1168_v8 = vsel %vm964_vm2, %v1162_v6, -inf }
 0x39e   : > { %v1151_v10 = vmul.f32 0.35355338, %v1097_v7  ;;  %1169 = vmax.xlane.f32.xlu0 %v1168_v8  ;;  %v2624_v11 = vpop.f32.mrb[9].mxu0 }
 0x39f   : > { %v1100_v12 = vpop.f32.mrb[10].mxu0  ;;  %v2795_v11 = vld [vmem:[%s3469_s10 + $0x8] sm:$0xff]  }
 0x3a0   : > { %v2625_v13 = vpop.f32.mrb[11].mxu0  ;;  %v1163_v14 = vsel %vm3141_vm5, %v1151_v10, -1e+30  ;;  %v2794_v10 = vld [vmem:[%s3469_s10] sm:$0xff]  }
 0x3a1   : > { %v1143_v15 = vpop.f32.mrb[8].mxu1  ;;  %v1171_v16 = vsel %vm964_vm2, %v1163_v14, -inf }
 0x3a2   : > { %v1152_v17 = vmul.f32 0.35355338, %v1143_v15  ;;  %v2630_v18 = vpop.f32.mrb[9].mxu1  ;;  %1172 = vmax.xlane.f32.xlu1 %v1171_v16 }
 0x3a3   : > { %v1146_v19 = vpop.f32.mrb[10].mxu1 }
 0x3a4   : > { %v2631_v20 = vpop.f32.mrb[11].mxu1  ;;  %v1164_v21 = vsel %vm3141_vm5, %v1152_v17, -1e+30 }
 0x3a5   : > { %v1174_v22 = vsel %vm964_vm2, %v1164_v21, -inf }
 0x3a6   : > { %1175 = vmax.xlane.f32.xlu1 %v1174_v22 }
 0x3b4   : > { %1214 = vrot.lane.b32.xlu0 %v3100_v34, %s3443_s9 }
 0x3b7   : > { %1264 = vrot.lane.b32.xlu1 %v3112_v38, %s3443_s9 }
 0x3b8   : > { %v1167_v23 = vpop.xlane.xlu1 %1166 }
 0x3b9   : > { %v1177_v24 = vsub.f32 %v1161_v62, %v1167_v23 }
 0x3bb   : > { %v1181_v25 = vmul.f32 1.442695, %v1177_v24 }
 0x3bd   : > { %2810 = vpow2.f32 %v1181_v25 }
 0x3c7   : > { %v2811_v26 = vpop.eup %2810 }
 0x3c8   : > { %v1189_v27 = vsel %vm964_vm2, %v2811_v26, 0.0 }
 0x3d3   : > { %1190 = vadd.xlane.f32.xlu0 %v1189_v27 }
 0x42b   : > { %v1170_v28 = vpop.xlane.xlu0 %1169 }
 0x42c   : > { %v1178_v29 = vsub.f32 %v1162_v6, %v1170_v28 }
 0x42e   : > { %v1183_v30 = vmul.f32 1.442695, %v1178_v29 }
 0x42f   : > { %v1215_v31 = vpop.permute.xlu0 %1214  ;;  %v1173_v32 = vpop.xlane.xlu1 %1172 }
 0x430   : > { %2812 = vpow2.f32 %v1183_v30  ;;  %v1221_v33 = vsel %vm1219_vm6, %v1215_v31, 0  ;;  %v1179_v34 = vsub.f32 %v1163_v14, %v1173_v32  ;;  %v2496_v31 = vld [vmem:[%s3470_s11] ss:$0 sm:$0xff]  ;;  %s3477_s11 = smov 16  }
 0x431   : > { %2633 = vmatpush3.bf16.msra.mxu0 %v1221_v33 }
 0x432   : > { %v1185_v35 = vmul.f32 1.442695, %v1179_v34  ;;  %2644 = vmatprep.subr.bf16.mxu0 %v2882_v9 }
 0x433   : > { %v1176_v36 = vpop.xlane.xlu1 %1175 }
 0x434   : > { %2814 = vpow2.f32 %v1185_v35  ;;  %v1180_v37 = vsub.f32 %v1164_v21, %v1176_v36 }
 0x436   : > { %v1187_v38 = vmul.f32 1.442695, %v1180_v37 }
 0x437   : > { %v1265_v39 = vpop.permute.xlu1 %1264 }
 0x438   : > { %2816 = vpow2.f32 %v1187_v38  ;;  %v1270_v40 = vsel %vm1219_vm6, %v1265_v39, 0  ;;  %v2796_v39 = vld [vmem:[%s3424_s16] sm:$0xff]  }
 0x439   : > { %2639 = vmatpush3.bf16.msra.mxu1 %v1270_v40 }
 0x43a   : > { %v2813_v42 = vpop.eup %2812  ;;  %2650 = vmatprep.subr.bf16.mxu1 %v2882_v9 }
 0x43b   : > { %v1192_v43 = vsel %vm964_vm2, %v2813_v42, 0.0 }
 0x43c   : > { %1193 = vadd.xlane.f32.xlu1 %v1192_v43 }
 0x43e   : > { %v2815_v44 = vpop.eup %2814 }
 0x43f   : > { %v1195_v45 = vsel %vm964_vm2, %v2815_v44, 0.0 }
 0x440   : > { %1196 = vadd.xlane.f32.xlu0 %v1195_v45 }
 0x442   : > { %v2817_v47 = vpop.eup %2816 }
 0x443   : > { %v1198_v48 = vsel %vm964_vm2, %v2817_v47, 0.0 }
 0x444   : > { %1199 = vadd.xlane.f32.xlu1 %v1198_v48  ;;  %v2797_v48 = vld [vmem:[%s3424_s16 + $0x8] sm:$0xff]  }
 0x455   : > { %1313 = vrot.lane.b32.xlu1 %v3116_v41, %s3443_s9 }
 0x456   : > { %1362 = vrot.lane.b32.xlu0 %v3121_v46, %s3443_s9  ;;  %s3476_s9 = smov 8  }
 0x460   : > { %v1191_v49 = vpop.xlane.xlu0 %1190 }
 0x461   : > { %2818 = vrcp.f32 %v1191_v49 }
 0x46b   : > { %v2819_v50 = vpop.eup %2818 }
 0x46c   : > { %v1205_v51 = vmul.f32 %v2819_v50, %v2811_v26  ;;  %v2798_v50 = vld [vmem:[%s3422_s14] sm:$0xff]  }
 0x46e   : > { %v1209_v52 = vpack.c.bf16 %v1205_v51, %v1205_v51  ;;  %v2799_v51 = vld [vmem:[%s3422_s14 + $0x8] sm:$0xff]  }
 0x470   : > { %2635 = vmatmul.mubr.msk.bf16.vlgmr.msra.gmra.mrb[12].mxu0 %vm964_vm2, %v1209_v52 }
 0x471   : > { %2646 = vmatprep.mubr.msk.bf16.mxu0 %vm2883_vm1, %v2882_v9 }
 0x4c9   : > { %v1194_v54 = vpop.xlane.xlu1 %1193 }
 0x4ca   : > { %2820 = vrcp.f32 %v1194_v54 }
 0x4cd   : > { %v1197_v55 = vpop.xlane.xlu0 %1196 }
 0x4ce   : > { %2822 = vrcp.f32 %v1197_v55 }
 0x4d1   : > { %v1200_v56 = vpop.xlane.xlu1 %1199  ;;  %v1363_v46 = vpop.permute.xlu0 %1362 }
 0x4d2   : > { %2824 = vrcp.f32 %v1200_v56  ;;  %v1368_v63 = vsel %vm1219_vm6, %v1363_v46, 0 }
 0x4d4   : > { %v2821_v41 = vpop.eup %2820 }
 0x4d5   : > { %v1206_v57 = vmul.f32 %v2821_v41, %v2813_v42  ;;  %v1314_v58 = vpop.permute.xlu1 %1313  ;;  %v2497_v41 = vld [vmem:[%s3420_s12] ss:$0 sm:$0xff] }
 0x4d6   : > { %v1319_v59 = vsel %vm1219_vm6, %v1314_v58, 0  ;;  %v2498_v58 = vld [vmem:[%s3421_s13] ss:$0 sm:$0xff] }
 0x4d7   : > { %2645 = vmatpush3.bf16.msra.mxu0 %v1319_v59  ;;  %v1210_v60 = vpack.c.bf16 %v1206_v57, %v1206_v57 }
 0x4d8   : > { %v2823_v61 = vpop.eup %2822  ;;  %2656 = vmatprep.subr.bf16.mxu0 %v2882_v9 }
 0x4d9   : > { %v1207_v62 = vmul.f32 %v2823_v61, %v2815_v44  ;;  %2641 = vmatmul.mubr.msk.bf16.vlgmr.msra.gmra.mrb[12].mxu1 %vm964_vm2, %v1210_v60  ;;  %v2503_v61 = vld [vmem:[%s3425_s17] ss:$0 sm:$0xff] }
 0x4da   : > { %2651 = vmatpush3.bf16.msra.mxu1 %v1368_v63  ;;  %2652 = vmatprep.mubr.msk.bf16.mxu1 %vm2883_vm1, %v2882_v9 }
 0x4db   : > { %v1211_v1 = vpack.c.bf16 %v1207_v62, %v1207_v62  ;;  %2664 = vmatprep.subr.bf16.mxu1 %v2882_v9 }
 0x4dc   : > { %v2825_v2 = vpop.eup %2824 }
 0x4dd   : > { %v1208_v3 = vmul.f32 %v2825_v2, %v2817_v47  ;;  %2647 = vmatmul.mubr.msk.bf16.vlgmr.msra.gmra.mrb[16].mxu0 %vm964_vm2, %v1211_v1 }
 0x4de   : > { %2660 = vmatprep.mubr.msk.bf16.mxu0 %vm2883_vm1, %v2882_v9  ;;  %2657 = vmatpush3.bf16.msra.mxu0 %v2794_v10 }
 0x4df   : > { %v1212_v4 = vpack.c.bf16 %v1208_v3, %v1208_v3  ;;  %2658 = vmatprep.subr.bf16.mxu0 %v2882_v9 }
 0x4e1   : > { %2653 = vmatmul.mubr.msk.bf16.vlgmr.msra.gmra.mrb[16].mxu1 %vm964_vm2, %v1212_v4 }
 0x4e2   : > { %2668 = vmatprep.mubr.msk.bf16.mxu1 %vm2883_vm1, %v2882_v9  ;;  %2659 = vmatpush3.bf16.msra.mxu0 %v2795_v11 }
 0x4e3   : > { %2672 = vmatprep.subr.bf16.mxu0 %v2882_v9  ;;  %2665 = vmatpush3.bf16.msra.mxu1 %v2798_v50 }
 0x4e4   : > { %2666 = vmatprep.subr.bf16.mxu1 %v2882_v9 }
 0x4e7   : > { %2667 = vmatpush3.bf16.msra.mxu1 %v2799_v51 }
 0x4e8   : > { %2680 = vmatprep.subr.bf16.mxu1 %v2882_v9 }
 0x543   : > { %v1257_v5 = vpop.f32.mrb[12].mxu0 }
 0x544   : > { %v2636_v6 = vpop.f32.mrb[13].mxu0 }
 0x545   : > { %v1260_v7 = vpop.f32.mrb[14].mxu0 }
 0x546   : > { %v2637_v8 = vpop.f32.mrb[15].mxu0 }
 0x5ac   : > { %v1306_v12 = vpop.f32.mrb[12].mxu1 }
 0x5ad   : > { %1411 = vrot.lane.b32.xlu1 %v1306_v12, %s3442_s7  ;;  %v2642_v13 = vpop.f32.mrb[13].mxu1 }
 0x5ae   : > { %v1309_v14 = vpop.f32.mrb[14].mxu1 }
 0x5af   : > { %v2643_v15 = vpop.f32.mrb[15].mxu1 }
 0x5b0   : > { %v1355_v16 = vpop.f32.mrb[16].mxu0 }
 0x5b1   : > { %1415 = vrot.lane.b32.xlu0 %v1355_v16, %s3441_s8  ;;  %v2648_v17 = vpop.f32.mrb[17].mxu0  ;;  %s3471_s8 = sld [smem:[#allocation8_spill]] }
 0x5b2   : > { %v1358_v18 = vpop.f32.mrb[18].mxu0  ;;  %v2499_v17 = vld [vmem:[%s3423_s15] ss:$0 sm:$0xff] }
 0x5b3   : > { %v2649_v19 = vpop.f32.mrb[19].mxu0 }
 0x5b4   : > { %v1404_v20 = vpop.f32.mrb[16].mxu1 }
 0x5b5   : > { %1419 = vrot.lane.b32.xlu1 %v1404_v20, %s3440_s5  ;;  %v2654_v21 = vpop.f32.mrb[17].mxu1  ;;  %s3472_s5 = smov 104  }
 0x5b6   : > { %v1407_v22 = vpop.f32.mrb[18].mxu1 }
 0x5b7   : > { %v2655_v23 = vpop.f32.mrb[19].mxu1  ;;  %s760_s7 = scalar_lea.vmem %s3471_s8, %s2533_s0 }
 0x5b8   : > { %v767_v45 = vld [vmem:[%s760_s7] sm:$0xff]  ;;  %v768_v47 = vld [vmem:[%s760_s7 + $0x8] sm:$0x3]  ;;  %s3479_s7 = sld [smem:[#allocation17_spill]] }
 0x5b9   : > { %v1598_v49 = vpack.c.bf16 %v768_v47, %v767_v45 }
 0x61f   : > { %v1412_v24 = vpop.permute.xlu1 %1411 }
 0x620   : > { %v1422_v26 = vsel %vm964_vm2, %v1257_v5, %v1412_v24 }
 0x623   : > { %v1416_v25 = vpop.permute.xlu0 %1415 }
 0x624   : > { %v1424_v27 = vsel %vm1423_vm7, %v1422_v26, %v1416_v25 }
 0x627   : > { %v1420_v28 = vpop.permute.xlu1 %1419 }
 0x628   : > { %v1426_v29 = vsel %vm1425_vm8, %v1424_v27, %v1420_v28 }
 0x629   : > { %v1427_v30 = vpack.c.bf16 %v1426_v29, %v1426_v29 }
 0x62b   : > { %2661 = vmatmul.mubr.msk.bf16.vlgmr.msra.gmra.mrb[20].mxu0 %vm771_vm0, %v1427_v30 }
 0x62c   : > { %2676 = vmatprep.mubr.msk.bf16.mxu0 %vm2883_vm1, %v2882_v9  ;;  %2673 = vmatpush3.bf16.msra.mxu0 %v2796_v39 }
 0x62d   : > { %2674 = vmatprep.subr.bf16.mxu0 %v2882_v9 }
 0x630   : > { %2675 = vmatpush3.bf16.msra.mxu0 %v2797_v48 }
 0x631   : > { %2686 = vmatprep.subr.bf16.mxu0 %v2882_v9 }
 0x633   : > { %2677 = vmatmul.mubr.msk.bf16.vlgmr.msra.gmra.mrb[24].mxu0 %vm771_vm0, %v1598_v49 }
 0x634   : > { %2688 = vmatprep.mubr.msk.bf16.mxu0 %vm2883_vm1, %v2882_v9 }
 0x6fe   : > { %v1477_v32 = vpop.f32.mrb[20].mxu0 }
 0x6ff   : > { %v1483_v33 = vadd.f32 %v1477_v32, %v3052_v0  ;;  %v2662_v34 = vpop.f32.mrb[21].mxu0 }
 0x700   : > { %v1480_v35 = vpop.f32.mrb[22].mxu0 }
 0x701   : > { %v3210_v36 = vadd.f32 %v2496_v31, %v1483_v33  ;;  %v2663_v37 = vpop.f32.mrb[23].mxu0 }
 0x703   : > { %v1493_v38 = vsel %vm771_vm0, %v3210_v36, 0.0 }
 0x704   : > { %1494 = vadd.xlane.f32.xlu0 %v1493_v38 }
 0x706   : > { %v1654_v62 = vpop.f32.mrb[24].mxu0 }
 0x707   : > { %v1655_v63 = vadd.f32 %v2503_v61, %v1654_v62  ;;  %v2678_v1 = vpop.f32.mrb[25].mxu0 }
 0x708   : > { %v1657_v2 = vpop.f32.mrb[26].mxu0 }
 0x709   : > { %v1658_v3 = vadd.f32 %v2503_v61, %v1657_v2  ;;  %v2679_v4 = vpop.f32.mrb[27].mxu0 }
 0x70b   : > { %v2780_v5 = vpack.i.bf16 %v1658_v3, %v1655_v63  ;;  %v3251_v6 = vpack.c.bf16 %v1658_v3, %v1655_v63 }
 0x70d   : > { %v1703_v7 = vsel %vm964_vm2, %v3251_v6, 0 }
 0x71a   : > { %2776 = vrot.lane.b32.xlu0 %v2780_v5, %s2884_s2 }
 0x791   : > { %v1495_v40 = vpop.xlane.xlu0 %1494 }
 0x792   : > { %v1496_v42 = vmul.f32 0.03125, %v1495_v40 }
 0x794   : > { %v1497_v0 = vsub.f32 %v3210_v36, %v1496_v42 }
 0x795   : > { %v2777_v8 = vpop.permute.xlu0 %2776 }
 0x796   : > { %v1498_v43 = vmul.f32 %v1497_v0, %v1497_v0  ;;  %v2779_v10 = vunpack.i.h.bf16 %v2777_v8  ;;  %v2778_v11 = vunpack.i.l.bf16 %v2777_v8 }
 0x798   : > { %v1499_v44 = vsel %vm771_vm0, %v1498_v43, 0.0  ;;  %v3259_v12 = vpack.c.bf16 %v2779_v10, %v2778_v11 }
 0x799   : > { %1500 = vadd.xlane.f32.xlu1 %v1499_v44 }
 0x79a   : > { %v1749_v13 = vsel %vm964_vm2, %v3259_v12, 0 }
 0x79b   : > { %2687 = vmatpush3.bf16.xpose.msra.mxu0 %v1749_v13 }
 0x79c   : > { %2698 = vmatprep.subr.bf16.mxu0 %v2882_v9 }
 0x7aa   : > { %2781 = vrot.lane.b32.xlu1 %v2780_v5, %s2885_s27 }
 0x7ae   : > { %2786 = vrot.lane.b32.xlu1 %v2780_v5, %s3472_s5 }
 0x826   : > { %v1501_v52 = vpop.xlane.xlu1 %1500 }
 0x827   : > { %v1502_v54 = vmul.f32 0.03125, %v1501_v52 }
 0x829   : > { %v1503_v55 = vadd.f32 1e-05, %v1502_v54 }
 0x82a   : > { %v2782_v14 = vpop.permute.xlu1 %2781 }
 0x82b   : > { %2826 = vrsqrt.f32 %v1503_v55  ;;  %v2784_v15 = vunpack.i.h.bf16 %v2782_v14  ;;  %v2783_v16 = vunpack.i.l.bf16 %v2782_v14 }
 0x82d   : > { %v3267_v18 = vpack.c.bf16 %v2784_v15, %v2783_v16 }
 0x82e   : > { %v2787_v26 = vpop.permute.xlu1 %2786 }
 0x82f   : > { %v1795_v25 = vsel %vm964_vm2, %v3267_v18, 0  ;;  %v2789_v27 = vunpack.i.h.bf16 %v2787_v26  ;;  %v2788_v28 = vunpack.i.l.bf16 %v2787_v26 }
 0x831   : > { %v3278_v29 = vpack.c.bf16 %v2789_v27, %v2788_v28 }
 0x833   : > { %v1841_v32 = vsel %vm964_vm2, %v3278_v29, 0 }
 0x835   : > { %v2827_v56 = vpop.eup %2826 }
 0x836   : > { %v1505_v57 = vmul.f32 %v2827_v56, %v1497_v0 }
 0x838   : > { %v1512_v46 = vmul.f32 %v2497_v41, %v1505_v57 }
 0x83a   : > { %v1519_v59 = vadd.f32 %v2498_v58, %v1512_v46 }
 0x83c   : > { %v1536_v60 = vpack.c.bf16 %v1519_v59, %v1519_v59 }
 0x83e   : > { %2669 = vmatmul.mubr.msk.bf16.vlgmr.msra.gmra.mrb[20].mxu1 %vm771_vm0, %v1536_v60 }
 0x83f   : > { %2682 = vmatprep.mubr.msk.bf16.mxu1 %vm2883_vm1, %v2882_v9  ;;  %2681 = vmatpush3.bf16.xpose.msra.mxu1 %v1703_v7 }
 0x840   : > { %2692 = vmatprep.subr.bf16.mxu1 %v2882_v9 }
 0x911   : > { %v1592_v19 = vpop.f32.mrb[20].mxu1 }
 0x912   : > { %v1593_v20 = vadd.f32 %v2499_v17, %v1592_v19  ;;  %v2670_v21 = vpop.f32.mrb[21].mxu1 }
 0x913   : > { %v1595_v22 = vpop.f32.mrb[22].mxu1 }
 0x914   : > { %v1691_v23 = vpack.c.bf16 %v1593_v20, %v1593_v20  ;;  %v2671_v24 = vpop.f32.mrb[23].mxu1  ;;  %1668 = vrot.lane.b32.xlu1 %v1593_v20, %s3472_s5  ;;  %1662 = vrot.lane.b32.xlu0 %v1593_v20, %s2884_s2  ;;  %s1520_s2 = sld [smem:[#allocation4 + %s3038_s21]]  ;;  %s3475_s21 = smov 96  }
 0x916   : > { %2683 = vmatmul.mubr.msk.bf16.vlgmr.msra.gmra.mrb[24].mxu1 %vm964_vm2, %v1691_v23 }
 0x917   : > { %2693 = vmatpush3.bf16.xpose.msra.mxu1 %v1795_v25  ;;  %2694 = vmatprep.mubr.msk.bf16.mxu1 %vm2883_vm1, %v2882_v9 }
 0x918   : > { %1665 = vrot.lane.b32.xlu0 %v1593_v20, %s2885_s27  ;;  %2704 = vmatprep.subr.bf16.mxu1 %v2882_v9 }
 0x91a   : > { %v1887_v38 = vstv %s1520_s2 }
 0x91b   : > { %vm3294_vm9 = vcmp.lt.s32.totalorder %v3137_v53, %v1887_v38 }
 0x986   : > { %v1663_v30 = vpop.permute.xlu0 %1662  ;;  %v1669_v35 = vpop.permute.xlu1 %1668 }
 0x987   : > { %v1692_v31 = vpack.c.bf16 %v1663_v30, %v1663_v30  ;;  %v1694_v37 = vpack.c.bf16 %v1669_v35, %v1669_v35 }
 0x989   : > { %2689 = vmatmul.mubr.msk.bf16.vlgmr.msra.gmra.mrb[28].mxu0 %vm964_vm2, %v1692_v31 }
 0x98a   : > { %2699 = vmatpush3.bf16.xpose.msra.mxu0 %v1841_v32  ;;  %v1666_v33 = vpop.permute.xlu0 %1665  ;;  %2700 = vmatprep.mubr.msk.bf16.mxu0 %vm2883_vm1, %v2882_v9 }
 0x98b   : > { %v1693_v34 = vpack.c.bf16 %v1666_v33, %v1666_v33  ;;  %2710 = vmatprep.subr.bf16.mxu0 %v2882_v9 }
 0x98d   : > { %2695 = vmatmul.mubr.msk.bf16.vlgmr.msra.gmra.mrb[28].mxu1 %vm964_vm2, %v1693_v34 }
 0x98e   : > { %2706 = vmatprep.mubr.msk.bf16.mxu1 %vm2883_vm1, %v2882_v9 }
 0x991   : > { %2701 = vmatmul.mubr.msk.bf16.vlgmr.msra.gmra.mrb[32].mxu0 %vm964_vm2, %v1694_v37 }
 0x992   : > { %2712 = vmatprep.mubr.msk.bf16.mxu0 %vm2883_vm1, %v2882_v9 }
 0x9e9   : > { %v1739_v39 = vpop.f32.mrb[24].mxu1 }
 0x9ea   : > { %v1883_v42 = vmul.f32 0.35355338, %v1739_v39  ;;  %v2684_v0 = vpop.f32.mrb[25].mxu1 }
 0x9eb   : > { %v1742_v43 = vpop.f32.mrb[26].mxu1 }
 0x9ec   : > { %v2685_v44 = vpop.f32.mrb[27].mxu1  ;;  %v1889_v45 = vsel %vm3294_vm9, %v1883_v42, -1e+30 }
 0x9ed   : > { %v1894_v47 = vsel %vm1893_vm10, %v1889_v45, -inf }
 0x9ee   : > { %1895 = vmax.xlane.f32.xlu0 %v1894_v47 }
 0xa5c   : > { %v1785_v48 = vpop.f32.mrb[28].mxu0 }
 0xa5d   : > { %v1884_v49 = vmul.f32 0.35355338, %v1785_v48  ;;  %v2690_v50 = vpop.f32.mrb[29].mxu0 }
 0xa5e   : > { %v1788_v51 = vpop.f32.mrb[30].mxu0 }
 0xa5f   : > { %v2691_v52 = vpop.f32.mrb[31].mxu0  ;;  %v1890_v53 = vsel %vm3294_vm9, %v1884_v49, -1e+30 }
 0xa60   : > { %v1831_v54 = vpop.f32.mrb[28].mxu1  ;;  %v1897_v55 = vsel %vm1893_vm10, %v1890_v53, -inf }
 0xa61   : > { %v1885_v56 = vmul.f32 0.35355338, %v1831_v54  ;;  %v2696_v41 = vpop.f32.mrb[29].mxu1  ;;  %1898 = vmax.xlane.f32.xlu1 %v1897_v55  ;;  %v2800_v55 = vld [vmem:[%s3426_s18] sm:$0xff]  }
 0xa62   : > { %v1834_v57 = vpop.f32.mrb[30].mxu1 }
 0xa63   : > { %v2697_v58 = vpop.f32.mrb[31].mxu1  ;;  %v1891_v46 = vsel %vm3294_vm9, %v1885_v56, -1e+30  ;;  %v2801_v56 = vld [vmem:[%s3426_s18 + $0x8] sm:$0xff]  }
 0xa64   : > { %v1877_v59 = vpop.f32.mrb[32].mxu0  ;;  %v1900_v60 = vsel %vm1893_vm10, %v1891_v46, -inf }
 0xa65   : > { %v1886_v61 = vmul.f32 0.35355338, %v1877_v59  ;;  %1901 = vmax.xlane.f32.xlu0 %v1900_v60  ;;  %v2702_v62 = vpop.f32.mrb[33].mxu0 }
 0xa66   : > { %v1880_v63 = vpop.f32.mrb[34].mxu0 }
 0xa67   : > { %v2703_v1 = vpop.f32.mrb[35].mxu0  ;;  %v1892_v2 = vsel %vm3294_vm9, %v1886_v61, -1e+30 }
 0xa68   : > { %v1903_v3 = vsel %vm1893_vm10, %v1892_v2, -inf }
 0xa69   : > { %1904 = vmax.xlane.f32.xlu0 %v1903_v3 }
 0xa72   : > { %1943 = vrot.lane.b32.xlu1 %v3251_v6, %s3475_s21 }
 0xa7b   : > { %v1896_v4 = vpop.xlane.xlu0 %1895 }
 0xa7c   : > { %v1906_v5 = vsub.f32 %v1889_v45, %v1896_v4 }
 0xa7e   : > { %v1910_v7 = vmul.f32 1.442695, %v1906_v5 }
 0xa80   : > { %2828 = vpow2.f32 %v1910_v7 }
 0xa8a   : > { %v2829_v8 = vpop.eup %2828 }
 0xa8b   : > { %v1918_v10 = vsel %vm1893_vm10, %v2829_v8, 0.0 }
 0xa96   : > { %1919 = vadd.xlane.f32.xlu1 %v1918_v10 }
 0xaee   : > { %v1899_v11 = vpop.xlane.xlu1 %1898 }
 0xaef   : > { %v1907_v13 = vsub.f32 %v1890_v53, %v1899_v11 }
 0xaf1   : > { %v1912_v14 = vmul.f32 1.442695, %v1907_v13 }
 0xaf2   : > { %v1902_v15 = vpop.xlane.xlu0 %1901  ;;  %v1944_v16 = vpop.permute.xlu1 %1943 }
 0xaf3   : > { %2830 = vpow2.f32 %v1912_v14  ;;  %v1908_v17 = vsub.f32 %v1891_v46, %v1902_v15  ;;  %v1950_v19 = vsel %vm1948_vm11, %v1944_v16, 0  ;;  %v2518_v14 = vld [vmem:[%s3427_s19] ss:$0 sm:$0xff] }
 0xaf4   : > { %2705 = vmatpush3.bf16.msra.mxu1 %v1950_v19 }
 0xaf5   : > { %v1914_v6 = vmul.f32 1.442695, %v1908_v17  ;;  %2716 = vmatprep.subr.bf16.mxu1 %v2882_v9 }
 0xaf6   : > { %v1905_v20 = vpop.xlane.xlu0 %1904 }
 0xaf7   : > { %2832 = vpow2.f32 %v1914_v6  ;;  %v1909_v21 = vsub.f32 %v1892_v2, %v1905_v20 }
 0xaf9   : > { %v1916_v22 = vmul.f32 1.442695, %v1909_v21 }
 0xafb   : > { %2834 = vpow2.f32 %v1916_v22 }
 0xafd   : > { %v2831_v23 = vpop.eup %2830 }
 0xafe   : > { %v1921_v24 = vsel %vm1893_vm10, %v2831_v23, 0.0 }
 0xaff   : > { %1922 = vadd.xlane.f32.xlu0 %v1921_v24 }
 0xb01   : > { %v2833_v25 = vpop.eup %2832 }
 0xb02   : > { %v1924_v26 = vsel %vm1893_vm10, %v2833_v25, 0.0 }
 0xb03   : > { %1925 = vadd.xlane.f32.xlu1 %v1924_v26 }
 0xb05   : > { %v2835_v27 = vpop.eup %2834 }
 0xb06   : > { %v1927_v28 = vsel %vm1893_vm10, %v2835_v27, 0.0 }
 0xb07   : > { %1928 = vadd.xlane.f32.xlu0 %v1927_v28  ;;  %v2804_v28 = vld [vmem:[%s3432_s24] sm:$0xff]  }
 0xb14   : > { %2042 = vrot.lane.b32.xlu1 %v3267_v18, %s3475_s21 }
 0xb18   : > { %2091 = vrot.lane.b32.xlu1 %v3278_v29, %s3475_s21 }
 0xb1d   : > { %1993 = vrot.lane.b32.xlu0 %v3259_v12, %s3475_s21 }
 0xb23   : > { %v1920_v30 = vpop.xlane.xlu1 %1919 }
 0xb24   : > { %2836 = vrcp.f32 %v1920_v30  ;;  %v2805_v30 = vld [vmem:[%s3432_s24 + $0x8] sm:$0xff]  }
 0xb2e   : > { %v2837_v31 = vpop.eup %2836 }
 0xb2f   : > { %v1934_v32 = vmul.f32 %v2837_v31, %v2829_v8 }
 0xb31   : > { %v1938_v33 = vpack.c.bf16 %v1934_v32, %v1934_v32 }
 0xb33   : > { %2707 = vmatmul.mubr.msk.bf16.vlgmr.msra.gmra.mrb[32].mxu1 %vm1893_vm10, %v1938_v33 }
 0xb34   : > { %2718 = vmatprep.mubr.msk.bf16.mxu1 %vm2883_vm1, %v2882_v9 }
 0xb8c   : > { %v1923_v34 = vpop.xlane.xlu0 %1922 }
 0xb8d   : > { %2838 = vrcp.f32 %v1923_v34 }
 0xb90   : > { %v1926_v35 = vpop.xlane.xlu1 %1925 }
 0xb91   : > { %2840 = vrcp.f32 %v1926_v35  ;;  %v2519_v35 = vld [vmem:[%s3428_s20] ss:$0 sm:$0xff] }
 0xb94   : > { %v2043_v18 = vpop.permute.xlu1 %2042  ;;  %v1929_v37 = vpop.xlane.xlu0 %1928 }
 0xb95   : > { %v2048_v29 = vsel %vm1948_vm11, %v2043_v18, 0  ;;  %2842 = vrcp.f32 %v1929_v37  ;;  %v2520_v37 = vld [vmem:[%s3479_s7] ss:$0 sm:$0xff] }
 0xb96   : > { %2717 = vmatpush3.bf16.msra.mxu1 %v2048_v29 }
 0xb97   : > { %v2839_v12 = vpop.eup %2838  ;;  %2728 = vmatprep.subr.bf16.mxu1 %v2882_v9 }
 0xb98   : > { %v1935_v38 = vmul.f32 %v2839_v12, %v2831_v23  ;;  %v1994_v39 = vpop.permute.xlu0 %1993  ;;  %v2092_v42 = vpop.permute.xlu1 %2091 }
 0xb99   : > { %v1999_v40 = vsel %vm1948_vm11, %v1994_v39, 0  ;;  %v2097_v45 = vsel %vm1948_vm11, %v2092_v42, 0  ;;  %v2806_v39 = vld [vmem:[%s3432_s24 + $0x10] sm:$0xff]   ;;  %v2521_v42 = vld [vmem:[%s3431_s23] ss:$0 sm:$0xff] }
 0xb9a   : > { %2711 = vmatpush3.bf16.msra.mxu0 %v1999_v40  ;;  %v1939_v0 = vpack.c.bf16 %v1935_v38, %v1935_v38  ;;  %v2807_v40 = vld [vmem:[%s3432_s24 + $0x18] sm:$0xff]  }
 0xb9b   : > { %v2841_v43 = vpop.eup %2840  ;;  %2722 = vmatprep.subr.bf16.mxu0 %v2882_v9 }
 0xb9c   : > { %v1936_v44 = vmul.f32 %v2841_v43, %v2833_v25 }
 0xb9d   : > { %2713 = vmatmul.mubr.msk.bf16.vlgmr.msra.gmra.mrb[36].mxu0 %vm1893_vm10, %v1939_v0 }
 0xb9e   : > { %2723 = vmatpush3.bf16.msra.mxu0 %v2097_v45  ;;  %v1940_v47 = vpack.c.bf16 %v1936_v44, %v1936_v44  ;;  %2724 = vmatprep.mubr.msk.bf16.mxu0 %vm2883_vm1, %v2882_v9 }
 0xb9f   : > { %v2843_v48 = vpop.eup %2842  ;;  %2736 = vmatprep.subr.bf16.mxu0 %v2882_v9 }
 0xba0   : > { %v1937_v49 = vmul.f32 %v2843_v48, %v2835_v27  ;;  %2719 = vmatmul.mubr.msk.bf16.vlgmr.msra.gmra.mrb[36].mxu1 %vm1893_vm10, %v1940_v47  ;;  %v2802_v27 = vld [vmem:[%s3430_s22] sm:$0xff]  }
 0xba1   : > { %2732 = vmatprep.mubr.msk.bf16.mxu1 %vm2883_vm1, %v2882_v9  ;;  %2729 = vmatpush3.bf16.msra.mxu1 %v2800_v55 }
 0xba2   : > { %v1941_v50 = vpack.c.bf16 %v1937_v49, %v1937_v49  ;;  %2730 = vmatprep.subr.bf16.mxu1 %v2882_v9 }
 0xba5   : > { %2725 = vmatmul.mubr.msk.bf16.vlgmr.msra.gmra.mrb[40].mxu0 %vm1893_vm10, %v1941_v50  ;;  %2731 = vmatpush3.bf16.msra.mxu1 %v2801_v56 }
 0xba6   : > { %2740 = vmatprep.mubr.msk.bf16.mxu0 %vm2883_vm1, %v2882_v9  ;;  %2744 = vmatprep.subr.bf16.mxu1 %v2882_v9 }
 0xba7   : > { %2737 = vmatpush3.bf16.msra.mxu0 %v2802_v27 }
 0xba8   : > { %2738 = vmatprep.subr.bf16.mxu0 %v2882_v9 }
 0xc06   : > { %v1986_v51 = vpop.f32.mrb[32].mxu1 }
 0xc07   : > { %v2708_v52 = vpop.f32.mrb[33].mxu1 }
 0xc08   : > { %v1989_v53 = vpop.f32.mrb[34].mxu1 }
 0xc09   : > { %v2709_v54 = vpop.f32.mrb[35].mxu1 }
 0xc70   : > { %v2035_v41 = vpop.f32.mrb[36].mxu0 }
 0xc71   : > { %2140 = vrot.lane.b32.xlu0 %v2035_v41, %s3476_s9  ;;  %v2714_v57 = vpop.f32.mrb[37].mxu0 }
 0xc72   : > { %v2038_v58 = vpop.f32.mrb[38].mxu0 }
 0xc73   : > { %v2715_v46 = vpop.f32.mrb[39].mxu0  ;;  %v2084_v59 = vpop.f32.mrb[36].mxu1 }
 0xc74   : > { %2144 = vrot.lane.b32.xlu1 %v2084_v59, %s3477_s11  ;;  %v2720_v60 = vpop.f32.mrb[37].mxu1 }
 0xc75   : > { %v2087_v61 = vpop.f32.mrb[38].mxu1 }
 0xc76   : > { %v2721_v62 = vpop.f32.mrb[39].mxu1 }
 0xc78   : > { %v2133_v63 = vpop.f32.mrb[40].mxu0 }
 0xc79   : > { %2148 = vrot.lane.b32.xlu0 %v2133_v63, %s3478_s6  ;;  %v2726_v1 = vpop.f32.mrb[41].mxu0  ;;  %s3480_s6 = sshll.u32 %s3044_s3, 3 }
 0xc7a   : > { %v2136_v2 = vpop.f32.mrb[42].mxu0  ;;  %s764_s7 = scalar_lea.vmem %s3434_s26, %s3480_s6 }
 0xc7b   : > { %v2727_v3 = vpop.f32.mrb[43].mxu0 }
 0xce3   : > { %v2141_v4 = vpop.permute.xlu0 %2140 }
 0xce4   : > { %v2151_v7 = vsel %vm964_vm2, %v1986_v51, %v2141_v4 }
 0xce6   : > { %v2145_v5 = vpop.permute.xlu1 %2144 }
 0xce7   : > { %v2152_v8 = vsel %vm1423_vm7, %v2151_v7, %v2145_v5 }
 0xceb   : > { %v2149_v10 = vpop.permute.xlu0 %2148 }
 0xcec   : > { %v2153_v11 = vsel %vm1425_vm8, %v2152_v8, %v2149_v10 }
 0xced   : > { %v2154_v13 = vpack.c.bf16 %v2153_v11, %v2153_v11 }
 0xcef   : > { %2733 = vmatmul.mubr.msk.bf16.vlgmr.msra.gmra.mrb[40].mxu1 %vm771_vm0, %v2154_v13 }
 0xcf0   : > { %2752 = vmatprep.mubr.msk.bf16.mxu1 %vm2883_vm1, %v2882_v9  ;;  %2745 = vmatpush3.bf16.msra.mxu1 %v2804_v28 }
 0xcf1   : > { %2746 = vmatprep.subr.bf16.mxu1 %v2882_v9 }
 0xcf4   : > { %2747 = vmatpush3.bf16.msra.mxu1 %v2805_v30 }
 0xcf5   : > { %2748 = vmatprep.subr.bf16.mxu1 %v2882_v9 }
 0xcf8   : > { %2749 = vmatpush3.bf16.msra.mxu1 %v2806_v39 }
 0xcf9   : > { %2750 = vmatprep.subr.bf16.mxu1 %v2882_v9  ;;  %v2525_v9 = vld [vmem:[%s3433_s25] ss:$0 sm:$0xff] }
 0xcfc   : > { %2751 = vmatpush3.bf16.msra.mxu1 %v2807_v40 }
 0xdc2   : > { %v2204_v15 = vpop.f32.mrb[40].mxu1 }
 0xdc3   : > { %v2210_v16 = vadd.f32 %v2204_v15, %v3210_v36  ;;  %v2734_v17 = vpop.f32.mrb[41].mxu1  ;;  %v2803_v36 = vld [vmem:[%s3430_s22 + $0x8] sm:$0xff]  }
 0xdc4   : > { %v2207_v19 = vpop.f32.mrb[42].mxu1  ;;  %2739 = vmatpush3.bf16.msra.mxu0 %v2803_v36 }
 0xdc5   : > { %v2217_v6 = vadd.f32 %v2518_v14, %v2210_v16  ;;  %v2735_v20 = vpop.f32.mrb[43].mxu1 }
 0xdc7   : > { %v2220_v21 = vsel %vm771_vm0, %v2217_v6, 0.0 }
 0xdc8   : > { %2221 = vadd.xlane.f32.xlu1 %v2220_v21 }
 0xe55   : > { %v2222_v22 = vpop.xlane.xlu1 %2221 }
 0xe56   : > { %v2223_v23 = vmul.f32 0.03125, %v2222_v22 }
 0xe58   : > { %v2224_v24 = vsub.f32 %v2217_v6, %v2223_v23 }
 0xe5a   : > { %v2225_v25 = vmul.f32 %v2224_v24, %v2224_v24 }
 0xe5c   : > { %v2226_v26 = vsel %vm771_vm0, %v2225_v25, 0.0 }
 0xe5d   : > { %2227 = vadd.xlane.f32.xlu0 %v2226_v26 }
 0xeea   : > { %v2228_v31 = vpop.xlane.xlu0 %2227 }
 0xeeb   : > { %v2229_v32 = vmul.f32 0.03125, %v2228_v31 }
 0xeed   : > { %v2230_v33 = vadd.f32 1e-05, %v2229_v32 }
 0xeef   : > { %2844 = vrsqrt.f32 %v2230_v33 }
 0xef9   : > { %v2845_v34 = vpop.eup %2844 }
 0xefa   : > { %v2232_v18 = vmul.f32 %v2845_v34, %v2224_v24 }
 0xefc   : > { %v2239_v29 = vmul.f32 %v2519_v35, %v2232_v18 }
 0xefe   : > { %v2246_v12 = vadd.f32 %v2520_v37, %v2239_v29 }
 0xf00   : > { %v2247_v38 = vpack.c.bf16 %v2246_v12, %v2246_v12 }
 0xf02   : > { %2741 = vmatmul.mubr.msk.bf16.vlgmr.msra.gmra.mrb[44].mxu0 %vm771_vm0, %v2247_v38 }
 0xfd5   : > { %v2308_v0 = vpop.f32.mrb[44].mxu0 }
 0xfd6   : > { %v2309_v43 = vadd.f32 %v2521_v42, %v2308_v0  ;;  %v2742_v44 = vpop.f32.mrb[45].mxu0 }
 0xfd7   : > { %v2311_v45 = vpop.f32.mrb[46].mxu0 }
 0xfd8   : > { %v2314_v47 = vmax.f32 %v2309_v43, 0.0  ;;  %v2743_v48 = vpop.f32.mrb[47].mxu0 }
 0xfda   : > { %v2315_v49 = vpack.c.bf16 %v2314_v47, %v2314_v47 }
 0xfdc   : > { %2753 = vmatmul.mubr.msk.bf16.vlgmr.msra.gmra.mrb[44].mxu1 %vm2355_vm12, %v2315_v49 }
0x10af   : > { %v2393_v50 = vpop.f32.mrb[44].mxu1 }
0x10b0   : > { %v2394_v51 = vadd.f32 %v2525_v9, %v2393_v50  ;;  %v2754_v52 = vpop.f32.mrb[45].mxu1 }
0x10b1   : > { %v2396_v53 = vpop.f32.mrb[46].mxu1 }
0x10b2   : > { %v2399_v54 = vadd.f32 %v2394_v51, %v2217_v6  ;;  %v2755_v55 = vpop.f32.mrb[47].mxu1 }
0x10b4   : > { %2400 = vst.msk [vmem:[%s764_s7] sm:$0xff] %vm771_vm0, %v2399_v54 }
0x10b5 PF: > { %s46_s1 = sadd.s32 1, %s2878_s1  }
0x10b6   : > { %p43_p0 = scmp.ge.s32.totalorder %s46_s1, 4  }
0x10b8   :  { %45 = sbr.rel (!%p43_p0) target bundleno = 39 (0x27), region = 149 }

// kernel: _lambda_.4
= control target key start
LH: loop header
LB: loop body
LE: loop exit
PB: predicated region body
PF: predicated region fallthrough
CT: control target
= control target key end

     0   :  { %s4044_s0 = inlined_call_operand.vmem [shape: s32[2], index: 0, kind: input, shape index: {}]   ;;  %s4045_s2 = inlined_call_operand.vmem [shape: f32[2,8,32], index: 2, kind: input, shape index: {}]   ;;  %s4046_s3 = inlined_call_operand.vmem [shape: f32[2,10,32], index: 3, kind: input, shape index: {}]   ;;  %s4047_s4 = inlined_call_operand.vmem [shape: f32[1,32], index: 4, kind: input, shape index: {}]   ;;  %s4048_s5 = inlined_call_operand.vmem [shape: f32[1,32], index: 5, kind: input, shape index: {}]   ;;  %s4049_s6 = inlined_call_operand.vmem [shape: bf16[32,32], index: 6, kind: input, shape index: {}]   ;;  %s4050_s7 = inlined_call_operand.vmem [shape: f32[1,32], index: 7, kind: input, shape index: {}]   ;;  %s4051_s8 = inlined_call_operand.vmem [shape: bf16[32,64], index: 8, kind: input, shape index: {}]   ;;  %s4052_s9 = inlined_call_operand.vmem [shape: f32[1,64], index: 9, kind: input, shape index: {}]   ;;  %s4053_s10 = inlined_call_operand.vmem [shape: bf16[32,32], index: 10, kind: input, shape index: {}]   ;;  %s4054_s11 = inlined_call_operand.vmem [shape: f32[1,32], index: 11, kind: input, shape index: {}]   ;;  %s4055_s12 = inlined_call_operand.vmem [shape: f32[1,32], index: 12, kind: input, shape index: {}]   ;;  %s4056_s13 = inlined_call_operand.vmem [shape: f32[1,32], index: 13, kind: input, shape index: {}]   ;;  %s4057_s14 = inlined_call_operand.vmem [shape: bf16[32,32], index: 14, kind: input, shape index: {}]   ;;  %s4058_s15 = inlined_call_operand.hbm [shape: f32[1,32], index: 15, kind: input, shape index: {}]   ;;  %s4059_s16 = inlined_call_operand.vmem [shape: bf16[32,64], index: 16, kind: input, shape index: {}]   ;;  %s4060_s17 = inlined_call_operand.hbm [shape: f32[1,64], index: 17, kind: input, shape index: {}]   ;;  %s4061_s18 = inlined_call_operand.vmem [shape: bf16[32,32], index: 18, kind: input, shape index: {}]   ;;  %s4062_s19 = inlined_call_operand.hbm [shape: f32[1,32], index: 19, kind: input, shape index: {}]   ;;  %s4063_s20 = inlined_call_operand.hbm [shape: f32[1,32], index: 20, kind: input, shape index: {}]   ;;  %s4064_s21 = inlined_call_operand.hbm [shape: f32[1,32], index: 21, kind: input, shape index: {}]   ;;  %s4065_s22 = inlined_call_operand.vmem [shape: bf16[32,64], index: 22, kind: input, shape index: {}]   ;;  %s4066_s23 = inlined_call_operand.hbm [shape: f32[1,64], index: 23, kind: input, shape index: {}]   ;;  %s4067_s24 = inlined_call_operand.vmem [shape: bf16[64,32], index: 24, kind: input, shape index: {}]   ;;  %s4068_s25 = inlined_call_operand.hbm [shape: f32[1,32], index: 25, kind: input, shape index: {}]   ;;  %s4069_s26 = inlined_call_operand.vmem [shape: f32[2,8,32], index: 26, kind: output, shape index: {}]   ;;  %s4070_s1 = inlined_call_operand.vmem [shape: s32[2], index: 1, kind: input, shape index: {}]  }
   0x1   :  { %4084 = sst [smem:[#allocation22_spill]] %s4044_s0 }
   0x2   :  { %4085 = sst [smem:[#allocation23_spill]] %s4045_s2 }
   0x3   :  { %4086 = sst [smem:[#allocation24_spill]] %s4046_s3 }
   0x4   :  { %4087 = sst [smem:[#allocation25_spill]] %s4047_s4 }
   0x5   :  { %4088 = sst [smem:[#allocation26_spill]] %s4048_s5  ;;  %s35_s5 = sshll.u32 %s4070_s1, 4  ;;  %s36_s5 = int_to_ptr.vmem [resolvable:$true] %s35_s5 }
   0x6   :  { %4089 = sst [smem:[#allocation27_spill]] %s4049_s6 }
   0x7   :  { %4090 = sst [smem:[#allocation28_spill]] %s4050_s7 }
   0x8   :  { %4091 = sst [smem:[#allocation29_spill]] %s4051_s8  ;;  %s4096_s8 = sld [smem:[#allocation22_spill]] }
   0x9   :  { %4092 = sst [smem:[#allocation30_spill]] %s4052_s9 }
   0xa   :  { %4093 = sst [smem:[#allocation31_spill]] %s4053_s10 }
   0xb   :  { %4094 = sst [smem:[#allocation32_spill]] %s4054_s11 }
   0xc   :  { %4095 = sst [smem:[#allocation33_spill]] %s4061_s18 }
   0xe   :  { %s31_s18 = sshll.u32 %s4096_s8, 4  ;;  %s32_s18 = int_to_ptr.vmem [resolvable:$true] %s31_s18 }
   0xf   :  { %s3088_s29 = scalar_lea.vmem %s32_s18, 16  ;;  %p3093_p1 = scmp.lt.s32.totalorder %s32_s18, %s32_s18 }
  0x10   :  { %p3089_p0 = scmp.ne.s32.totalorder %s32_s18, %s3088_s29  ;;  %p3094_p2 = scmp.lt.s32.totalorder %s3088_s29, %s3088_s29 }
  0x12   :  { %p3095_p3 = por %p3094_p2, %p3093_p1 }
  0x14   :  { %p3096_p4 = pnand %p3095_p3, %p3089_p0 }
  0x16   :  { %3099 = shalt.err (!%p3096_p4)  }
  0x17   :  { %s3334_s0 = smov [#allocation3]   ;;  %s3100_s10 = scalar_lea.vmem %s36_s5, 16 }
  0x18   :  { %34 = dma.vmem_to_smem %s32_s18, 16, %s3334_s0, [#allocation2] }
  0x19   :  { %p3101_p5 = scmp.ne.s32.totalorder %s36_s5, %s3100_s10  ;;  %p3105_p6 = scmp.lt.s32.totalorder %s36_s5, %s36_s5 }
  0x1a   :  { %p3106_p7 = scmp.lt.s32.totalorder %s3100_s10, %s3100_s10 }
  0x1c   :  { %p3107_p8 = por %p3106_p7, %p3105_p6 }
  0x1e   :  { %p3108_p9 = pnand %p3107_p8, %p3101_p5 }
  0x20   :  { %3111 = shalt.err (!%p3108_p9)  }
  0x21   :  { %s3335_s30 = smov [#allocation4]  }
  0x22   :  { %38 = dma.vmem_to_smem %s36_s5, 16, %s3335_s30, [#allocation2] }
  0x23   :  { %3312 = dma.done.wait [#allocation2], 32 }
  0x24   :  { %3313 = vsyncadd [#allocation2], 4294967264 }
  0x25   :  { %40 = sfence }
  0x26   :  { %41 = vsyncpa [#allocation6], 0 }
  0x27   :  { %42 = vsyncpa [#allocation8], 0 }
  0x28   :  { %43 = vsyncpa [#allocation11], 0 }
  0x29   :  { %44 = vsyncpa [#allocation14], 0  ;;  %s3493_s1 = smov 0  }
  0x2a LB: > { %4097 = sst [smem:[#allocation21_spill]] %s3332_s1  ;;  %s3336_s18 = smov [#allocation7]   ;;  %s3332_s1 = sphi %s3493_s1, %s50_s1  }
  0x2b   : > { %s655_s3 = sshll.u32 %s3336_s18, 4  ;;  %s3499_s6 = sadd.s32 4294967295, %s3332_s1   ;;  %s3504_s3 = int_to_ptr.vmem [resolvable:$true] %s655_s3 }
  0x2c   : > { %p2625_p10 = scmp.ge.s32.totalorder %s3332_s1, 1  ;;  %p595_p11 = scmp.lt.s32.totalorder %s3332_s1, 3 }
  0x2d   : > { %p4076_p12 = scmp.eq.s32.totalorder %s3499_s6, 0  ;;  %s3337_s7 = smov [#allocation10]  }
  0x2e   : > { %p3506_p13 = pnand %p2625_p10, %p595_p11  ;;  %s680_s2 = sshll.u32 %s3337_s7, 4  ;;  %s3512_s2 = int_to_ptr.vmem [resolvable:$true] %s680_s2 }
  0x2f   : > { %s3338_s27 = smov [#allocation13]   ;;  %s3339_s28 = smov [#allocation5]  }
  0x30   : > { %s4098_s11 = scalar_select %p3506_p13, 1, 0 }
  0x31   : > { %p2955_p0 = pneg %p3506_p13  ;;  %s705_s4 = sshll.u32 %s3338_s27, 4  ;;  %s3520_s4 = int_to_ptr.vmem [resolvable:$true] %s705_s4 }
  0x32   : > { %s641_s9 = sshll.u32 %s3339_s28, 4  ;;  %s3112_s0 = scalar_lea.hbm %s4060_s17, 16  ;;  %s3522_s9 = int_to_ptr.vmem [resolvable:$true] %s641_s9 }
  0x33   : > { %p3516_p1 = pnand %p4076_p12, %p2955_p0  ;;  %p3113_p2 = scmp.ne.s32.totalorder %s4060_s17, %s3112_s0 }
  0x34   : > { %p3119_p6 = scmp.lt.u32.totalorder %s3112_s0, %s4060_s17 }
  0x35   : > { %p3532_p3 = pneg %p3516_p1 }
  0x37   : > { %p3115_p4 = pnand %p3532_p3, %p3113_p2 }
  0x39   : > { %p3116_p5 = pneg %p3115_p4 }
  0x3b   : > { %p3121_p7 = pnand %p3119_p6, %p3116_p5 }
  0x3d   : > { %3124 = shalt.err (!%p3121_p7)
}
  0x3e   : > { %s3125_s28 = scalar_lea.vmem %s3504_s3, 16  ;;  %s3132_s5 = scalar_lea.vmem %s3504_s3, 32 }
  0x3f   : > { %p3126_p8 = scmp.ne.s32.totalorder %s3504_s3, %s3125_s28  ;;  %p3133_p11 = scmp.lt.s32.totalorder %s3504_s3, %s3504_s3 }
  0x40   : > { %p3134_p0 = scmp.lt.s32.totalorder %s3132_s5, %s3125_s28 }
  0x41   : > { %p3128_p9 = pnand %p3126_p8, %p3532_p3 }
  0x42   : > { %p3135_p2 = por %p3134_p0, %p3133_p11 }
  0x43   : > { %p3129_p10 = pneg %p3128_p9 }
  0x45   : > { %p3136_p4 = pnand %p3135_p2, %p3129_p10 }
  0x47   : > { %3139 = shalt.err (!%p3136_p4)
}
  0x48   : > { %2961 = dma.hbm_to_vmem [thread:$0]  (!%p3516_p1), %s4060_s17, 16, %s3504_s3, [#allocation8]  }
  0x49   : > { %s3140_s7 = scalar_lea.hbm %s4063_s20, 16 }
  0x4a   : > { %p3141_p5 = scmp.ne.s32.totalorder %s4063_s20, %s3140_s7  ;;  %p3147_p8 = scmp.lt.u32.totalorder %s3140_s7, %s4063_s20 }
  0x4c   : > { %p3143_p6 = pnand %p3141_p5, %p3532_p3 }
  0x4e   : > { %p3144_p7 = pneg %p3143_p6 }
  0x50   : > { %p3149_p9 = pnand %p3147_p8, %p3144_p7 }
  0x52   : > { %3152 = shalt.err (!%p3149_p9)
}
  0x53   : > { %s3153_s3 = scalar_lea.vmem %s3512_s2, 16  ;;  %s3160_s1 = scalar_lea.vmem %s3512_s2, 32 }
  0x54   : > { %p3154_p10 = scmp.ne.s32.totalorder %s3512_s2, %s3153_s3  ;;  %p3161_p2 = scmp.lt.s32.totalorder %s3512_s2, %s3512_s2 }
  0x55   : > { %p3162_p4 = scmp.lt.s32.totalorder %s3160_s1, %s3153_s3 }
  0x56   : > { %p3156_p11 = pnand %p3154_p10, %p3532_p3 }
  0x57   : > { %p3163_p5 = por %p3162_p4, %p3161_p2 }
  0x58   : > { %p3157_p0 = pneg %p3156_p11 }
  0x5a   : > { %p3164_p6 = pnand %p3163_p5, %p3157_p0 }
  0x5c   : > { %3167 = shalt.err (!%p3164_p6)
}
  0x5d   : > { %2967 = dma.hbm_to_vmem [thread:$0]  (!%p3516_p1), %s4063_s20, 16, %s3512_s2, [#allocation11]  }
  0x5e   : > { %s3168_s7 = scalar_lea.hbm %s4066_s23, 16 }
  0x5f   : > { %p3169_p7 = scmp.ne.s32.totalorder %s4066_s23, %s3168_s7  ;;  %p3175_p10 = scmp.lt.u32.totalorder %s3168_s7, %s4066_s23 }
  0x61   : > { %p3171_p8 = pnand %p3169_p7, %p3532_p3 }
  0x63   : > { %p3172_p9 = pneg %p3171_p8 }
  0x65   : > { %p3177_p11 = pnand %p3175_p10, %p3172_p9 }
  0x67   : > { %3180 = shalt.err (!%p3177_p11)
}
  0x68   : > { %s3181_s2 = scalar_lea.vmem %s3520_s4, 16  ;;  %s3188_s1 = scalar_lea.vmem %s3520_s4, 32 }
  0x69   : > { %p3182_p0 = scmp.ne.s32.totalorder %s3520_s4, %s3181_s2  ;;  %p3189_p5 = scmp.lt.s32.totalorder %s3520_s4, %s3520_s4 }
  0x6a   : > { %p3190_p6 = scmp.lt.s32.totalorder %s3188_s1, %s3181_s2 }
  0x6b   : > { %p3184_p2 = pnand %p3182_p0, %p3532_p3 }
  0x6c   : > { %p3191_p7 = por %p3190_p6, %p3189_p5 }
  0x6d   : > { %p3185_p4 = pneg %p3184_p2 }
  0x6f   : > { %p3192_p8 = pnand %p3191_p7, %p3185_p4 }
  0x71   : > { %3195 = shalt.err (!%p3192_p8)
}
  0x72   : > { %2973 = dma.hbm_to_vmem [thread:$0]  (!%p3516_p1), %s4066_s23, 16, %s3520_s4, [#allocation14]  }
  0x73   : > { %s3196_s7 = scalar_lea.hbm %s4058_s15, 16 }
  0x74   : > { %p3197_p9 = scmp.ne.s32.totalorder %s4058_s15, %s3196_s7  ;;  %p3203_p0 = scmp.lt.u32.totalorder %s3196_s7, %s4058_s15 }
  0x76   : > { %p3199_p10 = pnand %p3197_p9, %p3532_p3 }
  0x78   : > { %p3200_p11 = pneg %p3199_p10 }
  0x7a   : > { %p3205_p2 = pnand %p3203_p0, %p3200_p11 }
  0x7c   : > { %3208 = shalt.err (!%p3205_p2)
}
  0x7d   : > { %s3209_s4 = scalar_lea.vmem %s3522_s9, 16  ;;  %s3216_s2 = scalar_lea.vmem %s3522_s9, 32 }
  0x7e   : > { %p3210_p4 = scmp.ne.s32.totalorder %s3522_s9, %s3209_s4  ;;  %p3217_p7 = scmp.lt.s32.totalorder %s3522_s9, %s3522_s9 }
  0x7f   : > { %p3218_p8 = scmp.lt.s32.totalorder %s3216_s2, %s3209_s4 }
  0x80   : > { %p3212_p5 = pnand %p3210_p4, %p3532_p3 }
  0x81   : > { %p3219_p9 = por %p3218_p8, %p3217_p7 }
  0x82   : > { %p3213_p6 = pneg %p3212_p5 }
  0x84   : > { %p3220_p10 = pnand %p3219_p9, %p3213_p6 }
  0x86   : > { %3223 = shalt.err (!%p3220_p10)
}
  0x87   : > { %2958 = dma.hbm_to_vmem [thread:$0]  (!%p3516_p1), %s4058_s15, 16, %s3522_s9, [#allocation6]  }
  0x88   : > { %s3340_s0 = smov [#allocation9]   ;;  %s3341_s30 = smov [#allocation12]  }
  0x89   : > { %s669_s10 = sshll.u32 %s3340_s0, 4  ;;  %s691_s7 = sshll.u32 %s3341_s30, 4  ;;  %s670_s10 = int_to_ptr.vmem [resolvable:$true] %s669_s10  ;;  %s692_s7 = int_to_ptr.vmem [resolvable:$true] %s691_s7 }
  0x8a   : > { %s3224_s5 = scalar_lea.hbm %s4062_s19, 16 }
  0x8b   : > { %p3225_p11 = scmp.ne.s32.totalorder %s4062_s19, %s3224_s5  ;;  %p3231_p4 = scmp.lt.u32.totalorder %s3224_s5, %s4062_s19 }
  0x8d   : > { %p3227_p0 = pnand %p3225_p11, %p3532_p3 }
  0x8f   : > { %p3228_p2 = pneg %p3227_p0 }
  0x91   : > { %p3233_p5 = pnand %p3231_p4, %p3228_p2 }
  0x93   : > { %3236 = shalt.err (!%p3233_p5)
}
  0x94   : > { %s3237_s9 = scalar_lea.vmem %s670_s10, 16  ;;  %s3244_s29 = scalar_lea.vmem %s670_s10, 32 }
  0x95   : > { %p3238_p6 = scmp.ne.s32.totalorder %s670_s10, %s3237_s9  ;;  %p3245_p9 = scmp.lt.s32.totalorder %s670_s10, %s670_s10 }
  0x96   : > { %p3246_p10 = scmp.lt.s32.totalorder %s3244_s29, %s3237_s9 }
  0x97   : > { %p3240_p7 = pnand %p3238_p6, %p3532_p3 }
  0x98   : > { %p3247_p12 = por %p3246_p10, %p3245_p9 }
  0x99   : > { %p3241_p8 = pneg %p3240_p7 }
  0x9b   : > { %p3248_p13 = pnand %p3247_p12, %p3241_p8 }
  0x9d   : > { %3251 = shalt.err (!%p3248_p13)
}
  0x9e   : > { %2964 = dma.hbm_to_vmem [thread:$0]  (!%p3516_p1), %s4062_s19, 16, %s670_s10, [#allocation8]  }
  0x9f   : > { %s3252_s5 = scalar_lea.hbm %s4064_s21, 16 }
  0xa0   : > { %p3253_p11 = scmp.ne.s32.totalorder %s4064_s21, %s3252_s5  ;;  %p3259_p13 = scmp.lt.u32.totalorder %s3252_s5, %s4064_s21 }
  0xa2   : > { %p3255_p0 = pnand %p3253_p11, %p3532_p3 }
  0xa4   : > { %p3256_p12 = pneg %p3255_p0 }
  0xa6   : > { %p3261_p2 = pnand %p3259_p13, %p3256_p12 }
  0xa8   : > { %3264 = shalt.err (!%p3261_p2)
}
  0xa9   : > { %s3265_s9 = scalar_lea.vmem %s692_s7, 16  ;;  %s3272_s10 = scalar_lea.vmem %s692_s7, 32 }
  0xaa   : > { %p3266_p4 = scmp.ne.s32.totalorder %s692_s7, %s3265_s9  ;;  %p3273_p7 = scmp.lt.s32.totalorder %s692_s7, %s692_s7 }
  0xab   : > { %p3274_p8 = scmp.lt.s32.totalorder %s3272_s10, %s3265_s9 }
  0xac   : > { %p3268_p5 = pnand %p3266_p4, %p3532_p3 }
  0xad   : > { %p3275_p9 = por %p3274_p8, %p3273_p7 }
  0xae   : > { %p3269_p6 = pneg %p3268_p5 }
  0xb0   : > { %p3276_p10 = pnand %p3275_p9, %p3269_p6 }
  0xb2   : > { %3279 = shalt.err (!%p3276_p10)
}
  0xb3   : > { %2970 = dma.hbm_to_vmem [thread:$0]  (!%p3516_p1), %s4064_s21, 16, %s692_s7, [#allocation11]  }
  0xb4   : > { %s3342_s30 = smov [#allocation15]   ;;  %s3280_s3 = scalar_lea.hbm %s4068_s25, 16 }
  0xb5   : > { %s719_s27 = sshll.u32 %s3342_s30, 4  ;;  %p3281_p11 = scmp.ne.s32.totalorder %s4068_s25, %s3280_s3  ;;  %s720_s27 = int_to_ptr.vmem [resolvable:$true] %s719_s27 }
  0xb6   : > { %p3287_p13 = scmp.lt.u32.totalorder %s3280_s3, %s4068_s25 }
  0xb7   : > { %p3283_p0 = pnand %p3281_p11, %p3532_p3 }
  0xb9   : > { %p3284_p12 = pneg %p3283_p0 }
  0xbb   : > { %p3289_p2 = pnand %p3287_p13, %p3284_p12 }
  0xbd   : > { %3292 = shalt.err (!%p3289_p2)
}
  0xbe   : > { %s3293_s7 = scalar_lea.vmem %s720_s27, 16  ;;  %s3300_s10 = scalar_lea.vmem %s720_s27, 32 }
  0xbf   : > { %p3294_p4 = scmp.ne.s32.totalorder %s720_s27, %s3293_s7  ;;  %p3301_p7 = scmp.lt.s32.totalorder %s720_s27, %s720_s27 }
  0xc0   : > { %p3302_p8 = scmp.lt.s32.totalorder %s3300_s10, %s3293_s7 }
  0xc1   : > { %p3296_p5 = pnand %p3294_p4, %p3532_p3 }
  0xc2   : > { %p3303_p9 = por %p3302_p8, %p3301_p7 }
  0xc3   : > { %p3297_p6 = pneg %p3296_p5 }
  0xc5   : > { %p3304_p10 = pnand %p3303_p9, %p3297_p6 }
  0xc7   : > { %3307 = shalt.err (!%p3304_p10)
}
  0xc8   : > { %2976 = dma.hbm_to_vmem [thread:$0]  (!%p3516_p1), %s4068_s25, 16, %s720_s27, [#allocation14]  }
  0xc9   : > { %p4101_p11 = scmp.ne.s32.totalorder %s4098_s11, 0 }
  0xca   : > { %p4102_p0 = scmp.eq.s32.totalorder (!%p4101_p11), %s3499_s6, 0 }
  0xcb   : > { %747 = sbr.rel (%p4101_p11) target bundleno = 4449 (0x1161), region = 116 }
  0xd2   : > { %3315 = dma.done.wait (%p4102_p0), [#allocation6], 16   ;;  %p4103_p3 = pmov %p4102_p0 }
  0xd3   : > { %p4104_p12 = pmov %p4102_p0 }
  0xd4   : > { %3317 = vsyncadd (%p4103_p3), [#allocation6], 4294967280 }
  0xd5   : > { %3319 = dma.done.wait (%p4104_p12), [#allocation8], 32   ;;  %p4105_p13 = pmov %p4102_p0 }
  0xd6   : > { %p4106_p2 = pmov %p4102_p0 }
  0xd7   : > { %3321 = vsyncadd (%p4105_p13), [#allocation8], 4294967264 }
  0xd8   : > { %3323 = dma.done.wait (%p4106_p2), [#allocation11], 32   ;;  %p4107_p1 = pmov %p4102_p0 }
  0xd9   : > { %p4108_p4 = pmov %p4102_p0 }
  0xda   : > { %3325 = vsyncadd (%p4107_p1), [#allocation11], 4294967264 }
  0xdb   : > { %3327 = dma.done.wait (%p4108_p4), [#allocation14], 32   ;;  %p4109_p5 = pmov %p4102_p0 }
  0xdc   : > { %p840_p6 = scmp.lt.s32.totalorder %s3499_s6, 1  ;;  %s4110_s27 = sld [smem:[#allocation23_spill]]  ;;  %vm859_vm0 = vcmask 261120   ;;  %v3343_v9 = vmov 0.0   ;;  %vm3344_vm1 = vmmov 0   ;;  %vm1052_vm2 = vcmask 64512  }
  0xdd   : > { %3329 = vsyncadd (%p4109_p5), [#allocation14], 4294967264  ;;  %s4111_s4 = sld [smem:[#allocation27_spill]]  ;;  %s4112_s9 = sld [smem:[#allocation29_spill]]  ;;  %2763 = vmatprep.subr.bf16.mxu0 %v3343_v9  ;;  %2771 = vmatprep.subr.bf16.mxu1 %v3343_v9  ;;  %v1241_v52 = vlaneseq  ;;  %vm1307_vm6 = vcmask 1043456   ;;  %vm1511_vm7 = vcmask 130048  }
  0xde   : > { %s3700_s11 = scalar_select %p840_p6, %s3499_s6, 1  ;;  %2767 = vmatprep.mubr.msk.bf16.mxu0 %vm3344_vm1, %v3343_v9  ;;  %2775 = vmatprep.mubr.msk.bf16.mxu1 %vm3344_vm1, %v3343_v9  ;;  %vm1513_vm8 = vcmask 195584   ;;  %vm1981_vm10 = vcmask 80896   ;;  %vm2036_vm11 = vcmask 1044480   ;;  %vm2443_vm12 = vcmask 523264  }
  0xdf   : > { %s4114_s3 = sld [smem:[#allocation26_spill]]  ;;  %s4115_s7 = sld [smem:[#allocation28_spill]]  ;;  %v3793_v53 = vand.u32 127, %v1241_v52  ;;  %v1246_v54 = vshrl.u32 %v1241_v52, 7 }
  0xe0   : > { %s4078_s8 = sshll.u32 %s3700_s11, 3  ;;  %s4116_s0 = sld [smem:[#allocation30_spill]] }
  0xe1   : > { %s3345_s18 = smov 120   ;;  %s3346_s30 = smov 112   ;;  %vm1247_vm4 = vcmp.le.s32.totalorder %v3793_v53, %v1246_v54 }
  0xe2   : > { %s843_s28 = scalar_lea.vmem %s4110_s27, %s4078_s8  ;;  %s4113_s27 = sld [smem:[#allocation25_spill]] }
  0xe3   : > { %v3708_v0 = vld [vmem:[%s843_s28] sm:$0xff]  ;;  %v3034_v10 = vld [vmem:[%s4111_s4 + $0x8] sm:$0xff]   ;;  %s888_s28 = sld [smem:[#allocation3 + %s3499_s6]]  ;;  %s4082_s5 = smov 96  }
  0xe4   : > { %v860_v1 = vsel %vm859_vm0, %v3708_v0, 0.0  ;;  %v3032_v7 = vld [vmem:[%s4111_s4] sm:$0xff]   ;;  %v3035_v11 = vld [vmem:[%s4112_s9 + $0x8] sm:$0xff]   ;;  %s4119_s1 = sld [smem:[#allocation31_spill]]  ;;  %s4121_s10 = sld [smem:[#allocation32_spill]] }
  0xe5   : > { %861 = vadd.xlane.f32.xlu0 %v860_v1  ;;  %v3033_v8 = vld [vmem:[%s4112_s9] sm:$0xff]   ;;  %2764 = vmatpush3.bf16.msra.mxu0 %v3032_v7  ;;  %s2704_s2 = sshll.u32 %s3700_s11, 4 }
  0xe6   : > { %2772 = vmatpush3.bf16.msra.mxu1 %v3033_v8  ;;  %2765 = vmatprep.subr.bf16.mxu0 %v3343_v9  ;;  %v2647_v18 = vld [vmem:[%s4114_s3] ss:$0 sm:$0xff]  ;;  %s4079_s3 = smov 24  }
  0xe7   : > { %2773 = vmatprep.subr.bf16.mxu1 %v3343_v9  ;;  %v2648_v22 = vld [vmem:[%s4115_s7] ss:$0 sm:$0xff] }
  0xe8   : > { %v2646_v16 = vld [vmem:[%s4113_s27] ss:$0 sm:$0xff]  ;;  %s3347_s27 = smov 104  }
  0xe9   : > { %2766 = vmatpush3.bf16.msra.mxu0 %v3034_v10  ;;  %v2652_v23 = vld [vmem:[%s4116_s0] ss:$0 sm:$0xff]  ;;  %v1243_v55 = vstv %s888_s28  ;;  %s4081_s0 = smov 8   ;;  %s4080_s28 = smov 16  }
  0xea   : > { %2774 = vmatpush3.bf16.msra.mxu1 %v3035_v11  ;;  %2779 = vmatprep.subr.bf16.mxu0 %v3343_v9  ;;  %vm1244_vm3 = vcmp.lt.s32.totalorder %v3793_v53, %v1243_v55  ;;  %s4120_s7 = smov %s4119_s1 }
  0xeb   : > { %2785 = vmatprep.subr.bf16.mxu1 %v3343_v9  ;;  %vm3797_vm5 = vmand %vm1244_vm3, %vm1247_vm4 }
 0x172   : > { %v862_v2 = vpop.xlane.xlu0 %861 }
 0x173   : > { %v864_v3 = vmul.f32 0.03125, %v862_v2 }
 0x175   : > { %v865_v4 = vsub.f32 %v3708_v0, %v864_v3 }
 0x177   : > { %v866_v5 = vmul.f32 %v865_v4, %v865_v4 }
 0x179   : > { %v867_v6 = vsel %vm859_vm0, %v866_v5, 0.0 }
 0x17a   : > { %868 = vadd.xlane.f32.xlu0 %v867_v6 }
 0x207   : > { %v869_v12 = vpop.xlane.xlu0 %868 }
 0x208   : > { %v870_v13 = vmul.f32 0.03125, %v869_v12 }
 0x20a   : > { %v871_v14 = vadd.f32 1e-05, %v870_v13 }
 0x20c   : > { %3050 = vrsqrt.f32 %v871_v14 }
 0x216   : > { %v3051_v15 = vpop.eup %3050 }
 0x217   : > { %v873_v17 = vmul.f32 %v3051_v15, %v865_v4 }
 0x219   : > { %v880_v19 = vmul.f32 %v2646_v16, %v873_v17 }
 0x21b   : > { %v887_v20 = vadd.f32 %v2647_v18, %v880_v19 }
 0x21d   : > { %v904_v21 = vpack.c.bf16 %v887_v20, %v887_v20 }
 0x21f   : > { %2768 = vmatmul.mubr.msk.bf16.vlgmr.msra.gmra.mrb[0].mxu0 %vm859_vm0, %v904_v21  ;;  %2776 = vmatmul.mubr.msk.bf16.vlgmr.msra.gmra.mrb[0].mxu1 %vm859_vm0, %v904_v21 }
 0x220   : > { %2781 = vmatprep.mubr.msk.bf16.mxu0 %vm3344_vm1, %v3343_v9  ;;  %2787 = vmatprep.mubr.msk.bf16.mxu1 %vm3344_vm1, %v3343_v9 }
 0x2f2   : > { %v960_v24 = vpop.f32.mrb[0].mxu0  ;;  %v1018_v25 = vpop.f32.mrb[0].mxu1 }
 0x2f3   : > { %v961_v26 = vadd.f32 %v2648_v22, %v960_v24  ;;  %v1019_v27 = vadd.f32 %v2652_v23, %v1018_v25  ;;  %v2769_v28 = vpop.f32.mrb[1].mxu0  ;;  %v2777_v29 = vpop.f32.mrb[1].mxu1 }
 0x2f4   : > { %v963_v30 = vpop.f32.mrb[2].mxu0  ;;  %v1021_v31 = vpop.f32.mrb[2].mxu1 }
 0x2f5   : > { %1035 = vrot.lane.b32.xlu1 %v1019_v27, %s3345_s18  ;;  %v2778_v32 = vpop.f32.mrb[3].mxu1  ;;  %1025 = vrot.lane.b32.xlu0 %v961_v26, %s3345_s18  ;;  %v2770_v33 = vpop.f32.mrb[3].mxu0  ;;  %v3756_v34 = vpack.c.bf16 %v1019_v27, %v1019_v27  ;;  %v1044_v36 = vpack.c.bf16 %v961_v26, %v961_v26 }
 0x2f7   : > { %v1057_v35 = vsel %vm1052_vm2, %v3756_v34, 0 }
 0x2f8   : > { %2780 = vmatpush3.bf16.xpose.msra.mxu0 %v1057_v35 }
 0x2f9   : > { %1038 = vrot.lane.b32.xlu1 %v1019_v27, %s3346_s30  ;;  %2791 = vmatprep.subr.bf16.mxu0 %v3343_v9 }
 0x2fd   : > { %1041 = vrot.lane.b32.xlu1 %v1019_v27, %s3347_s27 }
 0x2ff   : > { %2782 = vmatmul.mubr.msk.bf16.vlgmr.msra.gmra.mrb[4].mxu0 %vm1052_vm2, %v1044_v36 }
 0x300   : > { %2793 = vmatprep.mubr.msk.bf16.mxu0 %vm3344_vm1, %v3343_v9 }
 0x301   : > { %1028 = vrot.lane.b32.xlu1 %v961_v26, %s3346_s30 }
 0x305   : > { %1031 = vrot.lane.b32.xlu1 %v961_v26, %s3347_s27 }
 0x367   : > { %v1036_v37 = vpop.permute.xlu1 %1035  ;;  %v1026_v42 = vpop.permute.xlu0 %1025 }
 0x368   : > { %v3768_v38 = vpack.c.bf16 %v1036_v37, %v1036_v37  ;;  %v1045_v45 = vpack.c.bf16 %v1026_v42, %v1026_v42 }
 0x36a   : > { %v1103_v39 = vsel %vm1052_vm2, %v3768_v38, 0 }
 0x36b   : > { %2786 = vmatpush3.bf16.xpose.msra.mxu1 %v1103_v39  ;;  %v1039_v40 = vpop.permute.xlu1 %1038 }
 0x36c   : > { %v3772_v41 = vpack.c.bf16 %v1039_v40, %v1039_v40  ;;  %2797 = vmatprep.subr.bf16.mxu1 %v3343_v9 }
 0x36e   : > { %v1149_v43 = vsel %vm1052_vm2, %v3772_v41, 0 }
 0x36f   : > { %v1042_v44 = vpop.permute.xlu1 %1041  ;;  %2792 = vmatpush3.bf16.xpose.msra.mxu0 %v1149_v43 }
 0x370   : > { %v3777_v46 = vpack.c.bf16 %v1042_v44, %v1042_v44  ;;  %2803 = vmatprep.subr.bf16.mxu0 %v3343_v9 }
 0x372   : > { %v1195_v47 = vsel %vm1052_vm2, %v3777_v46, 0  ;;  %2788 = vmatmul.mubr.msk.bf16.vlgmr.msra.gmra.mrb[4].mxu1 %vm1052_vm2, %v1045_v45 }
 0x373   : > { %v1029_v48 = vpop.permute.xlu1 %1028  ;;  %2798 = vmatpush3.bf16.xpose.msra.mxu1 %v1195_v47  ;;  %2799 = vmatprep.mubr.msk.bf16.mxu1 %vm3344_vm1, %v3343_v9 }
 0x374   : > { %v1046_v49 = vpack.c.bf16 %v1029_v48, %v1029_v48  ;;  %2809 = vmatprep.subr.bf16.mxu1 %v3343_v9 }
 0x376   : > { %2794 = vmatmul.mubr.msk.bf16.vlgmr.msra.gmra.mrb[8].mxu0 %vm1052_vm2, %v1046_v49 }
 0x377   : > { %v1032_v50 = vpop.permute.xlu1 %1031  ;;  %2805 = vmatprep.mubr.msk.bf16.mxu0 %vm3344_vm1, %v3343_v9 }
 0x378   : > { %v1047_v51 = vpack.c.bf16 %v1032_v50, %v1032_v50 }
 0x37a   : > { %2800 = vmatmul.mubr.msk.bf16.vlgmr.msra.gmra.mrb[8].mxu1 %vm1052_vm2, %v1047_v51 }
 0x37b   : > { %2811 = vmatprep.mubr.msk.bf16.mxu1 %vm3344_vm1, %v3343_v9 }
 0x3d2   : > { %v1093_v56 = vpop.f32.mrb[4].mxu0 }
 0x3d3   : > { %v1237_v58 = vmul.f32 0.35355338, %v1093_v56  ;;  %v2783_v59 = vpop.f32.mrb[5].mxu0 }
 0x3d4   : > { %v1096_v60 = vpop.f32.mrb[6].mxu0 }
 0x3d5   : > { %v2784_v61 = vpop.f32.mrb[7].mxu0  ;;  %v1249_v62 = vsel %vm3797_vm5, %v1237_v58, -1e+30 }
 0x3d6   : > { %v1253_v63 = vsel %vm1052_vm2, %v1249_v62, -inf }
 0x3d7   : > { %1254 = vmax.xlane.f32.xlu1 %v1253_v63 }
 0x445   : > { %v1139_v1 = vpop.f32.mrb[4].mxu1 }
 0x446   : > { %v1238_v2 = vmul.f32 0.35355338, %v1139_v1  ;;  %v2789_v3 = vpop.f32.mrb[5].mxu1 }
 0x447   : > { %v1142_v4 = vpop.f32.mrb[6].mxu1 }
 0x448   : > { %v2790_v5 = vpop.f32.mrb[7].mxu1  ;;  %v1250_v6 = vsel %vm3797_vm5, %v1238_v2, -1e+30 }
 0x449   : > { %v1185_v7 = vpop.f32.mrb[8].mxu0  ;;  %v1256_v8 = vsel %vm1052_vm2, %v1250_v6, -inf }
 0x44a   : > { %v1239_v10 = vmul.f32 0.35355338, %v1185_v7  ;;  %1257 = vmax.xlane.f32.xlu0 %v1256_v8  ;;  %v2795_v11 = vpop.f32.mrb[9].mxu0 }
 0x44b   : > { %v1188_v12 = vpop.f32.mrb[10].mxu0  ;;  %v3037_v11 = vld [vmem:[%s4120_s7 + $0x8] sm:$0xff]  }
 0x44c   : > { %v2796_v13 = vpop.f32.mrb[11].mxu0  ;;  %v1251_v14 = vsel %vm3797_vm5, %v1239_v10, -1e+30  ;;  %v3036_v10 = vld [vmem:[%s4119_s1] sm:$0xff]   ;;  %s4130_s1 = sshll.u32 %s3700_s11, 3 }
 0x44d   : > { %v1231_v15 = vpop.f32.mrb[8].mxu1  ;;  %v1259_v16 = vsel %vm1052_vm2, %v1251_v14, -inf }
 0x44e   : > { %v1240_v17 = vmul.f32 0.35355338, %v1231_v15  ;;  %v2801_v18 = vpop.f32.mrb[9].mxu1  ;;  %1260 = vmax.xlane.f32.xlu1 %v1259_v16 }
 0x44f   : > { %v1234_v19 = vpop.f32.mrb[10].mxu1 }
 0x450   : > { %v2802_v20 = vpop.f32.mrb[11].mxu1  ;;  %v1252_v21 = vsel %vm3797_vm5, %v1240_v17, -1e+30 }
 0x451   : > { %v1262_v22 = vsel %vm1052_vm2, %v1252_v21, -inf }
 0x452   : > { %1263 = vmax.xlane.f32.xlu1 %v1262_v22 }
 0x460   : > { %1302 = vrot.lane.b32.xlu0 %v3756_v34, %s4082_s5 }
 0x463   : > { %1352 = vrot.lane.b32.xlu1 %v3768_v38, %s4082_s5 }
 0x464   : > { %v1255_v23 = vpop.xlane.xlu1 %1254 }
 0x465   : > { %v1265_v24 = vsub.f32 %v1249_v62, %v1255_v23 }
 0x467   : > { %v1269_v25 = vmul.f32 1.442695, %v1265_v24 }
 0x469   : > { %3052 = vpow2.f32 %v1269_v25 }
 0x473   : > { %v3053_v26 = vpop.eup %3052 }
 0x474   : > { %v1277_v27 = vsel %vm1052_vm2, %v3053_v26, 0.0 }
 0x47f   : > { %1278 = vadd.xlane.f32.xlu0 %v1277_v27 }
 0x4d7   : > { %v1258_v28 = vpop.xlane.xlu0 %1257 }
 0x4d8   : > { %v1266_v29 = vsub.f32 %v1250_v6, %v1258_v28 }
 0x4da   : > { %v1271_v30 = vmul.f32 1.442695, %v1266_v29 }
 0x4db   : > { %v1303_v31 = vpop.permute.xlu0 %1302  ;;  %v1261_v32 = vpop.xlane.xlu1 %1260 }
 0x4dc   : > { %3054 = vpow2.f32 %v1271_v30  ;;  %v1309_v33 = vsel %vm1307_vm6, %v1303_v31, 0  ;;  %v1267_v34 = vsub.f32 %v1251_v14, %v1261_v32  ;;  %v2667_v31 = vld [vmem:[%s4121_s10] ss:$0 sm:$0xff]  ;;  %s4126_s10 = sld [smem:[#allocation33_spill]] }
 0x4dd   : > { %2804 = vmatpush3.bf16.msra.mxu0 %v1309_v33 }
 0x4de   : > { %v1273_v35 = vmul.f32 1.442695, %v1267_v34  ;;  %2815 = vmatprep.subr.bf16.mxu0 %v3343_v9 }
 0x4df   : > { %v1264_v36 = vpop.xlane.xlu1 %1263 }
 0x4e0   : > { %3056 = vpow2.f32 %v1273_v35  ;;  %v1268_v37 = vsub.f32 %v1252_v21, %v1264_v36 }
 0x4e2   : > { %v1275_v38 = vmul.f32 1.442695, %v1268_v37 }
 0x4e3   : > { %v1353_v39 = vpop.permute.xlu1 %1352 }
 0x4e4   : > { %3058 = vpow2.f32 %v1275_v38  ;;  %v1358_v40 = vsel %vm1307_vm6, %v1353_v39, 0  ;;  %v3038_v39 = vld [vmem:[%s4059_s16] sm:$0xff]  }
 0x4e5   : > { %2810 = vmatpush3.bf16.msra.mxu1 %v1358_v40 }
 0x4e6   : > { %v3055_v42 = vpop.eup %3054  ;;  %2821 = vmatprep.subr.bf16.mxu1 %v3343_v9 }
 0x4e7   : > { %v1280_v43 = vsel %vm1052_vm2, %v3055_v42, 0.0 }
 0x4e8   : > { %1281 = vadd.xlane.f32.xlu1 %v1280_v43 }
 0x4ea   : > { %v3057_v44 = vpop.eup %3056 }
 0x4eb   : > { %v1283_v45 = vsel %vm1052_vm2, %v3057_v44, 0.0 }
 0x4ec   : > { %1284 = vadd.xlane.f32.xlu0 %v1283_v45 }
 0x4ee   : > { %v3059_v47 = vpop.eup %3058 }
 0x4ef   : > { %v1286_v48 = vsel %vm1052_vm2, %v3059_v47, 0.0 }
 0x4f0   : > { %1287 = vadd.xlane.f32.xlu1 %v1286_v48  ;;  %v3039_v48 = vld [vmem:[%s4059_s16 + $0x8] sm:$0xff]  }
 0x501   : > { %1401 = vrot.lane.b32.xlu1 %v3772_v41, %s4082_s5 }
 0x502   : > { %1450 = vrot.lane.b32.xlu0 %v3777_v46, %s4082_s5 }
 0x50c   : > { %v1279_v49 = vpop.xlane.xlu0 %1278 }
 0x50d   : > { %3060 = vrcp.f32 %v1279_v49 }
 0x517   : > { %v3061_v50 = vpop.eup %3060 }
 0x518   : > { %v1293_v51 = vmul.f32 %v3061_v50, %v3053_v26  ;;  %v3040_v50 = vld [vmem:[%s4057_s14] sm:$0xff]  }
 0x51a   : > { %v1297_v52 = vpack.c.bf16 %v1293_v51, %v1293_v51  ;;  %v3041_v51 = vld [vmem:[%s4057_s14 + $0x8] sm:$0xff]  }
 0x51c   : > { %2806 = vmatmul.mubr.msk.bf16.vlgmr.msra.gmra.mrb[12].mxu0 %vm1052_vm2, %v1297_v52 }
 0x51d   : > { %2817 = vmatprep.mubr.msk.bf16.mxu0 %vm3344_vm1, %v3343_v9 }
 0x575   : > { %v1282_v54 = vpop.xlane.xlu1 %1281 }
 0x576   : > { %3062 = vrcp.f32 %v1282_v54 }
 0x579   : > { %v1285_v55 = vpop.xlane.xlu0 %1284 }
 0x57a   : > { %3064 = vrcp.f32 %v1285_v55 }
 0x57d   : > { %v1288_v56 = vpop.xlane.xlu1 %1287  ;;  %v1451_v46 = vpop.permute.xlu0 %1450 }
 0x57e   : > { %3066 = vrcp.f32 %v1288_v56  ;;  %v1456_v63 = vsel %vm1307_vm6, %v1451_v46, 0 }
 0x580   : > { %v3063_v41 = vpop.eup %3062 }
 0x581   : > { %v1294_v57 = vmul.f32 %v3063_v41, %v3055_v42  ;;  %v1402_v58 = vpop.permute.xlu1 %1401  ;;  %v2668_v41 = vld [vmem:[%s4055_s12] ss:$0 sm:$0xff] }
 0x582   : > { %v1407_v59 = vsel %vm1307_vm6, %v1402_v58, 0  ;;  %v2669_v58 = vld [vmem:[%s4056_s13] ss:$0 sm:$0xff] }
 0x583   : > { %2816 = vmatpush3.bf16.msra.mxu0 %v1407_v59  ;;  %v1298_v60 = vpack.c.bf16 %v1294_v57, %v1294_v57 }
 0x584   : > { %v3065_v61 = vpop.eup %3064  ;;  %2827 = vmatprep.subr.bf16.mxu0 %v3343_v9 }
 0x585   : > { %v1295_v62 = vmul.f32 %v3065_v61, %v3057_v44  ;;  %2812 = vmatmul.mubr.msk.bf16.vlgmr.msra.gmra.mrb[12].mxu1 %vm1052_vm2, %v1298_v60  ;;  %v2674_v61 = vld [vmem:[#allocation7] ss:$0 sm:$0xff] }
 0x586   : > { %2822 = vmatpush3.bf16.msra.mxu1 %v1456_v63  ;;  %2823 = vmatprep.mubr.msk.bf16.mxu1 %vm3344_vm1, %v3343_v9 }
 0x587   : > { %v1299_v1 = vpack.c.bf16 %v1295_v62, %v1295_v62  ;;  %2835 = vmatprep.subr.bf16.mxu1 %v3343_v9 }
 0x588   : > { %v3067_v2 = vpop.eup %3066 }
 0x589   : > { %v1296_v3 = vmul.f32 %v3067_v2, %v3059_v47  ;;  %2818 = vmatmul.mubr.msk.bf16.vlgmr.msra.gmra.mrb[16].mxu0 %vm1052_vm2, %v1299_v1 }
 0x58a   : > { %2831 = vmatprep.mubr.msk.bf16.mxu0 %vm3344_vm1, %v3343_v9  ;;  %2828 = vmatpush3.bf16.msra.mxu0 %v3036_v10 }
 0x58b   : > { %v1300_v4 = vpack.c.bf16 %v1296_v3, %v1296_v3  ;;  %2829 = vmatprep.subr.bf16.mxu0 %v3343_v9 }
 0x58d   : > { %2824 = vmatmul.mubr.msk.bf16.vlgmr.msra.gmra.mrb[16].mxu1 %vm1052_vm2, %v1300_v4 }
 0x58e   : > { %2839 = vmatprep.mubr.msk.bf16.mxu1 %vm3344_vm1, %v3343_v9  ;;  %2830 = vmatpush3.bf16.msra.mxu0 %v3037_v11 }
 0x58f   : > { %2843 = vmatprep.subr.bf16.mxu0 %v3343_v9  ;;  %2836 = vmatpush3.bf16.msra.mxu1 %v3040_v50 }
 0x590   : > { %2837 = vmatprep.subr.bf16.mxu1 %v3343_v9 }
 0x593   : > { %2838 = vmatpush3.bf16.msra.mxu1 %v3041_v51 }
 0x594   : > { %2851 = vmatprep.subr.bf16.mxu1 %v3343_v9 }
 0x5ef   : > { %v1345_v5 = vpop.f32.mrb[12].mxu0 }
 0x5f0   : > { %v2807_v6 = vpop.f32.mrb[13].mxu0 }
 0x5f1   : > { %v1348_v7 = vpop.f32.mrb[14].mxu0 }
 0x5f2   : > { %v2808_v8 = vpop.f32.mrb[15].mxu0 }
 0x658   : > { %v1394_v12 = vpop.f32.mrb[12].mxu1 }
 0x659   : > { %1499 = vrot.lane.b32.xlu1 %v1394_v12, %s4081_s0  ;;  %v2813_v13 = vpop.f32.mrb[13].mxu1 }
 0x65a   : > { %v1397_v14 = vpop.f32.mrb[14].mxu1 }
 0x65b   : > { %v2814_v15 = vpop.f32.mrb[15].mxu1 }
 0x65c   : > { %v1443_v16 = vpop.f32.mrb[16].mxu0 }
 0x65d   : > { %1503 = vrot.lane.b32.xlu0 %v1443_v16, %s4080_s28  ;;  %v2819_v17 = vpop.f32.mrb[17].mxu0 }
 0x65e   : > { %v1446_v18 = vpop.f32.mrb[18].mxu0  ;;  %v2670_v17 = vld [vmem:[#allocation5] ss:$0 sm:$0xff] }
 0x65f   : > { %v2820_v19 = vpop.f32.mrb[19].mxu0 }
 0x660   : > { %v1492_v20 = vpop.f32.mrb[16].mxu1 }
 0x661   : > { %1507 = vrot.lane.b32.xlu1 %v1492_v20, %s4079_s3  ;;  %v2825_v21 = vpop.f32.mrb[17].mxu1  ;;  %s4122_s3 = sld [smem:[#allocation24_spill]] }
 0x662   : > { %v1495_v22 = vpop.f32.mrb[18].mxu1 }
 0x663   : > { %v2826_v23 = vpop.f32.mrb[19].mxu1 }
 0x667   : > { %s848_s28 = scalar_lea.vmem %s4122_s3, %s2704_s2  ;;  %s4127_s3 = smov 8  }
 0x668   : > { %v855_v45 = vld [vmem:[%s848_s28] sm:$0xff]  ;;  %v856_v47 = vld [vmem:[%s848_s28 + $0x8] sm:$0x3]  ;;  %s4128_s28 = smov 16   ;;  %s4129_s2 = smov 24  }
 0x669   : > { %v1686_v49 = vpack.c.bf16 %v856_v47, %v855_v45 }
 0x6cb   : > { %v1500_v24 = vpop.permute.xlu1 %1499 }
 0x6cc   : > { %v1510_v26 = vsel %vm1052_vm2, %v1345_v5, %v1500_v24 }
 0x6cf   : > { %v1504_v25 = vpop.permute.xlu0 %1503 }
 0x6d0   : > { %v1512_v27 = vsel %vm1511_vm7, %v1510_v26, %v1504_v25 }
 0x6d3   : > { %v1508_v28 = vpop.permute.xlu1 %1507 }
 0x6d4   : > { %v1514_v29 = vsel %vm1513_vm8, %v1512_v27, %v1508_v28 }
 0x6d5   : > { %v1515_v30 = vpack.c.bf16 %v1514_v29, %v1514_v29 }
 0x6d7   : > { %2832 = vmatmul.mubr.msk.bf16.vlgmr.msra.gmra.mrb[20].mxu0 %vm859_vm0, %v1515_v30 }
 0x6d8   : > { %2847 = vmatprep.mubr.msk.bf16.mxu0 %vm3344_vm1, %v3343_v9  ;;  %2844 = vmatpush3.bf16.msra.mxu0 %v3038_v39 }
 0x6d9   : > { %2845 = vmatprep.subr.bf16.mxu0 %v3343_v9 }
 0x6dc   : > { %2846 = vmatpush3.bf16.msra.mxu0 %v3039_v48 }
 0x6dd   : > { %2857 = vmatprep.subr.bf16.mxu0 %v3343_v9 }
 0x6df   : > { %2848 = vmatmul.mubr.msk.bf16.vlgmr.msra.gmra.mrb[24].mxu0 %vm859_vm0, %v1686_v49 }
 0x6e0   : > { %2859 = vmatprep.mubr.msk.bf16.mxu0 %vm3344_vm1, %v3343_v9 }
 0x7aa   : > { %v1565_v32 = vpop.f32.mrb[20].mxu0 }
 0x7ab   : > { %v1571_v33 = vadd.f32 %v1565_v32, %v3708_v0  ;;  %v2833_v34 = vpop.f32.mrb[21].mxu0 }
 0x7ac   : > { %v1568_v35 = vpop.f32.mrb[22].mxu0 }
 0x7ad   : > { %v3866_v36 = vadd.f32 %v2667_v31, %v1571_v33  ;;  %v2834_v37 = vpop.f32.mrb[23].mxu0 }
 0x7af   : > { %v1581_v38 = vsel %vm859_vm0, %v3866_v36, 0.0 }
 0x7b0   : > { %1582 = vadd.xlane.f32.xlu0 %v1581_v38 }
 0x7b2   : > { %v1742_v62 = vpop.f32.mrb[24].mxu0 }
 0x7b3   : > { %v1743_v63 = vadd.f32 %v2674_v61, %v1742_v62  ;;  %v2849_v1 = vpop.f32.mrb[25].mxu0 }
 0x7b4   : > { %v1745_v2 = vpop.f32.mrb[26].mxu0 }
 0x7b5   : > { %v1746_v3 = vadd.f32 %v2674_v61, %v1745_v2  ;;  %v2850_v4 = vpop.f32.mrb[27].mxu0 }
 0x7b7   : > { %v3022_v5 = vpack.i.bf16 %v1746_v3, %v1743_v63  ;;  %v3904_v6 = vpack.c.bf16 %v1746_v3, %v1743_v63 }
 0x7b9   : > { %v1791_v7 = vsel %vm1052_vm2, %v3904_v6, 0 }
 0x7c6   : > { %3018 = vrot.lane.b32.xlu0 %v3022_v5, %s3345_s18 }
 0x83d   : > { %v1583_v40 = vpop.xlane.xlu0 %1582 }
 0x83e   : > { %v1584_v42 = vmul.f32 0.03125, %v1583_v40 }
 0x840   : > { %v1585_v0 = vsub.f32 %v3866_v36, %v1584_v42 }
 0x841   : > { %v3019_v8 = vpop.permute.xlu0 %3018 }
 0x842   : > { %v1586_v43 = vmul.f32 %v1585_v0, %v1585_v0  ;;  %v3021_v10 = vunpack.i.h.bf16 %v3019_v8  ;;  %v3020_v11 = vunpack.i.l.bf16 %v3019_v8 }
 0x844   : > { %v1587_v44 = vsel %vm859_vm0, %v1586_v43, 0.0  ;;  %v3912_v12 = vpack.c.bf16 %v3021_v10, %v3020_v11 }
 0x845   : > { %1588 = vadd.xlane.f32.xlu1 %v1587_v44 }
 0x846   : > { %v1837_v13 = vsel %vm1052_vm2, %v3912_v12, 0 }
 0x847   : > { %2858 = vmatpush3.bf16.xpose.msra.mxu0 %v1837_v13 }
 0x848   : > { %2869 = vmatprep.subr.bf16.mxu0 %v3343_v9 }
 0x856   : > { %3023 = vrot.lane.b32.xlu1 %v3022_v5, %s3346_s30 }
 0x85a   : > { %3028 = vrot.lane.b32.xlu1 %v3022_v5, %s3347_s27 }
 0x8d2   : > { %v1589_v52 = vpop.xlane.xlu1 %1588 }
 0x8d3   : > { %v1590_v54 = vmul.f32 0.03125, %v1589_v52 }
 0x8d5   : > { %v1591_v55 = vadd.f32 1e-05, %v1590_v54 }
 0x8d6   : > { %v3024_v14 = vpop.permute.xlu1 %3023 }
 0x8d7   : > { %3068 = vrsqrt.f32 %v1591_v55  ;;  %v3026_v15 = vunpack.i.h.bf16 %v3024_v14  ;;  %v3025_v16 = vunpack.i.l.bf16 %v3024_v14 }
 0x8d9   : > { %v3917_v18 = vpack.c.bf16 %v3026_v15, %v3025_v16 }
 0x8da   : > { %v3029_v26 = vpop.permute.xlu1 %3028 }
 0x8db   : > { %v1883_v25 = vsel %vm1052_vm2, %v3917_v18, 0  ;;  %v3031_v27 = vunpack.i.h.bf16 %v3029_v26  ;;  %v3030_v28 = vunpack.i.l.bf16 %v3029_v26 }
 0x8dd   : > { %v3928_v29 = vpack.c.bf16 %v3031_v27, %v3030_v28 }
 0x8df   : > { %v1929_v32 = vsel %vm1052_vm2, %v3928_v29, 0 }
 0x8e1   : > { %v3069_v56 = vpop.eup %3068 }
 0x8e2   : > { %v1593_v57 = vmul.f32 %v3069_v56, %v1585_v0 }
 0x8e4   : > { %v1600_v46 = vmul.f32 %v2668_v41, %v1593_v57 }
 0x8e6   : > { %v1607_v59 = vadd.f32 %v2669_v58, %v1600_v46 }
 0x8e8   : > { %v1624_v60 = vpack.c.bf16 %v1607_v59, %v1607_v59 }
 0x8ea   : > { %2840 = vmatmul.mubr.msk.bf16.vlgmr.msra.gmra.mrb[20].mxu1 %vm859_vm0, %v1624_v60 }
 0x8eb   : > { %2853 = vmatprep.mubr.msk.bf16.mxu1 %vm3344_vm1, %v3343_v9  ;;  %2852 = vmatpush3.bf16.xpose.msra.mxu1 %v1791_v7 }
 0x8ec   : > { %2863 = vmatprep.subr.bf16.mxu1 %v3343_v9 }
 0x9bd   : > { %v1680_v19 = vpop.f32.mrb[20].mxu1 }
 0x9be   : > { %v1681_v20 = vadd.f32 %v2670_v17, %v1680_v19  ;;  %v2841_v21 = vpop.f32.mrb[21].mxu1 }
 0x9bf   : > { %v1683_v22 = vpop.f32.mrb[22].mxu1 }
 0x9c0   : > { %v1779_v23 = vpack.c.bf16 %v1681_v20, %v1681_v20  ;;  %v2842_v24 = vpop.f32.mrb[23].mxu1  ;;  %1756 = vrot.lane.b32.xlu1 %v1681_v20, %s3347_s27  ;;  %1750 = vrot.lane.b32.xlu0 %v1681_v20, %s3345_s18  ;;  %s1608_s18 = sld [smem:[#allocation4 + %s3499_s6]]  ;;  %s4125_s6 = smov 96  }
 0x9c2   : > { %2854 = vmatmul.mubr.msk.bf16.vlgmr.msra.gmra.mrb[24].mxu1 %vm1052_vm2, %v1779_v23 }
 0x9c3   : > { %2864 = vmatpush3.bf16.xpose.msra.mxu1 %v1883_v25  ;;  %2865 = vmatprep.mubr.msk.bf16.mxu1 %vm3344_vm1, %v3343_v9 }
 0x9c4   : > { %1753 = vrot.lane.b32.xlu0 %v1681_v20, %s3346_s30  ;;  %2875 = vmatprep.subr.bf16.mxu1 %v3343_v9 }
 0x9c6   : > { %v1975_v38 = vstv %s1608_s18  ;;  %s852_s18 = scalar_lea.vmem %s4069_s26, %s4130_s1 }
 0x9c7   : > { %vm3944_vm9 = vcmp.lt.s32.totalorder %v3793_v53, %v1975_v38 }
 0xa32   : > { %v1751_v30 = vpop.permute.xlu0 %1750  ;;  %v1757_v35 = vpop.permute.xlu1 %1756 }
 0xa33   : > { %v1780_v31 = vpack.c.bf16 %v1751_v30, %v1751_v30  ;;  %v1782_v37 = vpack.c.bf16 %v1757_v35, %v1757_v35 }
 0xa35   : > { %2860 = vmatmul.mubr.msk.bf16.vlgmr.msra.gmra.mrb[28].mxu0 %vm1052_vm2, %v1780_v31 }
 0xa36   : > { %2870 = vmatpush3.bf16.xpose.msra.mxu0 %v1929_v32  ;;  %v1754_v33 = vpop.permute.xlu0 %1753  ;;  %2871 = vmatprep.mubr.msk.bf16.mxu0 %vm3344_vm1, %v3343_v9 }
 0xa37   : > { %v1781_v34 = vpack.c.bf16 %v1754_v33, %v1754_v33  ;;  %2881 = vmatprep.subr.bf16.mxu0 %v3343_v9 }
 0xa39   : > { %2866 = vmatmul.mubr.msk.bf16.vlgmr.msra.gmra.mrb[28].mxu1 %vm1052_vm2, %v1781_v34 }
 0xa3a   : > { %2877 = vmatprep.mubr.msk.bf16.mxu1 %vm3344_vm1, %v3343_v9 }
 0xa3d   : > { %2872 = vmatmul.mubr.msk.bf16.vlgmr.msra.gmra.mrb[32].mxu0 %vm1052_vm2, %v1782_v37 }
 0xa3e   : > { %2883 = vmatprep.mubr.msk.bf16.mxu0 %vm3344_vm1, %v3343_v9 }
 0xa95   : > { %v1827_v39 = vpop.f32.mrb[24].mxu1 }
 0xa96   : > { %v1971_v42 = vmul.f32 0.35355338, %v1827_v39  ;;  %v2855_v0 = vpop.f32.mrb[25].mxu1 }
 0xa97   : > { %v1830_v43 = vpop.f32.mrb[26].mxu1 }
 0xa98   : > { %v2856_v44 = vpop.f32.mrb[27].mxu1  ;;  %v1977_v45 = vsel %vm3944_vm9, %v1971_v42, -1e+30 }
 0xa99   : > { %v1982_v47 = vsel %vm1981_vm10, %v1977_v45, -inf }
 0xa9a   : > { %1983 = vmax.xlane.f32.xlu0 %v1982_v47 }
 0xb08   : > { %v1873_v48 = vpop.f32.mrb[28].mxu0 }
 0xb09   : > { %v1972_v49 = vmul.f32 0.35355338, %v1873_v48  ;;  %v2861_v50 = vpop.f32.mrb[29].mxu0 }
 0xb0a   : > { %v1876_v51 = vpop.f32.mrb[30].mxu0 }
 0xb0b   : > { %v2862_v52 = vpop.f32.mrb[31].mxu0  ;;  %v1978_v53 = vsel %vm3944_vm9, %v1972_v49, -1e+30 }
 0xb0c   : > { %v1919_v54 = vpop.f32.mrb[28].mxu1  ;;  %v1985_v55 = vsel %vm1981_vm10, %v1978_v53, -inf }
 0xb0d   : > { %v1973_v56 = vmul.f32 0.35355338, %v1919_v54  ;;  %v2867_v41 = vpop.f32.mrb[29].mxu1  ;;  %1986 = vmax.xlane.f32.xlu1 %v1985_v55  ;;  %v3042_v55 = vld [vmem:[%s4126_s10] sm:$0xff]  }
 0xb0e   : > { %v1922_v57 = vpop.f32.mrb[30].mxu1 }
 0xb0f   : > { %v2868_v58 = vpop.f32.mrb[31].mxu1  ;;  %v1979_v46 = vsel %vm3944_vm9, %v1973_v56, -1e+30  ;;  %v3043_v56 = vld [vmem:[%s4126_s10 + $0x8] sm:$0xff]  }
 0xb10   : > { %v1965_v59 = vpop.f32.mrb[32].mxu0  ;;  %v1988_v60 = vsel %vm1981_vm10, %v1979_v46, -inf }
 0xb11   : > { %v1974_v61 = vmul.f32 0.35355338, %v1965_v59  ;;  %1989 = vmax.xlane.f32.xlu0 %v1988_v60  ;;  %v2873_v62 = vpop.f32.mrb[33].mxu0 }
 0xb12   : > { %v1968_v63 = vpop.f32.mrb[34].mxu0 }
 0xb13   : > { %v2874_v1 = vpop.f32.mrb[35].mxu0  ;;  %v1980_v2 = vsel %vm3944_vm9, %v1974_v61, -1e+30 }
 0xb14   : > { %v1991_v3 = vsel %vm1981_vm10, %v1980_v2, -inf }
 0xb15   : > { %1992 = vmax.xlane.f32.xlu0 %v1991_v3 }
 0xb1e   : > { %2031 = vrot.lane.b32.xlu1 %v3904_v6, %s4125_s6 }
 0xb27   : > { %v1984_v4 = vpop.xlane.xlu0 %1983 }
 0xb28   : > { %v1994_v5 = vsub.f32 %v1977_v45, %v1984_v4 }
 0xb2a   : > { %v1998_v7 = vmul.f32 1.442695, %v1994_v5 }
 0xb2c   : > { %3070 = vpow2.f32 %v1998_v7 }
 0xb36   : > { %v3071_v8 = vpop.eup %3070 }
 0xb37   : > { %v2006_v10 = vsel %vm1981_vm10, %v3071_v8, 0.0 }
 0xb42   : > { %2007 = vadd.xlane.f32.xlu1 %v2006_v10 }
 0xb9a   : > { %v1987_v11 = vpop.xlane.xlu1 %1986 }
 0xb9b   : > { %v1995_v13 = vsub.f32 %v1978_v53, %v1987_v11 }
 0xb9d   : > { %v2000_v14 = vmul.f32 1.442695, %v1995_v13 }
 0xb9e   : > { %v1990_v15 = vpop.xlane.xlu0 %1989  ;;  %v2032_v16 = vpop.permute.xlu1 %2031 }
 0xb9f   : > { %3072 = vpow2.f32 %v2000_v14  ;;  %v1996_v17 = vsub.f32 %v1979_v46, %v1990_v15  ;;  %v2038_v19 = vsel %vm2036_vm11, %v2032_v16, 0  ;;  %v2689_v14 = vld [vmem:[#allocation9] ss:$0 sm:$0xff] }
 0xba0   : > { %2876 = vmatpush3.bf16.msra.mxu1 %v2038_v19 }
 0xba1   : > { %v2002_v6 = vmul.f32 1.442695, %v1996_v17  ;;  %2887 = vmatprep.subr.bf16.mxu1 %v3343_v9 }
 0xba2   : > { %v1993_v20 = vpop.xlane.xlu0 %1992 }
 0xba3   : > { %3074 = vpow2.f32 %v2002_v6  ;;  %v1997_v21 = vsub.f32 %v1980_v2, %v1993_v20 }
 0xba5   : > { %v2004_v22 = vmul.f32 1.442695, %v1997_v21 }
 0xba7   : > { %3076 = vpow2.f32 %v2004_v22 }
 0xba9   : > { %v3073_v23 = vpop.eup %3072 }
 0xbaa   : > { %v2009_v24 = vsel %vm1981_vm10, %v3073_v23, 0.0 }
 0xbab   : > { %2010 = vadd.xlane.f32.xlu0 %v2009_v24 }
 0xbad   : > { %v3075_v25 = vpop.eup %3074 }
 0xbae   : > { %v2012_v26 = vsel %vm1981_vm10, %v3075_v25, 0.0 }
 0xbaf   : > { %2013 = vadd.xlane.f32.xlu1 %v2012_v26 }
 0xbb1   : > { %v3077_v27 = vpop.eup %3076 }
 0xbb2   : > { %v2015_v28 = vsel %vm1981_vm10, %v3077_v27, 0.0 }
 0xbb3   : > { %2016 = vadd.xlane.f32.xlu0 %v2015_v28  ;;  %v3046_v28 = vld [vmem:[%s4067_s24] sm:$0xff]  }
 0xbc0   : > { %2130 = vrot.lane.b32.xlu1 %v3917_v18, %s4125_s6 }
 0xbc4   : > { %2179 = vrot.lane.b32.xlu1 %v3928_v29, %s4125_s6 }
 0xbc9   : > { %2081 = vrot.lane.b32.xlu0 %v3912_v12, %s4125_s6 }
 0xbcf   : > { %v2008_v30 = vpop.xlane.xlu1 %2007 }
 0xbd0   : > { %3078 = vrcp.f32 %v2008_v30  ;;  %v3047_v30 = vld [vmem:[%s4067_s24 + $0x8] sm:$0xff]  }
 0xbda   : > { %v3079_v31 = vpop.eup %3078 }
 0xbdb   : > { %v2022_v32 = vmul.f32 %v3079_v31, %v3071_v8 }
 0xbdd   : > { %v2026_v33 = vpack.c.bf16 %v2022_v32, %v2022_v32 }
 0xbdf   : > { %2878 = vmatmul.mubr.msk.bf16.vlgmr.msra.gmra.mrb[32].mxu1 %vm1981_vm10, %v2026_v33 }
 0xbe0   : > { %2889 = vmatprep.mubr.msk.bf16.mxu1 %vm3344_vm1, %v3343_v9 }
 0xc38   : > { %v2011_v34 = vpop.xlane.xlu0 %2010 }
 0xc39   : > { %3080 = vrcp.f32 %v2011_v34 }
 0xc3c   : > { %v2014_v35 = vpop.xlane.xlu1 %2013 }
 0xc3d   : > { %3082 = vrcp.f32 %v2014_v35  ;;  %v2690_v35 = vld [vmem:[#allocation10] ss:$0 sm:$0xff] }
 0xc40   : > { %v2131_v18 = vpop.permute.xlu1 %2130  ;;  %v2017_v37 = vpop.xlane.xlu0 %2016 }
 0xc41   : > { %v2136_v29 = vsel %vm2036_vm11, %v2131_v18, 0  ;;  %3084 = vrcp.f32 %v2017_v37  ;;  %v2691_v37 = vld [vmem:[#allocation12] ss:$0 sm:$0xff] }
 0xc42   : > { %2888 = vmatpush3.bf16.msra.mxu1 %v2136_v29 }
 0xc43   : > { %v3081_v12 = vpop.eup %3080  ;;  %2899 = vmatprep.subr.bf16.mxu1 %v3343_v9 }
 0xc44   : > { %v2023_v38 = vmul.f32 %v3081_v12, %v3073_v23  ;;  %v2082_v39 = vpop.permute.xlu0 %2081  ;;  %v2180_v42 = vpop.permute.xlu1 %2179 }
 0xc45   : > { %v2087_v40 = vsel %vm2036_vm11, %v2082_v39, 0  ;;  %v2185_v45 = vsel %vm2036_vm11, %v2180_v42, 0  ;;  %v3048_v39 = vld [vmem:[%s4067_s24 + $0x10] sm:$0xff]   ;;  %v2692_v42 = vld [vmem:[#allocation13] ss:$0 sm:$0xff] }
 0xc46   : > { %2882 = vmatpush3.bf16.msra.mxu0 %v2087_v40  ;;  %v2027_v0 = vpack.c.bf16 %v2023_v38, %v2023_v38  ;;  %v3049_v40 = vld [vmem:[%s4067_s24 + $0x18] sm:$0xff]  }
 0xc47   : > { %v3083_v43 = vpop.eup %3082  ;;  %2893 = vmatprep.subr.bf16.mxu0 %v3343_v9 }
 0xc48   : > { %v2024_v44 = vmul.f32 %v3083_v43, %v3075_v25 }
 0xc49   : > { %2884 = vmatmul.mubr.msk.bf16.vlgmr.msra.gmra.mrb[36].mxu0 %vm1981_vm10, %v2027_v0 }
 0xc4a   : > { %2894 = vmatpush3.bf16.msra.mxu0 %v2185_v45  ;;  %v2028_v47 = vpack.c.bf16 %v2024_v44, %v2024_v44  ;;  %2895 = vmatprep.mubr.msk.bf16.mxu0 %vm3344_vm1, %v3343_v9 }
 0xc4b   : > { %v3085_v48 = vpop.eup %3084  ;;  %2907 = vmatprep.subr.bf16.mxu0 %v3343_v9 }
 0xc4c   : > { %v2025_v49 = vmul.f32 %v3085_v48, %v3077_v27  ;;  %2890 = vmatmul.mubr.msk.bf16.vlgmr.msra.gmra.mrb[36].mxu1 %vm1981_vm10, %v2028_v47  ;;  %v3044_v27 = vld [vmem:[%s4065_s22] sm:$0xff]  }
 0xc4d   : > { %2903 = vmatprep.mubr.msk.bf16.mxu1 %vm3344_vm1, %v3343_v9  ;;  %2900 = vmatpush3.bf16.msra.mxu1 %v3042_v55 }
 0xc4e   : > { %v2029_v50 = vpack.c.bf16 %v2025_v49, %v2025_v49  ;;  %2901 = vmatprep.subr.bf16.mxu1 %v3343_v9 }
 0xc51   : > { %2896 = vmatmul.mubr.msk.bf16.vlgmr.msra.gmra.mrb[40].mxu0 %vm1981_vm10, %v2029_v50  ;;  %2902 = vmatpush3.bf16.msra.mxu1 %v3043_v56  ;;  %v2696_v50 = vld [vmem:[#allocation15] ss:$0 sm:$0xff] }
 0xc52   : > { %2911 = vmatprep.mubr.msk.bf16.mxu0 %vm3344_vm1, %v3343_v9  ;;  %2915 = vmatprep.subr.bf16.mxu1 %v3343_v9 }
 0xc53   : > { %2908 = vmatpush3.bf16.msra.mxu0 %v3044_v27 }
 0xc54   : > { %2909 = vmatprep.subr.bf16.mxu0 %v3343_v9 }
 0xcb2   : > { %v2074_v51 = vpop.f32.mrb[32].mxu1 }
 0xcb3   : > { %v2879_v52 = vpop.f32.mrb[33].mxu1 }
 0xcb4   : > { %v2077_v53 = vpop.f32.mrb[34].mxu1 }
 0xcb5   : > { %v2880_v54 = vpop.f32.mrb[35].mxu1 }
 0xd1c   : > { %v2123_v41 = vpop.f32.mrb[36].mxu0 }
 0xd1d   : > { %2228 = vrot.lane.b32.xlu0 %v2123_v41, %s4127_s3  ;;  %v2885_v57 = vpop.f32.mrb[37].mxu0 }
 0xd1e   : > { %v2126_v58 = vpop.f32.mrb[38].mxu0 }
 0xd1f   : > { %v2886_v46 = vpop.f32.mrb[39].mxu0  ;;  %v2172_v59 = vpop.f32.mrb[36].mxu1 }
 0xd20   : > { %2232 = vrot.lane.b32.xlu1 %v2172_v59, %s4128_s28  ;;  %v2891_v60 = vpop.f32.mrb[37].mxu1 }
 0xd21   : > { %v2175_v61 = vpop.f32.mrb[38].mxu1 }
 0xd22   : > { %v2892_v62 = vpop.f32.mrb[39].mxu1 }
 0xd24   : > { %v2221_v63 = vpop.f32.mrb[40].mxu0 }
 0xd25   : > { %2236 = vrot.lane.b32.xlu0 %v2221_v63, %s4129_s2  ;;  %v2897_v1 = vpop.f32.mrb[41].mxu0 }
 0xd26   : > { %v2224_v2 = vpop.f32.mrb[42].mxu0 }
 0xd27   : > { %v2898_v3 = vpop.f32.mrb[43].mxu0 }
 0xd8f   : > { %v2229_v4 = vpop.permute.xlu0 %2228 }
 0xd90   : > { %v2239_v7 = vsel %vm1052_vm2, %v2074_v51, %v2229_v4 }
 0xd92   : > { %v2233_v5 = vpop.permute.xlu1 %2232 }
 0xd93   : > { %v2240_v8 = vsel %vm1511_vm7, %v2239_v7, %v2233_v5 }
 0xd97   : > { %v2237_v10 = vpop.permute.xlu0 %2236 }
 0xd98   : > { %v2241_v11 = vsel %vm1513_vm8, %v2240_v8, %v2237_v10 }
 0xd99   : > { %v2242_v13 = vpack.c.bf16 %v2241_v11, %v2241_v11 }
 0xd9b   : > { %2904 = vmatmul.mubr.msk.bf16.vlgmr.msra.gmra.mrb[40].mxu1 %vm859_vm0, %v2242_v13 }
 0xd9c   : > { %2923 = vmatprep.mubr.msk.bf16.mxu1 %vm3344_vm1, %v3343_v9  ;;  %2916 = vmatpush3.bf16.msra.mxu1 %v3046_v28 }
 0xd9d   : > { %2917 = vmatprep.subr.bf16.mxu1 %v3343_v9 }
 0xda0   : > { %2918 = vmatpush3.bf16.msra.mxu1 %v3047_v30 }
 0xda1   : > { %2919 = vmatprep.subr.bf16.mxu1 %v3343_v9 }
 0xda4   : > { %2920 = vmatpush3.bf16.msra.mxu1 %v3048_v39 }
 0xda5   : > { %2921 = vmatprep.subr.bf16.mxu1 %v3343_v9 }
 0xda8   : > { %2922 = vmatpush3.bf16.msra.mxu1 %v3049_v40 }
 0xe6e   : > { %v2292_v15 = vpop.f32.mrb[40].mxu1 }
 0xe6f   : > { %v2298_v16 = vadd.f32 %v2292_v15, %v3866_v36  ;;  %v2905_v17 = vpop.f32.mrb[41].mxu1  ;;  %v3045_v36 = vld [vmem:[%s4065_s22 + $0x8] sm:$0xff]  }
 0xe70   : > { %v2295_v19 = vpop.f32.mrb[42].mxu1  ;;  %2910 = vmatpush3.bf16.msra.mxu0 %v3045_v36 }
 0xe71   : > { %v2305_v6 = vadd.f32 %v2689_v14, %v2298_v16  ;;  %v2906_v20 = vpop.f32.mrb[43].mxu1 }
 0xe73   : > { %v2308_v21 = vsel %vm859_vm0, %v2305_v6, 0.0 }
 0xe74   : > { %2309 = vadd.xlane.f32.xlu1 %v2308_v21 }
 0xf01   : > { %v2310_v22 = vpop.xlane.xlu1 %2309 }
 0xf02   : > { %v2311_v23 = vmul.f32 0.03125, %v2310_v22 }
 0xf04   : > { %v2312_v24 = vsub.f32 %v2305_v6, %v2311_v23 }
 0xf06   : > { %v2313_v25 = vmul.f32 %v2312_v24, %v2312_v24 }
 0xf08   : > { %v2314_v26 = vsel %vm859_vm0, %v2313_v25, 0.0 }
 0xf09   : > { %2315 = vadd.xlane.f32.xlu0 %v2314_v26 }
 0xf96   : > { %v2316_v31 = vpop.xlane.xlu0 %2315 }
 0xf97   : > { %v2317_v32 = vmul.f32 0.03125, %v2316_v31 }
 0xf99   : > { %v2318_v33 = vadd.f32 1e-05, %v2317_v32 }
 0xf9b   : > { %3086 = vrsqrt.f32 %v2318_v33 }
 0xfa5   : > { %v3087_v34 = vpop.eup %3086 }
 0xfa6   : > { %v2320_v18 = vmul.f32 %v3087_v34, %v2312_v24 }
 0xfa8   : > { %v2327_v29 = vmul.f32 %v2690_v35, %v2320_v18 }
 0xfaa   : > { %v2334_v12 = vadd.f32 %v2691_v37, %v2327_v29 }
 0xfac   : > { %v2335_v38 = vpack.c.bf16 %v2334_v12, %v2334_v12 }
 0xfae   : > { %2912 = vmatmul.mubr.msk.bf16.vlgmr.msra.gmra.mrb[44].mxu0 %vm859_vm0, %v2335_v38 }
0x1081   : > { %v2396_v0 = vpop.f32.mrb[44].mxu0 }
0x1082   : > { %v2397_v43 = vadd.f32 %v2692_v42, %v2396_v0  ;;  %v2913_v44 = vpop.f32.mrb[45].mxu0 }
0x1083   : > { %v2399_v45 = vpop.f32.mrb[46].mxu0 }
0x1084   : > { %v2402_v47 = vmax.f32 %v2397_v43, 0.0  ;;  %v2914_v48 = vpop.f32.mrb[47].mxu0 }
0x1086   : > { %v2403_v49 = vpack.c.bf16 %v2402_v47, %v2402_v47 }
0x1088   : > { %2924 = vmatmul.mubr.msk.bf16.vlgmr.msra.gmra.mrb[44].mxu1 %vm2443_vm12, %v2403_v49 }
0x115b   : > { %v2481_v51 = vpop.f32.mrb[44].mxu1 }
0x115c   : > { %v2482_v52 = vadd.f32 %v2696_v50, %v2481_v51  ;;  %v2925_v9 = vpop.f32.mrb[45].mxu1 }
0x115d   : > { %v2484_v53 = vpop.f32.mrb[46].mxu1 }
0x115e   : > { %v2487_v54 = vadd.f32 %v2482_v52, %v2305_v6  ;;  %v2926_v55 = vpop.f32.mrb[47].mxu1 }
0x1160   : > { %2488 = vst.msk [vmem:[%s852_s18] sm:$0xff] %vm859_vm0, %v2487_v54 }
0x1161 PF: > { %s4131_s6 = sld [smem:[#allocation21_spill]] }
0x1167   : > { %s50_s1 = sadd.s32 1, %s4131_s6  }
0x1168   : > { %p47_p7 = scmp.ge.s32.totalorder %s50_s1, 4  }
0x116a   :  { %49 = sbr.rel (!%p47_p7) target bundleno = 42 (0x2a), region = 178 }
0x1171   :  { %2508 = vsyncpa [#allocation6], 1 }
0x1172   :  { %2510 = vsyncpa [#allocation6 + $0x1], 1 }
0x1173   :  { %2511 = vsyncpa [#allocation8], 1 }
0x1174   :  { %2512 = vsyncpa [#allocation11], 1 }
0x1175   :  { %2513 = vsyncpa [#allocation14], 1 }

</bundles_post_ra>
